<compile_context>
chip_gen: v6e
topology: v6e:2x2x1
jax: 0.10.0
libtpu: 0.0.40
codegen_flags: <defaults>
</compile_context>

<pallas_src>
import jax
import jax.numpy as jnp
import numpy as np
from jax import lax
from jax.experimental import pallas as pl
from jax.experimental.pallas import tpu as pltpu

# ----------------------- configuration (mirrors module __init__) ------------
EMBED_DIM = 300              # fixed by the module (GloVe 300d)
HIDDEN_DIM = 32              # args.hidden_dim
BATCH = 4                    # args.batch_size
SEQ = 8
VOC = 50                     # len(word_to_ix)
CONC_FEATURES = 37
GAUSSIAN_NUM = 10            # bins
BIN_W = 0.2                  # GaussianBinner width factor
NB = GAUSSIAN_NUM + 2        # 12
BINNED = CONC_FEATURES * NB  # 444
MLP_D = BINNED // 2          # 222
INPUTDIM2 = HIDDEN_DIM * 2 + MLP_D   # 286
FINAL_MLP_D = INPUTDIM2 // 2         # 143
BN_EPS = 1e-5
BIN_EPS = 1e-6

# lane-aligned padded sizes used by the fused kernel
VOC_PAD = 64                 # 52  -> 64   (one-hot lookup rows)
BIN_PAD = 512                # 444 -> 512  (binned features)
MLP_PAD = 256                # 222 / 143 -> 256
SLAB_W = 256                 # weight-slab lane width (== 4*2*HIDDEN_DIM == MLP_PAD)
OUT_PAD = 128                # widened output lanes (lane 0 real)
SP_PAD = 128                 # sparse-features lane pad (37 -> 128)

# weight-slab row offsets (all multiples of 16 -> tile-aligned bf16 slices)
W_TABLE, W_WHH, W_F2W1, W_F2W2 = 0, 64, 96, 608
W_W1A, W_W1B, W_W1C, W_HW2, W_HW3 = 864, 896, 928, 1184, 1440
W_ROWS = 1696
# bias/pattern-slab rows
ROW_F2B1, ROW_F2B2, ROW_HB1, ROW_HB2, ROW_HB3, ROW_JPAT, ROW_BMASK = 0, 1, 2, 3, 4, 5, 6


def _vmem():
    return pl.BlockSpec(memory_space=pltpu.MemorySpace.VMEM)


# ------------------------------ fused forward kernel -------------------------
def _fused_kernel(tok_ref, sparse_ref, w_ref, b_ref, out_ref):
    B, T, H = BATCH, SEQ, HIDDEN_DIM
    G = 4 * H                     # 128 = one lane group of LSTM gates
    TB = T * B
    f32, bf16 = jnp.float32, jnp.bfloat16

    # ---- embedding + input projection + gate bias: one fused one-hot lookup ----
    tok = tok_ref[...]                                                 # (TB,1) int32
    onehot = (lax.broadcasted_iota(jnp.int32, (TB, VOC_PAD), 1) == tok)
    onehot = onehot.astype(f32).astype(bf16)                           # exact 0/1
    gx = jnp.dot(onehot, w_ref[W_TABLE:W_TABLE + VOC_PAD, :],
                 preferred_element_type=f32)                           # (TB,2G) = x@Wih + b

    whh = w_ref[W_WHH:W_WHH + H, 0:G]                                  # (H,G) bf16

    def cell(g, c_prev=None):
        i = jax.nn.sigmoid(g[:, 0:H])
        gg = jnp.tanh(g[:, 2 * H:3 * H])
        o = jax.nn.sigmoid(g[:, 3 * H:4 * H])
        if c_prev is None:                       # zero initial state: f*c_prev == 0
            c = i * gg
        else:
            f = jax.nn.sigmoid(g[:, H:2 * H])
            c = f * c_prev + i * gg
        return o * jnp.tanh(c), c

    # forward direction, fully unrolled; t=0 skips the h@Whh matmul (h0 == 0)
    h, c = cell(gx[0:B, 0:G])
    for t in range(1, T):
        g = gx[t * B:(t + 1) * B, 0:G] + jnp.dot(h.astype(bf16), whh,
                                                 preferred_element_type=f32)
        h, c = cell(g, c)
    h_fwd = h
    # backward direction: lstm_out[-1] only needs the FIRST backward step, which
    # sees x[T-1] from a zero state -> no Whh_r matmul at all.
    h_bwd, _ = cell(gx[(T - 1) * B:TB, G:2 * G])

    # ---- GaussianBinner (lane-dense; repeat / group-sum as iota-built 0/1 matmuls)
    lane = lax.broadcasted_iota(jnp.int32, (SP_PAD, BIN_PAD), 1)
    feat = lax.broadcasted_iota(jnp.int32, (SP_PAD, BIN_PAD), 0)
    d = lane - feat * NB
    rep = jnp.where((d >= 0) & (d < NB), 1.0, 0.0)                     # (128,512) "R"
    lane_t = lax.broadcasted_iota(jnp.int32, (BIN_PAD, SP_PAD), 0)
    feat_t = lax.broadcasted_iota(jnp.int32, (BIN_PAD, SP_PAD), 1)
    dt = lane_t - feat_t * NB
    rep_t = jnp.where((dt >= 0) & (dt < NB), 1.0, 0.0)                 # (512,128) "R^T"

    sp = sparse_ref[...]                                               # (B,128) f32
    xr = jnp.dot(sp, rep, preferred_element_type=f32)                  # (B,512) repeat x12
    mn = jnp.min(xr, axis=0, keepdims=True)
    mx = jnp.max(xr, axis=0, keepdims=True)
    bw = (mx - mn) * (1.0 / GAUSSIAN_NUM)
    sig = jnp.where(bw == 0.0, 1.0, bw * BIN_W)      # degenerate (min==max) guard
    means = mn - 0.5 * bw + b_ref[ROW_JPAT:ROW_JPAT + 1, :] * bw
    diff = xr - means
    inv2s2 = pl.reciprocal(2.0 * sig * sig)                            # EUP slot
    proj = jnp.exp(-(diff * diff) * inv2s2) * b_ref[ROW_BMASK:ROW_BMASK + 1, :]
    s37 = jnp.dot(proj, rep_t, preferred_element_type=f32)             # (B,128) group sums
    s37 = jnp.where(s37 == 0.0, BIN_EPS, s37)
    srep = jnp.dot(s37, rep, preferred_element_type=f32)               # (B,512)
    binned = proj * pl.reciprocal(srep, approx=True)                   # pad lanes -> 0

    # ---- fc_2 -----------------------------------------------------------------
    h1 = jnp.maximum(
        jnp.dot(binned.astype(bf16), w_ref[W_F2W1:W_F2W1 + BIN_PAD, :],
                preferred_element_type=f32)
        + b_ref[ROW_F2B1:ROW_F2B1 + 1, 0:SLAB_W], 0.0)
    h2 = jnp.maximum(
        jnp.dot(h1.astype(bf16), w_ref[W_F2W2:W_F2W2 + MLP_PAD, :],
                preferred_element_type=f32)
        + b_ref[ROW_F2B2:ROW_F2B2 + 1, 0:SLAB_W], 0.0)

    # ---- label head (concat replaced by split W1; BatchNorm folded at prep) -----
    z = (jnp.dot(h_fwd.astype(bf16), w_ref[W_W1A:W_W1A + H, :],
                 preferred_element_type=f32)
         + jnp.dot(h_bwd.astype(bf16), w_ref[W_W1B:W_W1B + H, :],
                   preferred_element_type=f32)
         + jnp.dot(h2.astype(bf16), w_ref[W_W1C:W_W1C + MLP_PAD, :],
                   preferred_element_type=f32)
         + b_ref[ROW_HB1:ROW_HB1 + 1, 0:SLAB_W])
    z = jnp.maximum(z, 0.0)                          # BN1 already folded into weights
    z = jnp.maximum(
        jnp.dot(z.astype(bf16), w_ref[W_HW2:W_HW2 + MLP_PAD, :],
                preferred_element_type=f32)
        + b_ref[ROW_HB2:ROW_HB2 + 1, 0:SLAB_W], 0.0)  # BN2 folded
    out_ref[...] = (
        jnp.dot(z.astype(bf16), w_ref[W_HW3:W_HW3 + MLP_PAD, 0:OUT_PAD],
                preferred_element_type=f32)
        + b_ref[ROW_HB3:ROW_HB3 + 1, 0:OUT_PAD])      # (B,128); lane 0 real


# ------------------------------ forward (wrapper) ----------------------------
def bilstm_glove_forward(kp, tokens, conc_features):
    # time-major flattening of the token ids:  row t*B + b  <->  tokens[b, t]
    tok_tm = jnp.transpose(tokens.astype(jnp.int32), (1, 0)).reshape(SEQ * BATCH, 1)
    sparse = conc_features[:, 0, :CONC_FEATURES]                      # (B, 37)
    sparse_pad = jnp.zeros((BATCH, SP_PAD), jnp.float32).at[:, :CONC_FEATURES].set(sparse)
    # surround_features = conc_features[:, :, -200:]                  # unused, as in reference

    y = pl.pallas_call(
        _fused_kernel,
        out_shape=jax.ShapeDtypeStruct((BATCH, OUT_PAD), jnp.float32),
        in_specs=[_vmem() for _ in range(4)],
        out_specs=_vmem(),
        # ~0.9 MB resident; 32 MiB scoped limit is safe on v5e/v6e (128 MiB) and
        # v7x (64 MiB physical).
        compiler_params=pltpu.CompilerParams(vmem_limit_bytes=32 * 1024 * 1024),
    )(tok_tm, sparse_pad, kp['wslab'], kp['bslab'])
    return y[:, 0]                                                    # (B,)


# ------------------------------ parameter prep -------------------------------
def prepare_params(p):
    """One-time prep: fuse embedding @ [Wih_f|Wih_r] (+bias) into one lookup
    table, fold eval-mode BatchNorm into the preceding Linear layers, pad all
    feature dims to lane-aligned sizes (zero padding) and pack everything into
    one bf16 weight slab + one small f32 bias/pattern slab."""
    H = HIDDEN_DIM

    def pad2(a, rows, cols):
        a = jnp.asarray(a, jnp.float32)
        return jnp.zeros((rows, cols), jnp.float32).at[:a.shape[0], :a.shape[1]].set(a)

    # fused embedding + input projection + gate bias lookup table  (VOC+2, 256)
    table = jnp.concatenate(
        [p['embedding'] @ p['wih_f'] + p['b_f'],
         p['embedding'] @ p['wih_r'] + p['b_r']], axis=1)

    # eval-mode BatchNorm folded into the preceding Linear (scale into columns)
    bn1_s = p['bn1_g'] / jnp.sqrt(p['bn1_v'] + BN_EPS)
    bn1_b = p['bn1_b'] - p['bn1_m'] * bn1_s
    bn2_s = p['bn2_g'] / jnp.sqrt(p['bn2_v'] + BN_EPS)
    bn2_b = p['bn2_b'] - p['bn2_m'] * bn2_s
    w1 = p['lab_w1'] * bn1_s                 # (286,143): [h_fwd | h_bwd | learned]
    hb1 = p['lab_b1'] * bn1_s + bn1_b        # (1,143)
    hw2 = p['lab_w2'] * bn2_s                # (143,143)
    hb2 = p['lab_b2'] * bn2_s + bn2_b        # (1,143)

    wslab = jnp.concatenate([
        pad2(table, VOC_PAD, SLAB_W),          # rows    0:  64  lookup table
        pad2(p['whh_f'], H, SLAB_W),           # rows   64:  96  (cols 0:128 real)
        pad2(p['fc2_w1'], BIN_PAD, SLAB_W),    # rows   96: 608
        pad2(p['fc2_w2'], MLP_PAD, SLAB_W),    # rows  608: 864
        pad2(w1[0:H], H, SLAB_W),              # rows  864: 896  h_fwd block
        pad2(w1[H:2 * H], H, SLAB_W),          # rows  896: 928  h_bwd block
        pad2(w1[2 * H:], MLP_PAD, SLAB_W),     # rows  928:1184  learned block
        pad2(hw2, MLP_PAD, SLAB_W),            # rows 1184:1440
        pad2(p['lab_w3'], MLP_PAD, SLAB_W),    # rows 1440:1696  (col 0 real)
    ], axis=0).astype(jnp.bfloat16)
    assert wslab.shape == (W_ROWS, SLAB_W), wslab.shape

    def row(a):
        return pad2(a, 1, BIN_PAD)[0]
    jpat = jnp.zeros((BIN_PAD,), jnp.float32).at[:BINNED].set(
        jnp.tile(jnp.arange(NB, dtype=jnp.float32), CONC_FEATURES))
    bmask = jnp.zeros((BIN_PAD,), jnp.float32).at[:BINNED].set(1.0)
    bslab = jnp.stack([
        row(p['fc2_b1']), row(p['fc2_b2']), row(hb1), row(hb2), row(p['lab_b3']),
        jpat, bmask, jnp.zeros((BIN_PAD,), jnp.float32)], axis=0)      # (8,512) f32

    return {'wslab': wslab, 'bslab': bslab}


# ------------------------------ pure-JAX reference ---------------------------
def reference_forward(p, tokens, conc_features):
    emb = jnp.take(p['embedding'], tokens, axis=0)
    x = jnp.transpose(emb, (1, 0, 2))
    T, B, _ = x.shape
    H = HIDDEN_DIM

    def cell(xt, h, c, wih, whh, b):
        g = xt @ wih + h @ whh + b
        i = jax.nn.sigmoid(g[:, :H]); f = jax.nn.sigmoid(g[:, H:2 * H])
        gg = jnp.tanh(g[:, 2 * H:3 * H]); o = jax.nn.sigmoid(g[:, 3 * H:])
        c = f * c + i * gg
        return o * jnp.tanh(c), c

    hf = jnp.zeros((B, H)); cf = jnp.zeros((B, H))
    for t in range(T):
        hf, cf = cell(x[t], hf, cf, p['wih_f'], p['whh_f'], p['b_f'])
    hb = jnp.zeros((B, H)); cb = jnp.zeros((B, H))
    hb, _ = cell(x[T - 1], hb, cb, p['wih_r'], p['whh_r'], p['b_r'])
    lstm_last = jnp.concatenate([hf, hb], axis=1)      # == lstm_out[-1]

    sparse = conc_features[:, 0, :CONC_FEATURES]
    mn = sparse.min(0); mx = sparse.max(0)
    bw = (mx - mn) / GAUSSIAN_NUM; sig = bw * BIN_W
    sig = jnp.where(sig == 0.0, 1.0, sig)
    j = jnp.arange(NB, dtype=jnp.float32)
    means = (mn - 0.5 * bw)[:, None] + j[None, :] * bw[:, None]
    diff = sparse[:, :, None] - means[None]
    proj = jnp.exp(-diff * diff / (2.0 * sig * sig)[None, :, None])
    s = proj.sum(-1, keepdims=True)
    s = jnp.where(s == 0.0, BIN_EPS, s)
    binned = (proj / s).reshape(B, BINNED)

    h = jnp.maximum(binned @ p['fc2_w1'] + p['fc2_b1'], 0.0)
    learned = jnp.maximum(h @ p['fc2_w2'] + p['fc2_b2'], 0.0)
    cat = jnp.concatenate([lstm_last, learned], axis=1)

    def bn(h, g, be, m, v):
        return (h - m) / jnp.sqrt(v + BN_EPS) * g + be

    h = cat @ p['lab_w1'] + p['lab_b1']
    h = jnp.maximum(bn(h, p['bn1_g'], p['bn1_b'], p['bn1_m'], p['bn1_v']), 0.0)
    h = h @ p['lab_w2'] + p['lab_b2']
    h = jnp.maximum(bn(h, p['bn2_g'], p['bn2_b'], p['bn2_m'], p['bn2_v']), 0.0)
    y = h @ p['lab_w3'] + p['lab_b3']
    return jnp.squeeze(y)


# ------------------------------ parameter init -------------------------------
def init_params(key):
    ks = iter(jax.random.split(key, 32))

    def u(shape, scale):
        return jax.random.uniform(next(ks), shape, jnp.float32, -scale, scale)

    H, E = HIDDEN_DIM, EMBED_DIM
    kl = 1.0 / (H ** 0.5)
    kf1 = 1.0 / (BINNED ** 0.5)
    kf2 = 1.0 / (MLP_D ** 0.5)
    kh1 = 1.0 / (INPUTDIM2 ** 0.5)
    kh2 = 1.0 / (FINAL_MLP_D ** 0.5)
    return {
        'embedding': jax.random.uniform(next(ks), (VOC + 2, E), jnp.float32, -1.0, 1.0),
        # LSTM (transposed weights, combined bias b_ih + b_hh), gate order i,f,g,o
        'wih_f': u((E, 4 * H), kl), 'whh_f': u((H, 4 * H), kl), 'b_f': u((1, 4 * H), kl),
        'wih_r': u((E, 4 * H), kl), 'whh_r': u((H, 4 * H), kl), 'b_r': u((1, 4 * H), kl),
        # fc_2
        'fc2_w1': u((BINNED, MLP_D), kf1), 'fc2_b1': u((1, MLP_D), kf1),
        'fc2_w2': u((MLP_D, MLP_D), kf2), 'fc2_b2': u((1, MLP_D), kf2),
        # label head
        'lab_w1': u((INPUTDIM2, FINAL_MLP_D), kh1), 'lab_b1': u((1, FINAL_MLP_D), kh1),
        'bn1_g': 1.0 + u((1, FINAL_MLP_D), 0.2), 'bn1_b': u((1, FINAL_MLP_D), 0.1),
        'bn1_m': u((1, FINAL_MLP_D), 0.1), 'bn1_v': 1.0 + jnp.abs(u((1, FINAL_MLP_D), 0.5)),
        'lab_w2': u((FINAL_MLP_D, FINAL_MLP_D), kh2), 'lab_b2': u((1, FINAL_MLP_D), kh2),
        'bn2_g': 1.0 + u((1, FINAL_MLP_D), 0.2), 'bn2_b': u((1, FINAL_MLP_D), 0.1),
        'bn2_m': u((1, FINAL_MLP_D), 0.1), 'bn2_v': 1.0 + jnp.abs(u((1, FINAL_MLP_D), 0.5)),
        'lab_w3': u((FINAL_MLP_D, 1), kh2), 'lab_b3': u((1, 1), kh2),
        # note: label_noSF (conc=False branch) is unused in the conc=True path
    }


if __name__ == "__main__":
    key = jax.random.PRNGKey(0)
    kparam_key, kt, kc = jax.random.split(key, 3)
    params = init_params(kparam_key)
    kparams = prepare_params(params)                       # one-time packed/fused layout

    tokens = jax.random.randint(kt, (BATCH, SEQ), 0, VOC + 2)                    # word ids
    conc = jax.random.normal(kc, (BATCH, 1, CONC_FEATURES + 200), jnp.float32)   # (B, 1, 237)

    fwd = jax.jit(bilstm_glove_forward)
    out = jax.block_until_ready(fwd(kparams, tokens, conc))

    ref = reference_forward(params, tokens, conc)
    assert out.shape == (BATCH,), out.shape
    assert bool(jnp.all(jnp.isfinite(out)))
    # bf16 matmul operands + approx reciprocal => bf16-appropriate tolerance
    np.testing.assert_allclose(np.asarray(out), np.asarray(ref), rtol=2e-2, atol=2e-2)
    print("KERNEL_OK")
</pallas_src>

<mosaic_0001>
module attributes {stable_mosaic.version = 11 : i64} {
  func.func @_fused_kernel(%arg0: memref<32x1xi32, #tpu.memory_space<vmem>>, %arg1: memref<4x128xf32, #tpu.memory_space<vmem>>, %arg2: memref<1696x256xbf16, #tpu.memory_space<vmem>>, %arg3: memref<8x512xf32, #tpu.memory_space<vmem>>, %arg4: memref<4x128xf32, #tpu.memory_space<vmem>>) attributes {dimension_semantics = [], scalar_prefetch = 0 : i64, scratch_operands = 0 : i64, tpu.core_type = #tpu.core_type<tc>} {
    %c0 = arith.constant 0 : index
    %c0_0 = arith.constant 0 : index
    %0 = vector.load %arg0[%c0, %c0_0] : memref<32x1xi32, #tpu.memory_space<vmem>>, vector<32x1xi32>
    %1 = tpu.iota {dimensions = array<i32: 1>} : vector<32x64xi32>
    %2 = vector.broadcast %0 : vector<32x1xi32> to vector<32x64xi32>
    %3 = arith.cmpi eq, %1, %2 : vector<32x64xi32>
    %4 = arith.extui %3 : vector<32x64xi1> to vector<32x64xi32>
    %5 = arith.sitofp %4 : vector<32x64xi32> to vector<32x64xf32>
    %6 = arith.truncf %5 : vector<32x64xf32> to vector<32x64xbf16>
    %c0_1 = arith.constant 0 : index
    %c0_2 = arith.constant 0 : index
    %7 = vector.load %arg2[%c0_1, %c0_2] : memref<1696x256xbf16, #tpu.memory_space<vmem>>, vector<64x256xbf16>
    %cst = arith.constant dense<0.000000e+00> : vector<32x256xf32>
    %8 = tpu.matmul %6, %7, %cst {dimension_numbers = #tpu.dot_dimension_numbers<[1], [0], [0], [1], [0, 0, 1, 1], [], []>} : vector<32x64xbf16>, vector<64x256xbf16>, vector<32x256xf32> -> vector<32x256xf32>
    %c64 = arith.constant 64 : index
    %c0_3 = arith.constant 0 : index
    %9 = vector.load %arg2[%c64, %c0_3] : memref<1696x256xbf16, #tpu.memory_space<vmem>>, vector<32x128xbf16>
    %10 = vector.extract_strided_slice %8 {offsets = [0, 0], sizes = [4, 128], strides = [1, 1]} : vector<32x256xf32> to vector<4x128xf32>
    %11 = vector.extract_strided_slice %10 {offsets = [0, 0], sizes = [4, 32], strides = [1, 1]} : vector<4x128xf32> to vector<4x32xf32>
    %12 = arith.negf %11 : vector<4x32xf32>
    %13 = math.exp %12 : vector<4x32xf32>
    %cst_4 = arith.constant 1.000000e+00 : f32
    %14 = vector.broadcast %cst_4 : f32 to vector<4x32xf32>
    %15 = arith.addf %14, %13 : vector<4x32xf32>
    %16 = arith.divf %14, %15 : vector<4x32xf32>
    %17 = vector.extract_strided_slice %10 {offsets = [0, 64], sizes = [4, 32], strides = [1, 1]} : vector<4x128xf32> to vector<4x32xf32>
    %18 = math.tanh %17 : vector<4x32xf32>
    %19 = vector.extract_strided_slice %10 {offsets = [0, 96], sizes = [4, 32], strides = [1, 1]} : vector<4x128xf32> to vector<4x32xf32>
    %20 = arith.negf %19 : vector<4x32xf32>
    %21 = math.exp %20 : vector<4x32xf32>
    %cst_5 = arith.constant 1.000000e+00 : f32
    %22 = vector.broadcast %cst_5 : f32 to vector<4x32xf32>
    %23 = arith.addf %22, %21 : vector<4x32xf32>
    %24 = arith.divf %22, %23 : vector<4x32xf32>
    %25 = arith.mulf %16, %18 : vector<4x32xf32>
    %26 = math.tanh %25 : vector<4x32xf32>
    %27 = arith.mulf %24, %26 : vector<4x32xf32>
    %28 = vector.extract_strided_slice %8 {offsets = [4, 0], sizes = [4, 128], strides = [1, 1]} : vector<32x256xf32> to vector<4x128xf32>
    %29 = arith.truncf %27 : vector<4x32xf32> to vector<4x32xbf16>
    %cst_6 = arith.constant dense<0.000000e+00> : vector<4x128xf32>
    %30 = tpu.matmul %29, %9, %cst_6 {dimension_numbers = #tpu.dot_dimension_numbers<[1], [0], [0], [1], [0, 0, 1, 1], [], []>} : vector<4x32xbf16>, vector<32x128xbf16>, vector<4x128xf32> -> vector<4x128xf32>
    %31 = arith.addf %28, %30 : vector<4x128xf32>
    %32 = vector.extract_strided_slice %31 {offsets = [0, 0], sizes = [4, 32], strides = [1, 1]} : vector<4x128xf32> to vector<4x32xf32>
    %33 = arith.negf %32 : vector<4x32xf32>
    %34 = math.exp %33 : vector<4x32xf32>
    %cst_7 = arith.constant 1.000000e+00 : f32
    %35 = vector.broadcast %cst_7 : f32 to vector<4x32xf32>
    %36 = arith.addf %35, %34 : vector<4x32xf32>
    %37 = arith.divf %35, %36 : vector<4x32xf32>
    %38 = vector.extract_strided_slice %31 {offsets = [0, 64], sizes = [4, 32], strides = [1, 1]} : vector<4x128xf32> to vector<4x32xf32>
    %39 = math.tanh %38 : vector<4x32xf32>
    %40 = vector.extract_strided_slice %31 {offsets = [0, 96], sizes = [4, 32], strides = [1, 1]} : vector<4x128xf32> to vector<4x32xf32>
    %41 = arith.negf %40 : vector<4x32xf32>
    %42 = math.exp %41 : vector<4x32xf32>
    %cst_8 = arith.constant 1.000000e+00 : f32
    %43 = vector.broadcast %cst_8 : f32 to vector<4x32xf32>
    %44 = arith.addf %43, %42 : vector<4x32xf32>
    %45 = arith.divf %43, %44 : vector<4x32xf32>
    %46 = vector.extract_strided_slice %31 {offsets = [0, 32], sizes = [4, 32], strides = [1, 1]} : vector<4x128xf32> to vector<4x32xf32>
    %47 = arith.negf %46 : vector<4x32xf32>
    %48 = math.exp %47 : vector<4x32xf32>
    %cst_9 = arith.constant 1.000000e+00 : f32
    %49 = vector.broadcast %cst_9 : f32 to vector<4x32xf32>
    %50 = arith.addf %49, %48 : vector<4x32xf32>
    %51 = arith.divf %49, %50 : vector<4x32xf32>
    %52 = arith.mulf %51, %25 : vector<4x32xf32>
    %53 = arith.mulf %37, %39 : vector<4x32xf32>
    %54 = arith.addf %52, %53 : vector<4x32xf32>
    %55 = math.tanh %54 : vector<4x32xf32>
    %56 = arith.mulf %45, %55 : vector<4x32xf32>
    %57 = vector.extract_strided_slice %8 {offsets = [8, 0], sizes = [4, 128], strides = [1, 1]} : vector<32x256xf32> to vector<4x128xf32>
    %58 = arith.truncf %56 : vector<4x32xf32> to vector<4x32xbf16>
    %cst_10 = arith.constant dense<0.000000e+00> : vector<4x128xf32>
    %59 = tpu.matmul %58, %9, %cst_10 {dimension_numbers = #tpu.dot_dimension_numbers<[1], [0], [0], [1], [0, 0, 1, 1], [], []>} : vector<4x32xbf16>, vector<32x128xbf16>, vector<4x128xf32> -> vector<4x128xf32>
    %60 = arith.addf %57, %59 : vector<4x128xf32>
    %61 = vector.extract_strided_slice %60 {offsets = [0, 0], sizes = [4, 32], strides = [1, 1]} : vector<4x128xf32> to vector<4x32xf32>
    %62 = arith.negf %61 : vector<4x32xf32>
    %63 = math.exp %62 : vector<4x32xf32>
    %cst_11 = arith.constant 1.000000e+00 : f32
    %64 = vector.broadcast %cst_11 : f32 to vector<4x32xf32>
    %65 = arith.addf %64, %63 : vector<4x32xf32>
    %66 = arith.divf %64, %65 : vector<4x32xf32>
    %67 = vector.extract_strided_slice %60 {offsets = [0, 64], sizes = [4, 32], strides = [1, 1]} : vector<4x128xf32> to vector<4x32xf32>
    %68 = math.tanh %67 : vector<4x32xf32>
    %69 = vector.extract_strided_slice %60 {offsets = [0, 96], sizes = [4, 32], strides = [1, 1]} : vector<4x128xf32> to vector<4x32xf32>
    %70 = arith.negf %69 : vector<4x32xf32>
    %71 = math.exp %70 : vector<4x32xf32>
    %cst_12 = arith.constant 1.000000e+00 : f32
    %72 = vector.broadcast %cst_12 : f32 to vector<4x32xf32>
    %73 = arith.addf %72, %71 : vector<4x32xf32>
    %74 = arith.divf %72, %73 : vector<4x32xf32>
    %75 = vector.extract_strided_slice %60 {offsets = [0, 32], sizes = [4, 32], strides = [1, 1]} : vector<4x128xf32> to vector<4x32xf32>
    %76 = arith.negf %75 : vector<4x32xf32>
    %77 = math.exp %76 : vector<4x32xf32>
    %cst_13 = arith.constant 1.000000e+00 : f32
    %78 = vector.broadcast %cst_13 : f32 to vector<4x32xf32>
    %79 = arith.addf %78, %77 : vector<4x32xf32>
    %80 = arith.divf %78, %79 : vector<4x32xf32>
    %81 = arith.mulf %80, %54 : vector<4x32xf32>
    %82 = arith.mulf %66, %68 : vector<4x32xf32>
    %83 = arith.addf %81, %82 : vector<4x32xf32>
    %84 = math.tanh %83 : vector<4x32xf32>
    %85 = arith.mulf %74, %84 : vector<4x32xf32>
    %86 = vector.extract_strided_slice %8 {offsets = [12, 0], sizes = [4, 128], strides = [1, 1]} : vector<32x256xf32> to vector<4x128xf32>
    %87 = arith.truncf %85 : vector<4x32xf32> to vector<4x32xbf16>
    %cst_14 = arith.constant dense<0.000000e+00> : vector<4x128xf32>
    %88 = tpu.matmul %87, %9, %cst_14 {dimension_numbers = #tpu.dot_dimension_numbers<[1], [0], [0], [1], [0, 0, 1, 1], [], []>} : vector<4x32xbf16>, vector<32x128xbf16>, vector<4x128xf32> -> vector<4x128xf32>
    %89 = arith.addf %86, %88 : vector<4x128xf32>
    %90 = vector.extract_strided_slice %89 {offsets = [0, 0], sizes = [4, 32], strides = [1, 1]} : vector<4x128xf32> to vector<4x32xf32>
    %91 = arith.negf %90 : vector<4x32xf32>
    %92 = math.exp %91 : vector<4x32xf32>
    %cst_15 = arith.constant 1.000000e+00 : f32
    %93 = vector.broadcast %cst_15 : f32 to vector<4x32xf32>
    %94 = arith.addf %93, %92 : vector<4x32xf32>
    %95 = arith.divf %93, %94 : vector<4x32xf32>
    %96 = vector.extract_strided_slice %89 {offsets = [0, 64], sizes = [4, 32], strides = [1, 1]} : vector<4x128xf32> to vector<4x32xf32>
    %97 = math.tanh %96 : vector<4x32xf32>
    %98 = vector.extract_strided_slice %89 {offsets = [0, 96], sizes = [4, 32], strides = [1, 1]} : vector<4x128xf32> to vector<4x32xf32>
    %99 = arith.negf %98 : vector<4x32xf32>
    %100 = math.exp %99 : vector<4x32xf32>
    %cst_16 = arith.constant 1.000000e+00 : f32
    %101 = vector.broadcast %cst_16 : f32 to vector<4x32xf32>
    %102 = arith.addf %101, %100 : vector<4x32xf32>
    %103 = arith.divf %101, %102 : vector<4x32xf32>
    %104 = vector.extract_strided_slice %89 {offsets = [0, 32], sizes = [4, 32], strides = [1, 1]} : vector<4x128xf32> to vector<4x32xf32>
    %105 = arith.negf %104 : vector<4x32xf32>
    %106 = math.exp %105 : vector<4x32xf32>
    %cst_17 = arith.constant 1.000000e+00 : f32
    %107 = vector.broadcast %cst_17 : f32 to vector<4x32xf32>
    %108 = arith.addf %107, %106 : vector<4x32xf32>
    %109 = arith.divf %107, %108 : vector<4x32xf32>
    %110 = arith.mulf %109, %83 : vector<4x32xf32>
    %111 = arith.mulf %95, %97 : vector<4x32xf32>
    %112 = arith.addf %110, %111 : vector<4x32xf32>
    %113 = math.tanh %112 : vector<4x32xf32>
    %114 = arith.mulf %103, %113 : vector<4x32xf32>
    %115 = vector.extract_strided_slice %8 {offsets = [16, 0], sizes = [4, 128], strides = [1, 1]} : vector<32x256xf32> to vector<4x128xf32>
    %116 = arith.truncf %114 : vector<4x32xf32> to vector<4x32xbf16>
    %cst_18 = arith.constant dense<0.000000e+00> : vector<4x128xf32>
    %117 = tpu.matmul %116, %9, %cst_18 {dimension_numbers = #tpu.dot_dimension_numbers<[1], [0], [0], [1], [0, 0, 1, 1], [], []>} : vector<4x32xbf16>, vector<32x128xbf16>, vector<4x128xf32> -> vector<4x128xf32>
    %118 = arith.addf %115, %117 : vector<4x128xf32>
    %119 = vector.extract_strided_slice %118 {offsets = [0, 0], sizes = [4, 32], strides = [1, 1]} : vector<4x128xf32> to vector<4x32xf32>
    %120 = arith.negf %119 : vector<4x32xf32>
    %121 = math.exp %120 : vector<4x32xf32>
    %cst_19 = arith.constant 1.000000e+00 : f32
    %122 = vector.broadcast %cst_19 : f32 to vector<4x32xf32>
    %123 = arith.addf %122, %121 : vector<4x32xf32>
    %124 = arith.divf %122, %123 : vector<4x32xf32>
    %125 = vector.extract_strided_slice %118 {offsets = [0, 64], sizes = [4, 32], strides = [1, 1]} : vector<4x128xf32> to vector<4x32xf32>
    %126 = math.tanh %125 : vector<4x32xf32>
    %127 = vector.extract_strided_slice %118 {offsets = [0, 96], sizes = [4, 32], strides = [1, 1]} : vector<4x128xf32> to vector<4x32xf32>
    %128 = arith.negf %127 : vector<4x32xf32>
    %129 = math.exp %128 : vector<4x32xf32>
    %cst_20 = arith.constant 1.000000e+00 : f32
    %130 = vector.broadcast %cst_20 : f32 to vector<4x32xf32>
    %131 = arith.addf %130, %129 : vector<4x32xf32>
    %132 = arith.divf %130, %131 : vector<4x32xf32>
    %133 = vector.extract_strided_slice %118 {offsets = [0, 32], sizes = [4, 32], strides = [1, 1]} : vector<4x128xf32> to vector<4x32xf32>
    %134 = arith.negf %133 : vector<4x32xf32>
    %135 = math.exp %134 : vector<4x32xf32>
    %cst_21 = arith.constant 1.000000e+00 : f32
    %136 = vector.broadcast %cst_21 : f32 to vector<4x32xf32>
    %137 = arith.addf %136, %135 : vector<4x32xf32>
    %138 = arith.divf %136, %137 : vector<4x32xf32>
    %139 = arith.mulf %138, %112 : vector<4x32xf32>
    %140 = arith.mulf %124, %126 : vector<4x32xf32>
    %141 = arith.addf %139, %140 : vector<4x32xf32>
    %142 = math.tanh %141 : vector<4x32xf32>
    %143 = arith.mulf %132, %142 : vector<4x32xf32>
    %144 = vector.extract_strided_slice %8 {offsets = [20, 0], sizes = [4, 128], strides = [1, 1]} : vector<32x256xf32> to vector<4x128xf32>
    %145 = arith.truncf %143 : vector<4x32xf32> to vector<4x32xbf16>
    %cst_22 = arith.constant dense<0.000000e+00> : vector<4x128xf32>
    %146 = tpu.matmul %145, %9, %cst_22 {dimension_numbers = #tpu.dot_dimension_numbers<[1], [0], [0], [1], [0, 0, 1, 1], [], []>} : vector<4x32xbf16>, vector<32x128xbf16>, vector<4x128xf32> -> vector<4x128xf32>
    %147 = arith.addf %144, %146 : vector<4x128xf32>
    %148 = vector.extract_strided_slice %147 {offsets = [0, 0], sizes = [4, 32], strides = [1, 1]} : vector<4x128xf32> to vector<4x32xf32>
    %149 = arith.negf %148 : vector<4x32xf32>
    %150 = math.exp %149 : vector<4x32xf32>
    %cst_23 = arith.constant 1.000000e+00 : f32
    %151 = vector.broadcast %cst_23 : f32 to vector<4x32xf32>
    %152 = arith.addf %151, %150 : vector<4x32xf32>
    %153 = arith.divf %151, %152 : vector<4x32xf32>
    %154 = vector.extract_strided_slice %147 {offsets = [0, 64], sizes = [4, 32], strides = [1, 1]} : vector<4x128xf32> to vector<4x32xf32>
    %155 = math.tanh %154 : vector<4x32xf32>
    %156 = vector.extract_strided_slice %147 {offsets = [0, 96], sizes = [4, 32], strides = [1, 1]} : vector<4x128xf32> to vector<4x32xf32>
    %157 = arith.negf %156 : vector<4x32xf32>
    %158 = math.exp %157 : vector<4x32xf32>
    %cst_24 = arith.constant 1.000000e+00 : f32
    %159 = vector.broadcast %cst_24 : f32 to vector<4x32xf32>
    %160 = arith.addf %159, %158 : vector<4x32xf32>
    %161 = arith.divf %159, %160 : vector<4x32xf32>
    %162 = vector.extract_strided_slice %147 {offsets = [0, 32], sizes = [4, 32], strides = [1, 1]} : vector<4x128xf32> to vector<4x32xf32>
    %163 = arith.negf %162 : vector<4x32xf32>
    %164 = math.exp %163 : vector<4x32xf32>
    %cst_25 = arith.constant 1.000000e+00 : f32
    %165 = vector.broadcast %cst_25 : f32 to vector<4x32xf32>
    %166 = arith.addf %165, %164 : vector<4x32xf32>
    %167 = arith.divf %165, %166 : vector<4x32xf32>
    %168 = arith.mulf %167, %141 : vector<4x32xf32>
    %169 = arith.mulf %153, %155 : vector<4x32xf32>
    %170 = arith.addf %168, %169 : vector<4x32xf32>
    %171 = math.tanh %170 : vector<4x32xf32>
    %172 = arith.mulf %161, %171 : vector<4x32xf32>
    %173 = vector.extract_strided_slice %8 {offsets = [24, 0], sizes = [4, 128], strides = [1, 1]} : vector<32x256xf32> to vector<4x128xf32>
    %174 = arith.truncf %172 : vector<4x32xf32> to vector<4x32xbf16>
    %cst_26 = arith.constant dense<0.000000e+00> : vector<4x128xf32>
    %175 = tpu.matmul %174, %9, %cst_26 {dimension_numbers = #tpu.dot_dimension_numbers<[1], [0], [0], [1], [0, 0, 1, 1], [], []>} : vector<4x32xbf16>, vector<32x128xbf16>, vector<4x128xf32> -> vector<4x128xf32>
    %176 = arith.addf %173, %175 : vector<4x128xf32>
    %177 = vector.extract_strided_slice %176 {offsets = [0, 0], sizes = [4, 32], strides = [1, 1]} : vector<4x128xf32> to vector<4x32xf32>
    %178 = arith.negf %177 : vector<4x32xf32>
    %179 = math.exp %178 : vector<4x32xf32>
    %cst_27 = arith.constant 1.000000e+00 : f32
    %180 = vector.broadcast %cst_27 : f32 to vector<4x32xf32>
    %181 = arith.addf %180, %179 : vector<4x32xf32>
    %182 = arith.divf %180, %181 : vector<4x32xf32>
    %183 = vector.extract_strided_slice %176 {offsets = [0, 64], sizes = [4, 32], strides = [1, 1]} : vector<4x128xf32> to vector<4x32xf32>
    %184 = math.tanh %183 : vector<4x32xf32>
    %185 = vector.extract_strided_slice %176 {offsets = [0, 96], sizes = [4, 32], strides = [1, 1]} : vector<4x128xf32> to vector<4x32xf32>
    %186 = arith.negf %185 : vector<4x32xf32>
    %187 = math.exp %186 : vector<4x32xf32>
    %cst_28 = arith.constant 1.000000e+00 : f32
    %188 = vector.broadcast %cst_28 : f32 to vector<4x32xf32>
    %189 = arith.addf %188, %187 : vector<4x32xf32>
    %190 = arith.divf %188, %189 : vector<4x32xf32>
    %191 = vector.extract_strided_slice %176 {offsets = [0, 32], sizes = [4, 32], strides = [1, 1]} : vector<4x128xf32> to vector<4x32xf32>
    %192 = arith.negf %191 : vector<4x32xf32>
    %193 = math.exp %192 : vector<4x32xf32>
    %cst_29 = arith.constant 1.000000e+00 : f32
    %194 = vector.broadcast %cst_29 : f32 to vector<4x32xf32>
    %195 = arith.addf %194, %193 : vector<4x32xf32>
    %196 = arith.divf %194, %195 : vector<4x32xf32>
    %197 = arith.mulf %196, %170 : vector<4x32xf32>
    %198 = arith.mulf %182, %184 : vector<4x32xf32>
    %199 = arith.addf %197, %198 : vector<4x32xf32>
    %200 = math.tanh %199 : vector<4x32xf32>
    %201 = arith.mulf %190, %200 : vector<4x32xf32>
    %202 = vector.extract_strided_slice %8 {offsets = [28, 0], sizes = [4, 128], strides = [1, 1]} : vector<32x256xf32> to vector<4x128xf32>
    %203 = arith.truncf %201 : vector<4x32xf32> to vector<4x32xbf16>
    %cst_30 = arith.constant dense<0.000000e+00> : vector<4x128xf32>
    %204 = tpu.matmul %203, %9, %cst_30 {dimension_numbers = #tpu.dot_dimension_numbers<[1], [0], [0], [1], [0, 0, 1, 1], [], []>} : vector<4x32xbf16>, vector<32x128xbf16>, vector<4x128xf32> -> vector<4x128xf32>
    %205 = arith.addf %202, %204 : vector<4x128xf32>
    %206 = vector.extract_strided_slice %205 {offsets = [0, 0], sizes = [4, 32], strides = [1, 1]} : vector<4x128xf32> to vector<4x32xf32>
    %207 = arith.negf %206 : vector<4x32xf32>
    %208 = math.exp %207 : vector<4x32xf32>
    %cst_31 = arith.constant 1.000000e+00 : f32
    %209 = vector.broadcast %cst_31 : f32 to vector<4x32xf32>
    %210 = arith.addf %209, %208 : vector<4x32xf32>
    %211 = arith.divf %209, %210 : vector<4x32xf32>
    %212 = vector.extract_strided_slice %205 {offsets = [0, 64], sizes = [4, 32], strides = [1, 1]} : vector<4x128xf32> to vector<4x32xf32>
    %213 = math.tanh %212 : vector<4x32xf32>
    %214 = vector.extract_strided_slice %205 {offsets = [0, 96], sizes = [4, 32], strides = [1, 1]} : vector<4x128xf32> to vector<4x32xf32>
    %215 = arith.negf %214 : vector<4x32xf32>
    %216 = math.exp %215 : vector<4x32xf32>
    %cst_32 = arith.constant 1.000000e+00 : f32
    %217 = vector.broadcast %cst_32 : f32 to vector<4x32xf32>
    %218 = arith.addf %217, %216 : vector<4x32xf32>
    %219 = arith.divf %217, %218 : vector<4x32xf32>
    %220 = vector.extract_strided_slice %205 {offsets = [0, 32], sizes = [4, 32], strides = [1, 1]} : vector<4x128xf32> to vector<4x32xf32>
    %221 = arith.negf %220 : vector<4x32xf32>
    %222 = math.exp %221 : vector<4x32xf32>
    %cst_33 = arith.constant 1.000000e+00 : f32
    %223 = vector.broadcast %cst_33 : f32 to vector<4x32xf32>
    %224 = arith.addf %223, %222 : vector<4x32xf32>
    %225 = arith.divf %223, %224 : vector<4x32xf32>
    %226 = arith.mulf %225, %199 : vector<4x32xf32>
    %227 = arith.mulf %211, %213 : vector<4x32xf32>
    %228 = arith.addf %226, %227 : vector<4x32xf32>
    %229 = math.tanh %228 : vector<4x32xf32>
    %230 = arith.mulf %219, %229 : vector<4x32xf32>
    %231 = vector.extract_strided_slice %8 {offsets = [28, 128], sizes = [4, 128], strides = [1, 1]} : vector<32x256xf32> to vector<4x128xf32>
    %232 = vector.extract_strided_slice %231 {offsets = [0, 0], sizes = [4, 32], strides = [1, 1]} : vector<4x128xf32> to vector<4x32xf32>
    %233 = arith.negf %232 : vector<4x32xf32>
    %234 = math.exp %233 : vector<4x32xf32>
    %cst_34 = arith.constant 1.000000e+00 : f32
    %235 = vector.broadcast %cst_34 : f32 to vector<4x32xf32>
    %236 = arith.addf %235, %234 : vector<4x32xf32>
    %237 = arith.divf %235, %236 : vector<4x32xf32>
    %238 = vector.extract_strided_slice %231 {offsets = [0, 64], sizes = [4, 32], strides = [1, 1]} : vector<4x128xf32> to vector<4x32xf32>
    %239 = math.tanh %238 : vector<4x32xf32>
    %240 = vector.extract_strided_slice %231 {offsets = [0, 96], sizes = [4, 32], strides = [1, 1]} : vector<4x128xf32> to vector<4x32xf32>
    %241 = arith.negf %240 : vector<4x32xf32>
    %242 = math.exp %241 : vector<4x32xf32>
    %cst_35 = arith.constant 1.000000e+00 : f32
    %243 = vector.broadcast %cst_35 : f32 to vector<4x32xf32>
    %244 = arith.addf %243, %242 : vector<4x32xf32>
    %245 = arith.divf %243, %244 : vector<4x32xf32>
    %246 = arith.mulf %237, %239 : vector<4x32xf32>
    %247 = math.tanh %246 : vector<4x32xf32>
    %248 = arith.mulf %245, %247 : vector<4x32xf32>
    %249 = tpu.iota {dimensions = array<i32: 1>} : vector<128x512xi32>
    %250 = tpu.iota {dimensions = array<i32: 0>} : vector<128x512xi32>
    %c12_i32 = arith.constant 12 : i32
    %251 = vector.broadcast %c12_i32 : i32 to vector<128x512xi32>
    %252 = arith.muli %250, %251 : vector<128x512xi32>
    %253 = arith.subi %249, %252 : vector<128x512xi32>
    %c0_i32 = arith.constant 0 : i32
    %254 = vector.broadcast %c0_i32 : i32 to vector<128x512xi32>
    %255 = arith.cmpi sge, %253, %254 : vector<128x512xi32>
    %c12_i32_36 = arith.constant 12 : i32
    %256 = vector.broadcast %c12_i32_36 : i32 to vector<128x512xi32>
    %257 = arith.cmpi slt, %253, %256 : vector<128x512xi32>
    %258 = arith.andi %255, %257 : vector<128x512xi1>
    %cst_37 = arith.constant 1.000000e+00 : f32
    %cst_38 = arith.constant 0.000000e+00 : f32
    %259 = vector.broadcast %cst_37 : f32 to vector<128x512xf32>
    %260 = vector.broadcast %cst_38 : f32 to vector<128x512xf32>
    %261 = arith.select %258, %259, %260 : vector<128x512xi1>, vector<128x512xf32>
    %262 = tpu.iota {dimensions = array<i32: 0>} : vector<512x128xi32>
    %263 = tpu.iota {dimensions = array<i32: 1>} : vector<512x128xi32>
    %c12_i32_39 = arith.constant 12 : i32
    %264 = vector.broadcast %c12_i32_39 : i32 to vector<512x128xi32>
    %265 = arith.muli %263, %264 : vector<512x128xi32>
    %266 = arith.subi %262, %265 : vector<512x128xi32>
    %c0_i32_40 = arith.constant 0 : i32
    %267 = vector.broadcast %c0_i32_40 : i32 to vector<512x128xi32>
    %268 = arith.cmpi sge, %266, %267 : vector<512x128xi32>
    %c12_i32_41 = arith.constant 12 : i32
    %269 = vector.broadcast %c12_i32_41 : i32 to vector<512x128xi32>
    %270 = arith.cmpi slt, %266, %269 : vector<512x128xi32>
    %271 = arith.andi %268, %270 : vector<512x128xi1>
    %cst_42 = arith.constant 1.000000e+00 : f32
    %cst_43 = arith.constant 0.000000e+00 : f32
    %272 = vector.broadcast %cst_42 : f32 to vector<512x128xf32>
    %273 = vector.broadcast %cst_43 : f32 to vector<512x128xf32>
    %274 = arith.select %271, %272, %273 : vector<512x128xi1>, vector<512x128xf32>
    %c0_44 = arith.constant 0 : index
    %c0_45 = arith.constant 0 : index
    %275 = vector.load %arg1[%c0_44, %c0_45] : memref<4x128xf32, #tpu.memory_space<vmem>>, vector<4x128xf32>
    %cst_46 = arith.constant dense<0.000000e+00> : vector<4x512xf32>
    %276 = tpu.matmul %275, %261, %cst_46 {dimension_numbers = #tpu.dot_dimension_numbers<[1], [0], [0], [1], [0, 0, 1, 1], [], []>} : vector<4x128xf32>, vector<128x512xf32>, vector<4x512xf32> -> vector<4x512xf32>
    %cst_47 = arith.constant dense<0x7F800000> : vector<512xf32>
    %277 = vector.multi_reduction <minimumf>, %276, %cst_47 [0] : vector<4x512xf32> to vector<512xf32>
    %278 = vector.shape_cast %277 : vector<512xf32> to vector<1x512xf32>
    %cst_48 = arith.constant dense<0xFF800000> : vector<512xf32>
    %279 = vector.multi_reduction <maximumf>, %276, %cst_48 [0] : vector<4x512xf32> to vector<512xf32>
    %280 = vector.shape_cast %279 : vector<512xf32> to vector<1x512xf32>
    %281 = arith.subf %280, %278 : vector<1x512xf32>
    %cst_49 = arith.constant 1.000000e-01 : f32
    %282 = vector.broadcast %cst_49 : f32 to vector<1x512xf32>
    %283 = arith.mulf %281, %282 : vector<1x512xf32>
    %cst_50 = arith.constant 0.000000e+00 : f32
    %284 = vector.broadcast %cst_50 : f32 to vector<1x512xf32>
    %285 = arith.cmpf oeq, %283, %284 : vector<1x512xf32>
    %cst_51 = arith.constant 2.000000e-01 : f32
    %286 = vector.broadcast %cst_51 : f32 to vector<1x512xf32>
    %287 = arith.mulf %283, %286 : vector<1x512xf32>
    %cst_52 = arith.constant 1.000000e+00 : f32
    %288 = vector.broadcast %cst_52 : f32 to vector<1x512xf32>
    %289 = arith.select %285, %288, %287 : vector<1x512xi1>, vector<1x512xf32>
    %cst_53 = arith.constant 5.000000e-01 : f32
    %290 = vector.broadcast %cst_53 : f32 to vector<1x512xf32>
    %291 = arith.mulf %290, %283 : vector<1x512xf32>
    %292 = arith.subf %278, %291 : vector<1x512xf32>
    %c5 = arith.constant 5 : index
    %c0_54 = arith.constant 0 : index
    %293 = vector.load %arg3[%c5, %c0_54] : memref<8x512xf32, #tpu.memory_space<vmem>>, vector<1x512xf32>
    %294 = arith.mulf %293, %283 : vector<1x512xf32>
    %295 = arith.addf %292, %294 : vector<1x512xf32>
    %296 = vector.broadcast %295 : vector<1x512xf32> to vector<4x512xf32>
    %297 = arith.subf %276, %296 : vector<4x512xf32>
    %cst_55 = arith.constant 2.000000e+00 : f32
    %298 = vector.broadcast %cst_55 : f32 to vector<1x512xf32>
    %299 = arith.mulf %298, %289 : vector<1x512xf32>
    %300 = arith.mulf %299, %289 : vector<1x512xf32>
    %301 = tpu.reciprocal %300 : vector<1x512xf32> -> vector<1x512xf32>
    %302 = arith.mulf %297, %297 : vector<4x512xf32>
    %cst_56 = arith.constant 0.000000e+00 : f32
    %303 = vector.broadcast %cst_56 : f32 to vector<4x512xf32>
    %304 = arith.subf %303, %302 : vector<4x512xf32>
    %305 = vector.broadcast %301 : vector<1x512xf32> to vector<4x512xf32>
    %306 = arith.mulf %304, %305 : vector<4x512xf32>
    %307 = math.exp %306 : vector<4x512xf32>
    %c6 = arith.constant 6 : index
    %c0_57 = arith.constant 0 : index
    %308 = vector.load %arg3[%c6, %c0_57] : memref<8x512xf32, #tpu.memory_space<vmem>>, vector<1x512xf32>
    %309 = vector.broadcast %308 : vector<1x512xf32> to vector<4x512xf32>
    %310 = arith.mulf %307, %309 : vector<4x512xf32>
    %cst_58 = arith.constant dense<0.000000e+00> : vector<4x128xf32>
    %311 = tpu.matmul %310, %274, %cst_58 {dimension_numbers = #tpu.dot_dimension_numbers<[1], [0], [0], [1], [0, 0, 1, 1], [], []>} : vector<4x512xf32>, vector<512x128xf32>, vector<4x128xf32> -> vector<4x128xf32>
    %cst_59 = arith.constant 0.000000e+00 : f32
    %312 = vector.broadcast %cst_59 : f32 to vector<4x128xf32>
    %313 = arith.cmpf oeq, %311, %312 : vector<4x128xf32>
    %cst_60 = arith.constant 9.99999997E-7 : f32
    %314 = vector.broadcast %cst_60 : f32 to vector<4x128xf32>
    %315 = arith.select %313, %314, %311 : vector<4x128xi1>, vector<4x128xf32>
    %cst_61 = arith.constant dense<0.000000e+00> : vector<4x512xf32>
    %316 = tpu.matmul %315, %261, %cst_61 {dimension_numbers = #tpu.dot_dimension_numbers<[1], [0], [0], [1], [0, 0, 1, 1], [], []>} : vector<4x128xf32>, vector<128x512xf32>, vector<4x512xf32> -> vector<4x512xf32>
    %317 = tpu.reciprocal %316 {approx = true} : vector<4x512xf32> -> vector<4x512xf32>
    %318 = arith.mulf %310, %317 : vector<4x512xf32>
    %319 = arith.truncf %318 : vector<4x512xf32> to vector<4x512xbf16>
    %c96 = arith.constant 96 : index
    %c0_62 = arith.constant 0 : index
    %320 = vector.load %arg2[%c96, %c0_62] : memref<1696x256xbf16, #tpu.memory_space<vmem>>, vector<512x256xbf16>
    %cst_63 = arith.constant dense<0.000000e+00> : vector<4x256xf32>
    %321 = tpu.matmul %319, %320, %cst_63 {dimension_numbers = #tpu.dot_dimension_numbers<[1], [0], [0], [1], [0, 0, 1, 1], [], []>} : vector<4x512xbf16>, vector<512x256xbf16>, vector<4x256xf32> -> vector<4x256xf32>
    %c0_64 = arith.constant 0 : index
    %c0_65 = arith.constant 0 : index
    %322 = vector.load %arg3[%c0_64, %c0_65] : memref<8x512xf32, #tpu.memory_space<vmem>>, vector<1x256xf32>
    %323 = vector.broadcast %322 : vector<1x256xf32> to vector<4x256xf32>
    %324 = arith.addf %321, %323 : vector<4x256xf32>
    %cst_66 = arith.constant 0.000000e+00 : f32
    %325 = vector.broadcast %cst_66 : f32 to vector<4x256xf32>
    %326 = arith.maximumf %324, %325 : vector<4x256xf32>
    %327 = arith.truncf %326 : vector<4x256xf32> to vector<4x256xbf16>
    %c608 = arith.constant 608 : index
    %c0_67 = arith.constant 0 : index
    %328 = vector.load %arg2[%c608, %c0_67] : memref<1696x256xbf16, #tpu.memory_space<vmem>>, vector<256x256xbf16>
    %cst_68 = arith.constant dense<0.000000e+00> : vector<4x256xf32>
    %329 = tpu.matmul %327, %328, %cst_68 {dimension_numbers = #tpu.dot_dimension_numbers<[1], [0], [0], [1], [0, 0, 1, 1], [], []>} : vector<4x256xbf16>, vector<256x256xbf16>, vector<4x256xf32> -> vector<4x256xf32>
    %c1 = arith.constant 1 : index
    %c0_69 = arith.constant 0 : index
    %330 = vector.load %arg3[%c1, %c0_69] : memref<8x512xf32, #tpu.memory_space<vmem>>, vector<1x256xf32>
    %331 = vector.broadcast %330 : vector<1x256xf32> to vector<4x256xf32>
    %332 = arith.addf %329, %331 : vector<4x256xf32>
    %cst_70 = arith.constant 0.000000e+00 : f32
    %333 = vector.broadcast %cst_70 : f32 to vector<4x256xf32>
    %334 = arith.maximumf %332, %333 : vector<4x256xf32>
    %335 = arith.truncf %230 : vector<4x32xf32> to vector<4x32xbf16>
    %c864 = arith.constant 864 : index
    %c0_71 = arith.constant 0 : index
    %336 = vector.load %arg2[%c864, %c0_71] : memref<1696x256xbf16, #tpu.memory_space<vmem>>, vector<32x256xbf16>
    %cst_72 = arith.constant dense<0.000000e+00> : vector<4x256xf32>
    %337 = tpu.matmul %335, %336, %cst_72 {dimension_numbers = #tpu.dot_dimension_numbers<[1], [0], [0], [1], [0, 0, 1, 1], [], []>} : vector<4x32xbf16>, vector<32x256xbf16>, vector<4x256xf32> -> vector<4x256xf32>
    %338 = arith.truncf %248 : vector<4x32xf32> to vector<4x32xbf16>
    %c896 = arith.constant 896 : index
    %c0_73 = arith.constant 0 : index
    %339 = vector.load %arg2[%c896, %c0_73] : memref<1696x256xbf16, #tpu.memory_space<vmem>>, vector<32x256xbf16>
    %cst_74 = arith.constant dense<0.000000e+00> : vector<4x256xf32>
    %340 = tpu.matmul %338, %339, %cst_74 {dimension_numbers = #tpu.dot_dimension_numbers<[1], [0], [0], [1], [0, 0, 1, 1], [], []>} : vector<4x32xbf16>, vector<32x256xbf16>, vector<4x256xf32> -> vector<4x256xf32>
    %341 = arith.addf %337, %340 : vector<4x256xf32>
    %342 = arith.truncf %334 : vector<4x256xf32> to vector<4x256xbf16>
    %c928 = arith.constant 928 : index
    %c0_75 = arith.constant 0 : index
    %343 = vector.load %arg2[%c928, %c0_75] : memref<1696x256xbf16, #tpu.memory_space<vmem>>, vector<256x256xbf16>
    %cst_76 = arith.constant dense<0.000000e+00> : vector<4x256xf32>
    %344 = tpu.matmul %342, %343, %cst_76 {dimension_numbers = #tpu.dot_dimension_numbers<[1], [0], [0], [1], [0, 0, 1, 1], [], []>} : vector<4x256xbf16>, vector<256x256xbf16>, vector<4x256xf32> -> vector<4x256xf32>
    %345 = arith.addf %341, %344 : vector<4x256xf32>
    %c2 = arith.constant 2 : index
    %c0_77 = arith.constant 0 : index
    %346 = vector.load %arg3[%c2, %c0_77] : memref<8x512xf32, #tpu.memory_space<vmem>>, vector<1x256xf32>
    %347 = vector.broadcast %346 : vector<1x256xf32> to vector<4x256xf32>
    %348 = arith.addf %345, %347 : vector<4x256xf32>
    %cst_78 = arith.constant 0.000000e+00 : f32
    %349 = vector.broadcast %cst_78 : f32 to vector<4x256xf32>
    %350 = arith.maximumf %348, %349 : vector<4x256xf32>
    %351 = arith.truncf %350 : vector<4x256xf32> to vector<4x256xbf16>
    %c1184 = arith.constant 1184 : index
    %c0_79 = arith.constant 0 : index
    %352 = vector.load %arg2[%c1184, %c0_79] : memref<1696x256xbf16, #tpu.memory_space<vmem>>, vector<256x256xbf16>
    %cst_80 = arith.constant dense<0.000000e+00> : vector<4x256xf32>
    %353 = tpu.matmul %351, %352, %cst_80 {dimension_numbers = #tpu.dot_dimension_numbers<[1], [0], [0], [1], [0, 0, 1, 1], [], []>} : vector<4x256xbf16>, vector<256x256xbf16>, vector<4x256xf32> -> vector<4x256xf32>
    %c3 = arith.constant 3 : index
    %c0_81 = arith.constant 0 : index
    %354 = vector.load %arg3[%c3, %c0_81] : memref<8x512xf32, #tpu.memory_space<vmem>>, vector<1x256xf32>
    %355 = vector.broadcast %354 : vector<1x256xf32> to vector<4x256xf32>
    %356 = arith.addf %353, %355 : vector<4x256xf32>
    %cst_82 = arith.constant 0.000000e+00 : f32
    %357 = vector.broadcast %cst_82 : f32 to vector<4x256xf32>
    %358 = arith.maximumf %356, %357 : vector<4x256xf32>
    %359 = arith.truncf %358 : vector<4x256xf32> to vector<4x256xbf16>
    %c1440 = arith.constant 1440 : index
    %c0_83 = arith.constant 0 : index
    %360 = vector.load %arg2[%c1440, %c0_83] : memref<1696x256xbf16, #tpu.memory_space<vmem>>, vector<256x128xbf16>
    %cst_84 = arith.constant dense<0.000000e+00> : vector<4x128xf32>
    %361 = tpu.matmul %359, %360, %cst_84 {dimension_numbers = #tpu.dot_dimension_numbers<[1], [0], [0], [1], [0, 0, 1, 1], [], []>} : vector<4x256xbf16>, vector<256x128xbf16>, vector<4x128xf32> -> vector<4x128xf32>
    %c4 = arith.constant 4 : index
    %c0_85 = arith.constant 0 : index
    %362 = vector.load %arg3[%c4, %c0_85] : memref<8x512xf32, #tpu.memory_space<vmem>>, vector<1x128xf32>
    %363 = vector.broadcast %362 : vector<1x128xf32> to vector<4x128xf32>
    %364 = arith.addf %361, %363 : vector<4x128xf32>
    %c0_86 = arith.constant 0 : index
    %c0_87 = arith.constant 0 : index
    %365 = vector.load %arg4[%c0_86, %c0_87] : memref<4x128xf32, #tpu.memory_space<vmem>>, vector<4x128xf32>
    tpu.vector_store %arg4[%c0_86, %c0_87], %364 {strides = array<i32>} : memref<4x128xf32, #tpu.memory_space<vmem>>, vector<4x128xf32>,
    return
  }
}

</mosaic_0001>

<bundles_post_ra>
// kernel: bilstm_glove_forward.1
= control target key start
LH: loop header
LB: loop body
LE: loop exit
PB: predicated region body
PF: predicated region fallthrough
CT: control target
= control target key end

     0   :  { %9 = vsyncpa [#allocation3], 0  ;;  %s4703_s15 = smov [#allocation2]   ;;  %s6160_s0 = inlined_call_operand.vmem [shape: s32[32,1], index: 0, kind: input, shape index: {}]   ;;  %s6161_s1 = inlined_call_operand.vmem [shape: f32[4,128], index: 1, kind: input, shape index: {}]   ;;  %s6162_s2 = inlined_call_operand.hbm [shape: bf16[1696,256], index: 2, kind: input, shape index: {}]   ;;  %s6163_s3 = inlined_call_operand.vmem [shape: f32[8,512], index: 3, kind: input, shape index: {}]   ;;  %s6164_s4 = inlined_call_operand.vmem [shape: f32[4,128], index: 4, kind: output, shape index: {}]  }
   0x1   :  { %s19_s16 = sshll.u32 %s4703_s15, 4  ;;  %s20_s16 = int_to_ptr.vmem [resolvable:$true] %s19_s16 }
   0x2   :  { %s4689_s17 = scalar_lea.vmem %s20_s16, 27136  ;;  %p4694_p1 = scmp.lt.s32.totalorder %s20_s16, %s20_s16 }
   0x3   :  { %p4690_p0 = scmp.ne.s32.totalorder %s20_s16, %s4689_s17  ;;  %p4695_p2 = scmp.lt.s32.totalorder %s4689_s17, %s4689_s17 }
   0x5   :  { %p4696_p3 = por %p4695_p2, %p4694_p1 }
   0x7   :  { %p4697_p4 = pnand %p4696_p3, %p4690_p0 }
   0x9   :  { %4700 = shalt.err (!%p4697_p4)
}
   0xa   :  { %s4704_s18 = smov 128   ;;  %s4705_s19 = smov 8  }
   0xb   :  { %25 = dma.hbm_to_vmem [thread:$0]  %s6162_s2, 27136, %s20_s16, [#allocation3], %s4704_s18, %s4704_s18, %s4705_s19  }
   0xc   :  { %4701 = dma.done.wait [#allocation3], 27136  }
   0xd   :  { %4702 = vsyncadd [#allocation3], 4294940160  ;;  %v6179_v0 = vmov 0   ;;  %v6181_v1 = vmov 0.0   ;;  %v32_v2 = vld [vmem:[%s6160_s0] sm:$0xff]  ;;  %v33_v3 = vld [vmem:[%s6160_s0 + $0x8] sm:$0xff]  ;;  %v36_v12 = vlaneseq }
   0xe   :  { %4301 = vset.pattern.permute.xlu0 %v6179_v0  ;;  %151 = vmatprep.mubr.bf16.mxu0 %v6179_v0  ;;  %v4303_v4 = vld [vmem:[#allocation2 + $0x34] ss:$8 sps:$4 sm:$0xff]   ;;  %v4305_v5 = vld [vmem:[#allocation2 + $0x30] ss:$8 sps:$4 sm:$0xff]   ;;  %v4306_v6 = vld [vmem:[#allocation2 + $0x24] ss:$8 sps:$4 sm:$0xff]  }
   0xf   :  { %4234 = vmatprep.subr.bf16.mxu1 %v6181_v1  ;;  %4302 = vset.pattern.permute.xlu1 %v6179_v0  ;;  %v4308_v7 = vld [vmem:[#allocation2 + $0x20] ss:$8 sps:$4 sm:$0xff]   ;;  %v4309_v8 = vld [vmem:[#allocation2 + $0x14] ss:$8 sps:$4 sm:$0xff]   ;;  %v4311_v9 = vld [vmem:[#allocation2 + $0x10] ss:$8 sps:$4 sm:$0xff]  }
  0x10   :  { %39 = vperm.xlu0 %4301, %v32_v2   ;;  %127 = vmatprep.subr.bf16.mxu0 %v4303_v4  ;;  %v4312_v10 = vld [vmem:[#allocation2 + $0x4] ss:$8 sps:$4 sm:$0xff]   ;;  %v4314_v11 = vld [vmem:[#allocation2] ss:$8 sps:$4 sm:$0xff]   ;;  %v4754_v13 = vand.u32 127, %v36_v12  ;;  %vm112_vm2 = vcmask 523264  }
  0x11   :  { %128 = vmatpush1.bf16.msra.mxu0 %v4305_v5  ;;  %s4708_s2 = smov 64   ;;  %v4765_v30 = vld [vmem:[#allocation2 + $0x50] ss:$8 sps:$4 sm:$0xff]   ;;  %vm4709_vm3 = vmmov 0   ;;  %v4770_v31 = vld [vmem:[#allocation2 + $0x40] ss:$8 sps:$4 sm:$0xff]  }
  0x12   :  { %129 = vmatprep.subr.bf16.mxu0 %v4306_v6  ;;  %4238 = vmatprep.mubr.msk.bf16.mxu1 %vm4709_vm3, %v6181_v1  ;;  %s4710_s26 = smov 96   ;;  %s4711_s27 = smov 32   ;;  %vm6165_vm4 = vcmask 261120  }
  0x13   :  { %4235 = vmatpush3.bf16.msra.mxu1 %v4765_v30 }
  0x14   :  { %42 = vperm.xlu0 %4301, %v33_v3   ;;  %4236 = vmatprep.subr.bf16.mxu1 %v6181_v1 }
  0x15   :  { %130 = vmatpush1.bf16.msra.mxu0 %v4308_v7 }
  0x16   :  { %131 = vmatprep.subr.bf16.mxu0 %v4309_v8 }
  0x17   :  { %4237 = vmatpush3.bf16.msra.mxu1 %v4770_v31 }
  0x18   :  { %4242 = vmatprep.subr.bf16.mxu1 %v6181_v1 }
  0x19   :  { %132 = vmatpush1.bf16.msra.mxu0 %v4311_v9 }
  0x1a   :  { %133 = vmatprep.subr.bf16.mxu0 %v4312_v10 }
  0x1d   :  { %134 = vmatpush1.bf16.msra.mxu0 %v4314_v11 }
  0x1e   :  { %4274 = vmatprep.subr.bf16.mxu0 %v6181_v1 }
  0x8b   :  { %v40_v14 = vpop.permute.xlu0 %39 }
  0x8c   :  { %vm50_vm0 = vcmp.eq.s32.totalorder %v4754_v13, %v40_v14 }
  0x8d   :  { %v3706_v16 = vsel %vm50_vm0, 1.0, %v6181_v1 }
  0x8f   :  { %v43_v15 = vpop.permute.xlu0 %42 }
  0x90   :  { %vm51_vm1 = vcmp.eq.s32.totalorder %v4754_v13, %v43_v15 }
  0x91   :  { %v3707_v17 = vsel %vm51_vm1, 1.0, %v6181_v1 }
  0x92   :  { %v62_v18 = vpack.c.bf16 %v3707_v17, %v3706_v16 }
  0x94   :  { %3718 = vmatmul.mubr.msk.bf16.vlgmr.msra.gmra.mxu0 %vm112_vm2, %v62_v18 }
  0x95   :  { %159 = vmatprep.mubr.bf16.mxu0 %v6179_v0  ;;  %4275 = vmatpush3.bf16.msra.mxu0 %v4765_v30 }
  0x96   :  { %4276 = vmatprep.subr.bf16.mxu0 %v6181_v1 }
  0x99   :  { %4277 = vmatpush3.bf16.msra.mxu0 %v4770_v31 }
 0x154   :  { %v153_v19 = vpop.f32.mrf.mxu0 }
 0x155   :  { %4585 = vtanh.f32 %v153_v19  ;;  %v3720_v24 = vmul.f32 -1.442695, %v153_v19 }
 0x156   :  { %v155_v20 = vpop.f32.mrf.mxu0 }
 0x157   :  { %4587 = vpow2.f32 %v3720_v24 }
 0x158   :  { %v4762_v21 = vpop.f32.mrf.mxu0 }
 0x15a   :  { %v158_v22 = vpop.f32.mrf.mxu0 }
 0x162   :  { %v4586_v23 = vpop.eup %4585 }
 0x163   :  { %181 = vrot.lane.b32.xlu1 %v4586_v23, %s4708_s2 }
 0x164   :  { %v4588_v25 = vpop.eup %4587 }
 0x165   :  { %v176_v26 = vadd.f32 1.0, %v4588_v25 }
 0x167   :  { %4589 = vrcp.f32 %v176_v26 }
 0x174   :  { %v4590_v27 = vpop.eup %4589 }
 0x1d5   :  { %v182_v28 = vpop.permute.xlu1 %181 }
 0x1d6   :  { %v184_v29 = vmul.f32 %v4590_v27, %v182_v28 }
 0x1d8   :  { %4591 = vtanh.f32 %v184_v29  ;;  %v263_v36 = vrot.slane %v184_v29, 4 }
 0x1e5   :  { %v4592_v32 = vpop.eup %4591 }
 0x1e6   :  { %187 = vrot.lane.b32.xlu1 %v4592_v32, %s4710_s26 }
 0x258   :  { %v188_v33 = vpop.permute.xlu1 %187 }
 0x259   :  { %v190_v34 = vmul.f32 %v4590_v27, %v188_v33 }
 0x25b   :  { %v191_v35 = vpack.c.bf16 %v190_v34, %v190_v34 }
 0x25d   :  { %193 = vrot.lane.b32.xlu0 %v191_v35, %s4711_s27 }
 0x261   :  { %264 = vrot.lane.b32.xlu0 %v263_v36, %s4711_s27 }
 0x2cf   :  { %v194_v37 = vpop.permute.xlu0 %193 }
 0x2d0   :  { %4239 = vmatmul.mubr.msk.bf16.vlgmr.msra.gmra.mxu1 %vm6165_vm4, %v194_v37 }
 0x2d1   :  { %4243 = vmatpush3.bf16.msra.mxu1 %v4765_v30  ;;  %4246 = vmatprep.mubr.msk.bf16.mxu1 %vm4709_vm3, %v6181_v1 }
 0x2d2   :  { %4244 = vmatprep.subr.bf16.mxu1 %v6181_v1 }
 0x2d3   :  { %v265_v51 = vpop.permute.xlu0 %264 }
 0x2d5   :  { %4245 = vmatpush3.bf16.msra.mxu1 %v4770_v31 }
 0x2d6   :  { %4250 = vmatprep.subr.bf16.mxu1 %v6181_v1 }
 0x390   :  { %v245_v38 = vpop.f32.mrf.mxu1 }
 0x391   :  { %v252_v39 = vrot.slane %v245_v38, 4 }
 0x392   :  { %v4240_v40 = vpop.f32.mrf.mxu1 }
 0x393   :  { %v254_v41 = vadd.f32 %v252_v39, %v153_v19 }
 0x394   :  { %v248_v42 = vpop.f32.mrf.mxu1 }
 0x395   :  { %4593 = vtanh.f32 %v254_v41  ;;  %v3724_v45 = vmul.f32 -1.442695, %v254_v41 }
 0x396   :  { %v4241_v43 = vpop.f32.mrf.mxu1 }
 0x397   :  { %4595 = vpow2.f32 %v3724_v45  ;;  %v35_v43 = vld [vmem:[%s6160_s0 + $0x18] sm:$0xff] }
 0x3a2   :  { %v4594_v44 = vpop.eup %4593 }
 0x3a3   :  { %269 = vrot.lane.b32.xlu1 %v4594_v44, %s4708_s2 }
 0x3a4   :  { %v4596_v46 = vpop.eup %4595 }
 0x3a5   :  { %v258_v47 = vadd.f32 1.0, %v4596_v46 }
 0x3a7   :  { %4597 = vrcp.f32 %v258_v47 }
 0x3b4   :  { %v4598_v48 = vpop.eup %4597 }
 0x3b5   :  { %v267_v52 = vmul.f32 %v4598_v48, %v265_v51 }
 0x415   :  { %v270_v49 = vpop.permute.xlu1 %269 }
 0x416   :  { %v272_v50 = vmul.f32 %v4598_v48, %v270_v49 }
 0x418   :  { %274 = vrot.lane.b32.xlu1 %v272_v50, %s4711_s27 }
 0x48a   :  { %v275_v53 = vpop.permute.xlu1 %274 }
 0x48b   :  { %v277_v54 = vadd.f32 %v275_v53, %v267_v52 }
 0x48d   :  { %4599 = vtanh.f32 %v277_v54  ;;  %v341_v11 = vrot.slane %v277_v54, 4 }
 0x49a   :  { %v4600_v55 = vpop.eup %4599 }
 0x49b   :  { %280 = vrot.lane.b32.xlu0 %v4600_v55, %s4708_s2 }
 0x50d   :  { %v281_v56 = vpop.permute.xlu0 %280 }
 0x50e   :  { %v283_v57 = vmul.f32 %v4598_v48, %v281_v56 }
 0x510   :  { %v284_v58 = vpack.c.bf16 %v283_v57, %v283_v57 }
 0x512   :  { %v286_v59 = vrot.slane %v284_v58, 2 }
 0x514   :  { %287 = vrot.lane.b32.xlu1 %v286_v59, %s4711_s27 }
 0x586   :  { %v288_v60 = vpop.permute.xlu1 %287 }
 0x587   :  { %4247 = vmatmul.mubr.msk.bf16.vlgmr.msra.gmra.mxu1 %vm6165_vm4, %v288_v60 }
 0x588   :  { %4251 = vmatpush3.bf16.msra.mxu1 %v4765_v30  ;;  %4254 = vmatprep.mubr.msk.bf16.mxu1 %vm4709_vm3, %v6181_v1 }
 0x589   :  { %4252 = vmatprep.subr.bf16.mxu1 %v6181_v1 }
 0x58c   :  { %4253 = vmatpush3.bf16.msra.mxu1 %v4770_v31 }
 0x58d   :  { %4258 = vmatprep.subr.bf16.mxu1 %v6181_v1 }
 0x647   :  { %v326_v61 = vpop.f32.mrf.mxu1 }
 0x648   :  { %v332_v62 = vadd.f32 %v326_v61, %v4762_v21 }
 0x649   :  { %v4248_v63 = vpop.f32.mrf.mxu1 }
 0x64a   :  { %4601 = vtanh.f32 %v332_v62  ;;  %v3726_v5 = vmul.f32 -1.442695, %v332_v62 }
 0x64b   :  { %v329_v2 = vpop.f32.mrf.mxu1 }
 0x64c   :  { %4603 = vpow2.f32 %v3726_v5 }
 0x64d   :  { %v4249_v3 = vpop.f32.mrf.mxu1 }
 0x657   :  { %v4602_v4 = vpop.eup %4601 }
 0x658   :  { %345 = vrot.lane.b32.xlu0 %v4602_v4, %s4708_s2 }
 0x659   :  { %v4604_v6 = vpop.eup %4603 }
 0x65a   :  { %v336_v7 = vadd.f32 1.0, %v4604_v6 }
 0x65c   :  { %4605 = vrcp.f32 %v336_v7 }
 0x669   :  { %v4606_v8 = vpop.eup %4605 }
 0x66a   :  { %v343_v14 = vmul.f32 %v4606_v8, %v341_v11 }
 0x6ca   :  { %v346_v9 = vpop.permute.xlu0 %345 }
 0x6cb   :  { %v348_v10 = vmul.f32 %v4606_v8, %v346_v9 }
 0x6cd   :  { %350 = vrot.lane.b32.xlu1 %v348_v10, %s4711_s27 }
 0x73f   :  { %v351_v15 = vpop.permute.xlu1 %350 }
 0x740   :  { %v353_v16 = vadd.f32 %v351_v15, %v343_v14 }
 0x742   :  { %4607 = vtanh.f32 %v353_v16  ;;  %v419_v38 = vrot.slane %v353_v16, 4 }
 0x74f   :  { %v4608_v17 = vpop.eup %4607 }
 0x750   :  { %356 = vrot.lane.b32.xlu0 %v4608_v17, %s4708_s2 }
 0x7c2   :  { %v357_v18 = vpop.permute.xlu0 %356 }
 0x7c3   :  { %v359_v19 = vmul.f32 %v4606_v8, %v357_v18 }
 0x7c5   :  { %v360_v20 = vpack.c.bf16 %v359_v19, %v359_v19 }
 0x7c7   :  { %362 = vrot.lane.b32.xlu1 %v360_v20, %s4711_s27 }
 0x839   :  { %v363_v22 = vpop.permute.xlu1 %362 }
 0x83a   :  { %4255 = vmatmul.mubr.msk.bf16.vlgmr.msra.gmra.mxu1 %vm6165_vm4, %v363_v22 }
 0x83b   :  { %4259 = vmatpush3.bf16.msra.mxu1 %v4765_v30  ;;  %4262 = vmatprep.mubr.msk.bf16.mxu1 %vm4709_vm3, %v6181_v1 }
 0x83c   :  { %4260 = vmatprep.subr.bf16.mxu1 %v6181_v1 }
 0x83f   :  { %4261 = vmatpush3.bf16.msra.mxu1 %v4770_v31 }
 0x840   :  { %4266 = vmatprep.subr.bf16.mxu1 %v6181_v1 }
 0x8fa   :  { %v401_v23 = vpop.f32.mrf.mxu1 }
 0x8fb   :  { %v408_v24 = vrot.slane %v401_v23, 4 }
 0x8fc   :  { %v4256_v25 = vpop.f32.mrf.mxu1 }
 0x8fd   :  { %v410_v26 = vadd.f32 %v408_v24, %v4762_v21  ;;  %v34_v21 = vld [vmem:[%s6160_s0 + $0x10] sm:$0xff] }
 0x8fe   :  { %v404_v27 = vpop.f32.mrf.mxu1 }
 0x8ff   :  { %4609 = vtanh.f32 %v410_v26  ;;  %v3728_v32 = vmul.f32 -1.442695, %v410_v26 }
 0x900   :  { %v4257_v28 = vpop.f32.mrf.mxu1 }
 0x901   :  { %4611 = vpow2.f32 %v3728_v32 }
 0x90c   :  { %v4610_v29 = vpop.eup %4609 }
 0x90d   :  { %423 = vrot.lane.b32.xlu0 %v4610_v29, %s4708_s2 }
 0x90e   :  { %v4612_v33 = vpop.eup %4611 }
 0x90f   :  { %v414_v34 = vadd.f32 1.0, %v4612_v33 }
 0x911   :  { %4613 = vrcp.f32 %v414_v34 }
 0x91e   :  { %v4614_v35 = vpop.eup %4613 }
 0x91f   :  { %v421_v39 = vmul.f32 %v4614_v35, %v419_v38 }
 0x97f   :  { %v424_v36 = vpop.permute.xlu0 %423 }
 0x980   :  { %v426_v37 = vmul.f32 %v4614_v35, %v424_v36 }
 0x982   :  { %428 = vrot.lane.b32.xlu1 %v426_v37, %s4711_s27 }
 0x986   :  { %45 = vperm.xlu1 %4302, %v34_v21  }
 0x9f4   :  { %v429_v40 = vpop.permute.xlu1 %428 }
 0x9f5   :  { %v431_v41 = vadd.f32 %v429_v40, %v421_v39 }
 0x9f7   :  { %4615 = vtanh.f32 %v431_v41  ;;  %v495_v6 = vrot.slane %v431_v41, 4 }
 0xa01   :  { %v46_v48 = vpop.permute.xlu1 %45 }
 0xa02   :  { %vm52_vm5 = vcmp.eq.s32.totalorder %v4754_v13, %v46_v48 }
 0xa03   :  { %v3708_v49 = vsel %vm52_vm5, 1.0, %v6181_v1 }
 0xa04   :  { %v4616_v42 = vpop.eup %4615 }
 0xa05   :  { %434 = vrot.lane.b32.xlu0 %v4616_v42, %s4708_s2 }
 0xa09   :  { %48 = vperm.xlu0 %4301, %v35_v43  }
 0xa77   :  { %v435_v44 = vpop.permute.xlu0 %434 }
 0xa78   :  { %v437_v45 = vmul.f32 %v4614_v35, %v435_v44 }
 0xa7a   :  { %v438_v46 = vpack.c.bf16 %v437_v45, %v437_v45 }
 0xa7c   :  { %v440_v47 = vrot.slane %v438_v46, 2 }
 0xa7e   :  { %441 = vrot.lane.b32.xlu1 %v440_v47, %s4711_s27 }
 0xa84   :  { %v49_v50 = vpop.permute.xlu0 %48 }
 0xa85   :  { %vm53_vm6 = vcmp.eq.s32.totalorder %v4754_v13, %v49_v50 }
 0xa86   :  { %v3709_v51 = vsel %vm53_vm6, 1.0, %v6181_v1 }
 0xa87   :  { %v63_v52 = vpack.c.bf16 %v3709_v51, %v3708_v49 }
 0xa89   :  { %3719 = vmatmul.mubr.msk.bf16.gmra.mxu0 %vm112_vm2, %v63_v52 }
 0xa8a   :  { %4278 = vmatprep.mubr.msk.bf16.mxu0 %vm4709_vm3, %v6181_v1 }
 0xaf0   :  { %v442_v53 = vpop.permute.xlu1 %441 }
 0xaf1   :  { %4263 = vmatmul.mubr.msk.bf16.vlgmr.msra.gmra.mxu1 %vm6165_vm4, %v442_v53 }
 0xaf2   :  { %4267 = vmatpush3.bf16.msra.mxu1 %v4765_v30  ;;  %4270 = vmatprep.mubr.msk.bf16.mxu1 %vm4709_vm3, %v6181_v1 }
 0xaf3   :  { %4268 = vmatprep.subr.bf16.mxu1 %v6181_v1 }
 0xaf6   :  { %4269 = vmatpush3.bf16.msra.mxu1 %v4770_v31 }
 0xaf7   :  { %4282 = vmatprep.subr.bf16.mxu1 %v6181_v1 }
 0xb49   :  { %v161_v54 = vpop.f32.mrf.mxu0 }
 0xb4b   :  { %v163_v55 = vpop.f32.mrf.mxu0 }
 0xb4d   :  { %v4852_v40 = vpop.f32.mrf.mxu0 }
 0xb4f   :  { %v4854_v41 = vpop.f32.mrf.mxu0 }
 0xbb1   :  { %v480_v56 = vpop.f32.mrf.mxu1 }
 0xbb2   :  { %v486_v57 = vadd.f32 %v480_v56, %v161_v54 }
 0xbb3   :  { %v4264_v58 = vpop.f32.mrf.mxu1 }
 0xbb4   :  { %4617 = vtanh.f32 %v486_v57  ;;  %v3730_v62 = vmul.f32 -1.442695, %v486_v57  ;;  %v4867_v58 = vshrl.u32 %v36_v12, 7 }
 0xbb5   :  { %v483_v59 = vpop.f32.mrf.mxu1 }
 0xbb6   :  { %4619 = vpow2.f32 %v3730_v62  ;;  %v4870_v59 = vadd.s32 128, %v4754_v13  ;;  %v4879_v62 = vadd.s32 104, %v4867_v58 }
 0xbb7   :  { %v4265_v60 = vpop.f32.mrf.mxu1 }
 0xbb8   :  { %v4873_v60 = vadd.s32 120, %v4867_v58 }
 0xbc1   :  { %v4618_v61 = vpop.eup %4617 }
 0xbc2   :  { %499 = vrot.lane.b32.xlu0 %v4618_v61, %s4708_s2  ;;  %v4876_v61 = vadd.s32 112, %v4867_v58 }
 0xbc3   :  { %v4620_v63 = vpop.eup %4619 }
 0xbc4   :  { %v490_v2 = vadd.f32 1.0, %v4620_v63  ;;  %v4882_v63 = vadd.s32 96, %v4867_v58  ;;  %v4888_v12 = vmul.u32 12, %v4876_v61 }
 0xbc6   :  { %4621 = vrcp.f32 %v490_v2  ;;  %v4885_v2 = vmul.u32 12, %v4873_v60 }
 0xbd3   :  { %v4622_v3 = vpop.eup %4621 }
 0xbd4   :  { %v497_v7 = vmul.f32 %v4622_v3, %v495_v6  ;;  %v4900_v6 = vmul.u32 12, %v4882_v63 }
 0xc34   :  { %v500_v4 = vpop.permute.xlu0 %499 }
 0xc35   :  { %v502_v5 = vmul.f32 %v4622_v3, %v500_v4  ;;  %v4894_v4 = vadd.s32 80, %v4867_v58 }
 0xc37   :  { %504 = vrot.lane.b32.xlu1 %v502_v5, %s4711_s27  ;;  %v4897_v5 = vmul.u32 12, %v4879_v62 }
 0xca9   :  { %v505_v8 = vpop.permute.xlu1 %504 }
 0xcaa   :  { %v507_v9 = vadd.f32 %v505_v8, %v497_v7  ;;  %v4903_v7 = vadd.s32 72, %v4867_v58  ;;  %v4906_v8 = vadd.s32 64, %v4867_v58 }
 0xcac   :  { %4623 = vtanh.f32 %v507_v9 }
 0xcb9   :  { %v4624_v10 = vpop.eup %4623 }
 0xcba   :  { %510 = vrot.lane.b32.xlu0 %v4624_v10, %s4708_s2  ;;  %v861_v10 = vsub.s32 %v4870_v59, %v4885_v2 }
 0xcbc   :  { %vm925_vm7 = vcmp.ge.s32.totalorder %v861_v10, 0  ;;  %vm989_vm8 = vcmp.lt.s32.totalorder %v861_v10, 12 }
 0xcbd   :  { %vm4925_vm11 = vmand %vm925_vm7, %vm989_vm8 }
 0xd2c   :  { %v511_v11 = vpop.permute.xlu0 %510 }
 0xd2d   :  { %v513_v14 = vmul.f32 %v4622_v3, %v511_v11  ;;  %v4891_v3 = vadd.s32 88, %v4867_v58  ;;  %v860_v11 = vsub.s32 %v4754_v13, %v4885_v2 }
 0xd2f   :  { %v514_v15 = vpack.c.bf16 %v513_v14, %v513_v14  ;;  %v857_v14 = vsub.s32 %v4870_v59, %v4888_v12  ;;  %vm924_vm9 = vcmp.ge.s32.totalorder %v860_v11, 0  ;;  %vm988_vm10 = vcmp.lt.s32.totalorder %v860_v11, 12 }
 0xd30   :  { %vm4932_vm0 = vmand %vm924_vm9, %vm988_vm10 }
 0xd31   :  { %516 = vrot.lane.b32.xlu1 %v514_v15, %s4711_s27  ;;  %v856_v15 = vsub.s32 %v4754_v13, %v4888_v12  ;;  %vm921_vm12 = vcmp.ge.s32.totalorder %v857_v14, 0  ;;  %vm985_vm13 = vcmp.lt.s32.totalorder %v857_v14, 12 }
 0xd33   :  { %vm920_vm14 = vcmp.ge.s32.totalorder %v856_v15, 0  ;;  %vm984_vm15 = vcmp.lt.s32.totalorder %v856_v15, 12  ;;  %v5100_v15 = vadd.s32 40, %v4867_v58 }
 0xd34   :  { %vm4949_vm7 = vmand %vm920_vm14, %vm984_vm15 }
 0xda3   :  { %v517_v16 = vpop.permute.xlu1 %516 }
 0xda4   :  { %4271 = vmatmul.mubr.msk.bf16.vlgmr.msra.gmra.mxu1 %vm6165_vm4, %v517_v16  ;;  %v853_v16 = vsub.s32 %v4870_v59, %v4897_v5 }
 0xda5   :  { %4283 = vmatpush3.bf16.msra.mxu1 %v4765_v30  ;;  %4286 = vmatprep.mubr.msk.bf16.mxu1 %vm4709_vm3, %v6181_v1  ;;  %vm4939_vm3 = vmand %vm921_vm12, %vm985_vm13 }
 0xda6   :  { %4284 = vmatprep.subr.bf16.mxu1 %v6181_v1  ;;  %vm917_vm1 = vcmp.ge.s32.totalorder %v853_v16, 0  ;;  %vm981_vm2 = vcmp.lt.s32.totalorder %v853_v16, 12  ;;  %v6312_v16 = vmov 0 }
 0xda7   :  { %vm4962_vm10 = vmand %vm917_vm1, %vm981_vm2 }
 0xda9   :  { %4285 = vmatpush3.bf16.msra.mxu1 %v4770_v31  ;;  %v573_v31 = vrot.slane %v507_v9, 4 }
 0xe64   :  { %v555_v17 = vpop.f32.mrf.mxu1 }
 0xe65   :  { %v562_v18 = vrot.slane %v555_v17, 4  ;;  %v852_v17 = vsub.s32 %v4754_v13, %v4897_v5 }
 0xe66   :  { %v4272_v19 = vpop.f32.mrf.mxu1 }
 0xe67   :  { %v564_v20 = vadd.f32 %v562_v18, %v161_v54  ;;  %v849_v18 = vsub.s32 %v4870_v59, %v4900_v6  ;;  %v848_v19 = vsub.s32 %v4754_v13, %v4900_v6  ;;  %vm916_vm5 = vcmp.ge.s32.totalorder %v852_v17, 0 }
 0xe68   :  { %v558_v22 = vpop.f32.mrf.mxu1  ;;  %vm980_vm6 = vcmp.lt.s32.totalorder %v852_v17, 12 }
 0xe69   :  { %4625 = vtanh.f32 %v564_v20  ;;  %v3732_v25 = vmul.f32 -1.442695, %v564_v20  ;;  %v6275_v20 = vmov 0  ;;  %v6207_v22 = vmov 1.0   ;;  %vm4977_vm14 = vmand %vm916_vm5, %vm980_vm6 }
 0xe6a   :  { %v4273_v23 = vpop.f32.mrf.mxu1  ;;  %v6276_v20 = vsel %vm4925_vm11, 4294967295, %v6275_v20  ;;  %3738 = vmatprep.subr.msk.mxu0 %vm4925_vm11, %v6207_v22  ;;  %vm913_vm8 = vcmp.ge.s32.totalorder %v849_v18, 0  ;;  %vm977_vm9 = vcmp.lt.s32.totalorder %v849_v18, 12  ;;  %vm912_vm12 = vcmp.ge.s32.totalorder %v848_v19, 0 }
 0xe6b   :  { %4627 = vpow2.f32 %v3732_v25  ;;  %v6277_v23 = vmov 0  ;;  %v4944_v25 = vadd.s32 384, %v4754_v13  ;;  %vm976_vm13 = vcmp.lt.s32.totalorder %v848_v19, 12  ;;  %vm4994_vm15 = vmand %vm913_vm8, %vm977_vm9 }
 0xe6c   :  { %v6278_v23 = vsel %vm4932_vm0, 4294967295, %v6277_v23  ;;  %vm5011_vm1 = vmand %vm912_vm12, %vm976_vm13  ;;  %v6315_v19 = vmov 0 }
 0xe76   :  { %v4626_v24 = vpop.eup %4625 }
 0xe77   :  { %577 = vrot.lane.b32.xlu0 %v4626_v24, %s4708_s2  ;;  %v6279_v24 = vmov 0 }
 0xe78   :  { %v4628_v30 = vpop.eup %4627  ;;  %v6280_v24 = vsel %vm4939_vm3, 4294967295, %v6279_v24 }
 0xe79   :  { %v568_v26 = vadd.f32 1.0, %v4628_v30  ;;  %v6281_v30 = vmov 0 }
 0xe7a   :  { %v6282_v30 = vsel %vm4949_vm7, 4294967295, %v6281_v30 }
 0xe7b   :  { %4629 = vrcp.f32 %v568_v26  ;;  %v4954_v26 = vmul.u32 12, %v4891_v3 }
 0xe88   :  { %v4630_v27 = vpop.eup %4629 }
 0xe89   :  { %v575_v32 = vmul.f32 %v4630_v27, %v573_v31  ;;  %v4970_v31 = vmul.u32 12, %v4906_v8 }
 0xee9   :  { %v578_v28 = vpop.permute.xlu0 %577 }
 0xeea   :  { %v580_v29 = vmul.f32 %v4630_v27, %v578_v28  ;;  %v6283_v28 = vmov 0 }
 0xeeb   :  { %v6284_v28 = vsel %vm4962_vm10, 4294967295, %v6283_v28 }
 0xeec   :  { %582 = vrot.lane.b32.xlu1 %v580_v29, %s4711_s27  ;;  %v4967_v29 = vmul.u32 12, %v4903_v7 }
 0xf5e   :  { %v583_v33 = vpop.permute.xlu1 %582 }
 0xf5f   :  { %v585_v34 = vadd.f32 %v583_v33, %v575_v32  ;;  %v6285_v32 = vmov 0  ;;  %v845_v33 = vsub.s32 %v4870_v59, %v4954_v26 }
 0xf60   :  { %v6286_v32 = vsel %vm4977_vm14, 4294967295, %v6285_v32 }
 0xf61   :  { %4631 = vtanh.f32 %v585_v34  ;;  %v649_v54 = vrot.slane %v585_v34, 4  ;;  %v844_v34 = vsub.s32 %v4754_v13, %v4954_v26  ;;  %vm909_vm2 = vcmp.ge.s32.totalorder %v845_v33, 0 }
 0xf62   :  { %vm973_vm5 = vcmp.lt.s32.totalorder %v845_v33, 12  ;;  %v5119_v33 = vmul.u32 12, %v5100_v15 }
 0xf63   :  { %vm908_vm6 = vcmp.ge.s32.totalorder %v844_v34, 0  ;;  %vm972_vm8 = vcmp.lt.s32.totalorder %v844_v34, 12  ;;  %vm5018_vm9 = vmand %vm909_vm2, %vm973_vm5  ;;  %v5122_v34 = vadd.s32 32, %v4867_v58 }
 0xf64   :  { %vm5025_vm12 = vmand %vm908_vm6, %vm972_vm8 }
 0xf6e   :  { %v4632_v35 = vpop.eup %4631 }
 0xf6f   :  { %588 = vrot.lane.b32.xlu0 %v4632_v35, %s4708_s2 }
 0xfe1   :  { %v589_v36 = vpop.permute.xlu0 %588 }
 0xfe2   :  { %v591_v37 = vmul.f32 %v4630_v27, %v589_v36  ;;  %v4957_v27 = vmul.u32 12, %v4894_v4 }
 0xfe4   :  { %v592_v21 = vpack.c.bf16 %v591_v37, %v591_v37  ;;  %v841_v35 = vsub.s32 %v4870_v59, %v4957_v27  ;;  %v840_v36 = vsub.s32 %v4754_v13, %v4957_v27  ;;  %v6287_v37 = vmov 0 }
 0xfe5   :  { %v6288_v37 = vsel %vm4994_vm15, 4294967295, %v6287_v37 }
 0xfe6   :  { %v594_v38 = vrot.slane %v592_v21, 2  ;;  %v837_v21 = vsub.s32 %v4870_v59, %v4967_v29 }
 0xfe8   :  { %595 = vrot.lane.b32.xlu1 %v594_v38, %s4711_s27  ;;  %v836_v38 = vsub.s32 %v4754_v13, %v4967_v29  ;;  %vm901_vm13 = vcmp.ge.s32.totalorder %v837_v21, 0 }
 0xfea   :  { %vm900_vm5 = vcmp.ge.s32.totalorder %v836_v38, 0 }
0x105a   :  { %v596_v39 = vpop.permute.xlu1 %595 }
0x105b   :  { %4279 = vmatmul.mubr.msk.bf16.vlgmr.msra.gmra.mxu0 %vm6165_vm4, %v596_v39  ;;  %v833_v39 = vsub.s32 %v4870_v59, %v4970_v31  ;;  %vm905_vm4 = vcmp.ge.s32.totalorder %v841_v35, 0 }
0x105c   :  { %1554 = vmatprep.mubr.f32.mxu0 %v6181_v1  ;;  %3739 = vmatpush1.msk.msra.mxu0 %vm4932_vm0, %v6207_v22  ;;  %v6333_v1 = vmov 0 }
0x105d   :  { %3740 = vmatprep.subr.msk.mxu0 %vm4939_vm3, %v6207_v22  ;;  %vm897_vm8 = vcmp.ge.s32.totalorder %v833_v39, 0  ;;  %vm6364_vm3 = vcmask 261120  }
0x105e   :  { %3741 = vmatpush1.msk.msra.mxu0 %vm4949_vm7, %v6207_v22  ;;  %vm965_vm7 = vcmp.lt.s32.totalorder %v837_v21, 12  ;;  %v820_v21 = vsub.s32 %v4754_v13, %v5119_v33 }
0x105f   :  { %3742 = vmatprep.subr.msk.mxu0 %vm4962_vm10, %v6207_v22  ;;  %vm968_vm10 = vcmp.lt.s32.totalorder %v840_v36, 12 }
0x1060   :  { %3743 = vmatpush1.msk.msra.mxu0 %vm4977_vm14, %v6207_v22  ;;  %vm904_vm14 = vcmp.ge.s32.totalorder %v840_v36, 0  ;;  %v821_v36 = vsub.s32 %v4870_v59, %v5119_v33 }
0x1061   :  { %3744 = vmatprep.subr.msk.mxu0 %vm4994_vm15, %v6207_v22  ;;  %vm969_vm15 = vcmp.lt.s32.totalorder %v841_v35, 12  ;;  %vm5039_vm6 = vmand %vm904_vm14, %vm968_vm10  ;;  %v6318_v35 = vmov 0 }
0x1062   :  { %3745 = vmatpush1.msk.msra.mxu0 %vm5011_vm1, %v6207_v22  ;;  %vm5032_vm2 = vmand %vm905_vm4, %vm969_vm15 }
0x1063   :  { %3746 = vmatprep.subr.msk.mxu0 %vm5018_vm9, %v6207_v22  ;;  %vm5046_vm4 = vmand %vm901_vm13, %vm965_vm7 }
0x1064   :  { %3747 = vmatpush1.msk.msra.mxu0 %vm5025_vm12, %v6207_v22 }
0x1065   :  { %3748 = vmatprep.subr.msk.mxu0 %vm5032_vm2, %v6207_v22 }
0x1066   :  { %3749 = vmatpush1.msk.msra.mxu0 %vm5039_vm6, %v6207_v22 }
0x1067   :  { %3750 = vmatprep.subr.msk.mxu0 %vm5046_vm4, %v6207_v22 }
0x111b   :  { %v634_v42 = vpop.f32.mrf.mxu0 }
0x111c   :  { %v640_v43 = vadd.f32 %v634_v42, %v4852_v40  ;;  %v863_v42 = vsub.s32 %v4944_v25, %v4885_v2 }
0x111d   :  { %v4280_v44 = vpop.f32.mrf.mxu0 }
0x111e   :  { %4633 = vtanh.f32 %v640_v43  ;;  %v3734_v48 = vmul.f32 -1.442695, %v640_v43  ;;  %v6289_v43 = vmov 0  ;;  %v6291_v44 = vmov 0 }
0x111f   :  { %v637_v45 = vpop.f32.mrf.mxu0  ;;  %v6290_v43 = vsel %vm5011_vm1, 4294967295, %v6289_v43  ;;  %v6292_v44 = vsel %vm5018_vm9, 4294967295, %v6291_v44  ;;  %vm964_vm1 = vcmp.lt.s32.totalorder %v836_v38, 12  ;;  %vm961_vm9 = vcmp.lt.s32.totalorder %v833_v39, 12 }
0x1120   :  { %4635 = vpow2.f32 %v3734_v48  ;;  %v6293_v45 = vmov 0  ;;  %v6299_v48 = vmov 0  ;;  %vm927_vm15 = vcmp.ge.s32.totalorder %v863_v42, 0  ;;  %vm5053_vm10 = vmand %vm900_vm5, %vm964_vm1 }
0x1121   :  { %v4281_v46 = vpop.f32.mrf.mxu0  ;;  %v6294_v45 = vsel %vm5025_vm12, 4294967295, %v6293_v45  ;;  %v6300_v48 = vsel %vm5046_vm4, 4294967295, %v6299_v48  ;;  %vm991_vm12 = vcmp.lt.s32.totalorder %v863_v42, 12  ;;  %3751 = vmatpush1.msk.msra.mxu0 %vm5053_vm10, %v6207_v22  ;;  %vm5060_vm14 = vmand %vm897_vm8, %vm961_vm9  ;;  %v6321_v39 = vmov 0 }
0x1122   :  { %v6295_v46 = vmov 0  ;;  %3752 = vmatprep.subr.msk.mxu0 %vm5060_vm14, %v6207_v22  ;;  %vm5067_vm7 = vmand %vm927_vm15, %vm991_vm12  ;;  %v5143_v42 = vmul.u32 12, %v5122_v34 }
0x1123   :  { %v6296_v46 = vsel %vm5032_vm2, 4294967295, %v6295_v46  ;;  %3770 = vmatprep.subr.msk.mxu1 %vm5067_vm7, %v6207_v22 }
0x112b   :  { %v4634_v47 = vpop.eup %4633 }
0x112c   :  { %653 = vrot.lane.b32.xlu0 %v4634_v47, %s4708_s2  ;;  %v6297_v47 = vmov 0 }
0x112d   :  { %v4636_v49 = vpop.eup %4635  ;;  %v6298_v47 = vsel %vm5039_vm6, 4294967295, %v6297_v47 }
0x112e   :  { %v644_v50 = vadd.f32 1.0, %v4636_v49  ;;  %v6301_v49 = vmov 0 }
0x112f   :  { %v6302_v49 = vsel %vm5053_vm10, 4294967295, %v6301_v49 }
0x1130   :  { %4637 = vrcp.f32 %v644_v50  ;;  %6303 = vst [vmem:[#allocation6_spill] sm:$0xff] %v6302_v49  ;;  %v6304_v50 = vmov 0  ;;  %v6376_v49 = vmov 0 }
0x1131   :  { %v6305_v50 = vsel %vm5060_vm14, 4294967295, %v6304_v50 }
0x1132   :  { %6306 = vst [vmem:[#allocation7_spill] sm:$0xff] %v6305_v50 }
0x113d   :  { %v4858_v51 = vpop.eup %4637 }
0x113e   :  { %v651_v55 = vmul.f32 %v4858_v51, %v649_v54  ;;  %v832_v54 = vsub.s32 %v4754_v13, %v4970_v31 }
0x1140   :  { %vm896_vm1 = vcmp.ge.s32.totalorder %v832_v54, 0  ;;  %vm960_vm9 = vcmp.lt.s32.totalorder %v832_v54, 12 }
0x1141   :  { %vm5085_vm12 = vmand %vm896_vm1, %vm960_vm9 }
0x1142   :  { %3753 = vmatpush1.msk.msra.mxu0 %vm5085_vm12, %v6207_v22 }
0x119e   :  { %v654_v52 = vpop.permute.xlu0 %653 }
0x119f   :  { %v656_v53 = vmul.f32 %v4858_v51, %v654_v52  ;;  %v6307_v52 = vmov 0 }
0x11a0   :  { %v6308_v52 = vsel %vm5067_vm7, 4294967295, %v6307_v52 }
0x11a1   :  { %658 = vrot.lane.b32.xlu1 %v656_v53, %s4711_s27  ;;  %v5075_v53 = vadd.s32 56, %v4867_v58 }
0x1213   :  { %v659_v56 = vpop.permute.xlu1 %658 }
0x1214   :  { %v4863_v57 = vadd.f32 %v659_v56, %v651_v55  ;;  %v5080_v55 = vmul.u32 12, %v5075_v53  ;;  %v5083_v56 = vadd.s32 48, %v4867_v58 }
0x1216   :  { %6274 = vst [vmem:[#allocation5_spill] sm:$0xff] %v4863_v57  ;;  %4639 = vtanh.f32 %v4863_v57  ;;  %v829_v10 = vsub.s32 %v4870_v59, %v5080_v55  ;;  %v828_v11 = vsub.s32 %v4754_v13, %v5080_v55  ;;  %v5097_v14 = vmul.u32 12, %v5083_v56 }
0x1217   :  { %4641 = vtanh.f32 %v4854_v41 }
0x1218   :  { %vm893_vm13 = vcmp.ge.s32.totalorder %v829_v10, 0  ;;  %vm957_vm5 = vcmp.lt.s32.totalorder %v829_v10, 12  ;;  %vm892_vm15 = vcmp.ge.s32.totalorder %v828_v11, 0  ;;  %vm956_vm1 = vcmp.lt.s32.totalorder %v828_v11, 12 }
0x1219   :  { %vm5102_vm8 = vmand %vm893_vm13, %vm957_vm5  ;;  %v825_v17 = vsub.s32 %v4870_v59, %v5097_v14  ;;  %v824_v18 = vsub.s32 %v4754_v13, %v5097_v14  ;;  %v6324_v10 = vmov 0  ;;  %v817_v11 = vsub.s32 %v4870_v59, %v5143_v42 }
0x121a   :  { %v6313_v16 = vsel %vm5102_vm8, 4294967295, %v6312_v16  ;;  %3754 = vmatprep.subr.msk.mxu0 %vm5102_vm8, %v6207_v22  ;;  %vm5114_vm9 = vmand %vm892_vm15, %vm956_vm1  ;;  %vm885_vm1 = vcmp.ge.s32.totalorder %v821_v36, 0 }
0x121b   :  { %6314 = vst [vmem:[#allocation9_spill] sm:$0xff] %v6313_v16  ;;  %v6316_v19 = vsel %vm5114_vm9, 4294967295, %v6315_v19  ;;  %3755 = vmatpush1.msk.msra.mxu0 %vm5114_vm9, %v6207_v22  ;;  %vm889_vm13 = vcmp.ge.s32.totalorder %v825_v17, 0  ;;  %vm953_vm5 = vcmp.lt.s32.totalorder %v825_v17, 12  ;;  %vm888_vm8 = vcmp.ge.s32.totalorder %v824_v18, 0 }
0x121c   :  { %6317 = vst [vmem:[#allocation10_spill] sm:$0xff] %v6316_v19  ;;  %vm5127_vm14 = vmand %vm889_vm13, %vm953_vm5  ;;  %vm949_vm13 = vcmp.lt.s32.totalorder %v821_v36, 12  ;;  %vm884_vm5 = vcmp.ge.s32.totalorder %v820_v21, 0  ;;  %v816_v17 = vsub.s32 %v4754_v13, %v5143_v42  ;;  %v6327_v36 = vmov 0 }
0x121d   :  { %v6319_v35 = vsel %vm5127_vm14, 4294967295, %v6318_v35  ;;  %3756 = vmatprep.subr.msk.mxu0 %vm5127_vm14, %v6207_v22  ;;  %vm948_vm14 = vcmp.lt.s32.totalorder %v820_v21, 12  ;;  %vm5149_vm9 = vmand %vm885_vm1, %vm949_vm13  ;;  %vm945_vm1 = vcmp.lt.s32.totalorder %v817_v11, 12  ;;  %v6372_v19 = vmov 0 }
0x121e   :  { %6320 = vst [vmem:[#allocation11_spill] sm:$0xff] %v6319_v35  ;;  %v6325_v10 = vsel %vm5149_vm9, 4294967295, %v6324_v10  ;;  %vm880_vm13 = vcmp.ge.s32.totalorder %v816_v17, 0  ;;  %v859_v35 = vsub.s32 %v4944_v25, %v4888_v12  ;;  %v839_v16 = vsub.s32 %v4944_v25, %v4967_v29 }
0x121f   :  { %6326 = vst [vmem:[#allocation13_spill] sm:$0xff] %v6325_v10 }
0x1223   :  { %v4640_v9 = vpop.eup %4639 }
0x1224   :  { %664 = vrot.lane.b32.xlu0 %v4640_v9, %s4708_s2  ;;  %v6309_v9 = vmov 0  ;;  %v4642_v0 = vpop.eup %4641 }
0x1225   :  { %v6310_v9 = vsel %vm5085_vm12, 4294967295, %v6309_v9  ;;  %vm952_vm12 = vcmp.lt.s32.totalorder %v824_v18, 12 }
0x1226   :  { %6311 = vst [vmem:[#allocation8_spill] sm:$0xff] %v6310_v9  ;;  %vm5138_vm15 = vmand %vm888_vm8, %vm952_vm12  ;;  %vm881_vm8 = vcmp.ge.s32.totalorder %v817_v11, 0 }
0x1227   :  { %v6322_v39 = vsel %vm5138_vm15, 4294967295, %v6321_v39  ;;  %3757 = vmatpush1.msk.msra.mxu0 %vm5138_vm15, %v6207_v22  ;;  %vm5163_vm12 = vmand %vm884_vm5, %vm948_vm14  ;;  %vm944_vm15 = vcmp.lt.s32.totalorder %v816_v17, 12 }
0x1228   :  { %6323 = vst [vmem:[#allocation12_spill] sm:$0xff] %v6322_v39  ;;  %3758 = vmatprep.subr.msk.mxu0 %vm5149_vm9, %v6207_v22  ;;  %v6328_v36 = vsel %vm5163_vm12, 4294967295, %v6327_v36  ;;  %vm5177_vm14 = vmand %vm881_vm8, %vm945_vm1  ;;  %v6342_v39 = vmov 0 }
0x1229   :  { %6329 = vst [vmem:[#allocation14_spill] sm:$0xff] %v6328_v36  ;;  %3759 = vmatpush1.msk.msra.mxu0 %vm5163_vm12, %v6207_v22  ;;  %vm5191_vm5 = vmand %vm880_vm13, %vm944_vm15 }
0x122a   :  { %3760 = vmatprep.subr.msk.mxu0 %vm5177_vm14, %v6207_v22  ;;  %v6334_v1 = vsel %vm5191_vm5, 4294967295, %v6333_v1 }
0x122b   :  { %6335 = vst [vmem:[#allocation16_spill] sm:$0xff] %v6334_v1  ;;  %3761 = vmatpush1.msk.msra.mxu0 %vm5191_vm5, %v6207_v22  ;;  %v5228_v1 = vmul.u32 12, %v4867_v58 }
0x1296   :  { %v665_v38 = vpop.permute.xlu0 %664 }
0x1297   :  { %v667_v54 = vmul.f32 %v4858_v51, %v665_v38  ;;  %v5161_v51 = vadd.s32 24, %v4867_v58  ;;  %v5175_v38 = vadd.s32 16, %v4867_v58 }
0x1299   :  { %v668_v18 = vpack.c.bf16 %v667_v54, %v667_v54  ;;  %v5172_v21 = vmul.u32 12, %v5161_v51  ;;  %v6330_v54 = vmov 0  ;;  %v5196_v57 = vmul.u32 12, %v5175_v38 }
0x129a   :  { %v6331_v54 = vsel %vm5177_vm14, 4294967295, %v6330_v54 }
0x129b   :  { %670 = vrot.lane.b32.xlu1 %v668_v18, %s4711_s27  ;;  %6332 = vst [vmem:[#allocation15_spill] sm:$0xff] %v6331_v54  ;;  %v813_v11 = vsub.s32 %v4870_v59, %v5172_v21  ;;  %v812_v17 = vsub.s32 %v4754_v13, %v5172_v21  ;;  %v5189_v18 = vadd.s32 8, %v4867_v58  ;;  %v6336_v54 = vmov 0 }
0x129c   :  { %v809_v36 = vsub.s32 %v4870_v59, %v5196_v57  ;;  %v808_v10 = vsub.s32 %v4754_v13, %v5196_v57 }
0x129d   :  { %vm877_vm8 = vcmp.ge.s32.totalorder %v813_v11, 0  ;;  %vm941_vm1 = vcmp.lt.s32.totalorder %v813_v11, 12  ;;  %vm876_vm14 = vcmp.ge.s32.totalorder %v812_v17, 0  ;;  %vm940_vm12 = vcmp.lt.s32.totalorder %v812_v17, 12 }
0x129e   :  { %vm5202_vm9 = vmand %vm877_vm8, %vm941_vm1  ;;  %v6339_v11 = vmov 0  ;;  %vm873_vm13 = vcmp.ge.s32.totalorder %v809_v36, 0  ;;  %vm937_vm8 = vcmp.lt.s32.totalorder %v809_v36, 12  ;;  %vm872_vm1 = vcmp.ge.s32.totalorder %v808_v10, 0 }
0x129f   :  { %754 = vrot.lane.b32.xlu1 %v4642_v0, %s4708_s2  ;;  %v6337_v54 = vsel %vm5202_vm9, 4294967295, %v6336_v54  ;;  %3762 = vmatprep.subr.msk.mxu0 %vm5202_vm9, %v6207_v22  ;;  %v5214_v0 = vmul.u32 12, %v5189_v18  ;;  %vm5216_vm15 = vmand %vm876_vm14, %vm940_vm12  ;;  %vm936_vm5 = vcmp.lt.s32.totalorder %v808_v10, 12  ;;  %v6345_v10 = vmov 0 }
0x12a0   :  { %6338 = vst [vmem:[#allocation17_spill] sm:$0xff] %v6337_v54  ;;  %v6340_v11 = vsel %vm5216_vm15, 4294967295, %v6339_v11  ;;  %3763 = vmatpush1.msk.msra.mxu0 %vm5216_vm15, %v6207_v22  ;;  %vm5230_vm12 = vmand %vm873_vm13, %vm937_vm8  ;;  %v801_v36 = vsub.s32 %v4870_v59, %v5228_v1 }
0x12a1   :  { %6341 = vst [vmem:[#allocation18_spill] sm:$0xff] %v6340_v11  ;;  %v805_v17 = vsub.s32 %v4870_v59, %v5214_v0  ;;  %v804_v54 = vsub.s32 %v4754_v13, %v5214_v0  ;;  %v6343_v39 = vsel %vm5230_vm12, 4294967295, %v6342_v39  ;;  %3764 = vmatprep.subr.msk.mxu0 %vm5230_vm12, %v6207_v22  ;;  %vm5237_vm9 = vmand %vm872_vm1, %vm936_vm5  ;;  %v800_v11 = vsub.s32 %v4754_v13, %v5228_v1 }
0x12a2   :  { %6344 = vst [vmem:[#allocation19_spill] sm:$0xff] %v6343_v39  ;;  %v6346_v10 = vsel %vm5237_vm9, 4294967295, %v6345_v10  ;;  %3765 = vmatpush1.msk.msra.mxu0 %vm5237_vm9, %v6207_v22  ;;  %v6348_v39 = vmov 0  ;;  %vm865_vm5 = vcmp.ge.s32.totalorder %v801_v36, 0  ;;  %vm929_vm1 = vcmp.lt.s32.totalorder %v801_v36, 12 }
0x12a3   :  { %vm869_vm14 = vcmp.ge.s32.totalorder %v805_v17, 0  ;;  %vm933_vm15 = vcmp.lt.s32.totalorder %v805_v17, 12  ;;  %6347 = vst [vmem:[#allocation20_spill] sm:$0xff] %v6346_v10  ;;  %vm868_vm13 = vcmp.ge.s32.totalorder %v804_v54, 0  ;;  %vm932_vm8 = vcmp.lt.s32.totalorder %v804_v54, 12 }
0x12a4   :  { %vm5248_vm10 = vmand %vm869_vm14, %vm933_vm15  ;;  %v6351_v59 = vmov 0  ;;  %vm864_vm9 = vcmp.ge.s32.totalorder %v800_v11, 0  ;;  %vm928_vm4 = vcmp.lt.s32.totalorder %v800_v11, 12  ;;  %v6354_v54 = vmov 0  ;;  %v5272_v17 = vld [vmem:[%s6161_s1] sm:$0xf] }
0x12a5   :  { %v6349_v39 = vsel %vm5248_vm10, 4294967295, %v6348_v39  ;;  %3766 = vmatprep.subr.msk.mxu0 %vm5248_vm10, %v6207_v22  ;;  %vm5255_vm12 = vmand %vm868_vm13, %vm932_vm8  ;;  %v6357_v36 = vmov 0  ;;  %v3737_v11 = vmul.f32 -1.442695, %v4854_v41  ;;  %vm923_vm13 = vcmp.ge.s32.totalorder %v859_v35, 0 }
0x12a6   :  { %6350 = vst [vmem:[#allocation21_spill] sm:$0xff] %v6349_v39  ;;  %v6352_v59 = vsel %vm5255_vm12, 4294967295, %v6351_v59  ;;  %3767 = vmatpush1.msk.msra.mxu0 %vm5255_vm12, %v6207_v22  ;;  %vm5262_vm15 = vmand %vm865_vm5, %vm929_vm1  ;;  %v5284_v39 = vadd.s32 256, %v4754_v13  ;;  %vm987_vm8 = vcmp.lt.s32.totalorder %v859_v35, 12  ;;  %v6362_v35 = vmov 0 }
0x12a7   :  { %6353 = vst [vmem:[#allocation22_spill] sm:$0xff] %v6352_v59  ;;  %v6355_v54 = vsel %vm5262_vm15, 4294967295, %v6354_v54  ;;  %3768 = vmatprep.subr.msk.mxu0 %vm5262_vm15, %v6207_v22  ;;  %vm5274_vm14 = vmand %vm864_vm9, %vm928_vm4  ;;  %4643 = vpow2.f32 %v3737_v11  ;;  %v6368_v11 = vmov 0 }
0x12a8   :  { %6356 = vst [vmem:[#allocation23_spill] sm:$0xff] %v6355_v54  ;;  %v6358_v36 = vsel %vm5274_vm14, 4294967295, %v6357_v36  ;;  %3769 = vmatpush1.msk.msra.mxu0 %vm5274_vm14, %v6207_v22  ;;  %v862_v10 = vsub.s32 %v5284_v39, %v4885_v2  ;;  %v858_v22 = vsub.s32 %v5284_v39, %v4888_v12  ;;  %v854_v41 = vsub.s32 %v5284_v39, %v4897_v5  ;;  %vm5306_vm10 = vmand %vm923_vm13, %vm987_vm8 }
0x12a9   :  { %6359 = vst [vmem:[#allocation24_spill] sm:$0xff] %v6358_v36  ;;  %1555 = vmatmul.mubr.f32.vlgmr.msra.gmra.mxu0 %v5272_v17  ;;  %v855_v36 = vsub.s32 %v4944_v25, %v4897_v5  ;;  %v850_v2 = vsub.s32 %v5284_v39, %v4900_v6  ;;  %v6360_v12 = vmov 0  ;;  %v6363_v35 = vsel %vm5306_vm10, 4294967295, %v6362_v35 }
0x12aa   :  { %vm926_vm4 = vcmp.ge.s32.totalorder %v862_v10, 0  ;;  %vm990_vm9 = vcmp.lt.s32.totalorder %v862_v10, 12  ;;  %vm922_vm5 = vcmp.ge.s32.totalorder %v858_v22, 0  ;;  %vm986_vm1 = vcmp.lt.s32.totalorder %v858_v22, 12 }
0x12ab   :  { %vm5300_vm14 = vmand %vm926_vm4, %vm990_vm9  ;;  %vm919_vm15 = vcmp.ge.s32.totalorder %v855_v36, 0  ;;  %vm983_vm12 = vcmp.lt.s32.totalorder %v855_v36, 12  ;;  %v847_v10 = vsub.s32 %v4944_v25, %v4954_v26  ;;  %vm982_vm2 = vcmp.lt.s32.totalorder %v854_v41, 12 }
0x12ac   :  { %v6361_v12 = vsel %vm5300_vm14, 4294967295, %v6360_v12  ;;  %v846_v22 = vsub.s32 %v5284_v39, %v4954_v26  ;;  %vm5313_vm4 = vmand %vm922_vm5, %vm986_vm1  ;;  %v6367_v36 = vmov 1.0   ;;  %vm914_vm8 = vcmp.ge.s32.totalorder %v850_v2, 0 }
0x12ad   :  { %vm5322_vm13 = vmand %vm919_vm15, %vm983_vm12  ;;  %vm978_vm6 = vcmp.lt.s32.totalorder %v850_v2, 12  ;;  %v842_v26 = vsub.s32 %v5284_v39, %v4957_v27  ;;  %vm975_vm15 = vcmp.lt.s32.totalorder %v847_v10, 12  ;;  %v834_v2 = vsub.s32 %v5284_v39, %v4970_v31 }
0x12ae   :  { %v6369_v11 = vsel %vm5322_vm13, 4294967295, %v6368_v11  ;;  %vm5358_vm12 = vmand %vm914_vm8, %vm978_vm6  ;;  %vm6381_vm8 = vcmp.lt.s32.totalorder %v846_v22, 12 }
0x12af   :  { %v6377_v49 = vsel %vm5358_vm12, 4294967295, %v6376_v49  ;;  %vm970_vm6 = vcmp.lt.s32.totalorder %v842_v26, 12 }
0x12b4   :  { %v4644_v54 = vpop.eup %4643 }
0x12b5   :  { %v749_v59 = vadd.f32 1.0, %v4644_v54  ;;  %v843_v54 = vsub.s32 %v4944_v25, %v4957_v27 }
0x12b7   :  { %4645 = vrcp.f32 %v749_v59  ;;  %v851_v59 = vsub.s32 %v4944_v25, %v4900_v6  ;;  %v6365_v6 = vmov 0 }
0x12b8   :  { %v6366_v6 = vsel %vm5313_vm4, 4294967295, %v6365_v6 }
0x12b9   :  { %vm915_vm9 = vcmp.ge.s32.totalorder %v851_v59, 0  ;;  %vm979_vm0 = vcmp.lt.s32.totalorder %v851_v59, 12  ;;  %v835_v59 = vsub.s32 %v4944_v25, %v4970_v31  ;;  %v6386_v31 = vmov 0 }
0x12ba   :  { %vm5346_vm1 = vmand %vm915_vm9, %vm979_vm0  ;;  %vm971_vm9 = vcmp.lt.s32.totalorder %v843_v54, 12  ;;  %vm6382_vm0 = vcmp.ge.s32.totalorder %v846_v22, 0  ;;  %v827_v22 = vsub.s32 %v4944_v25, %v5097_v14 }
0x12c4   :  { %v5339_v9 = vpop.eup %4645 }
0x130d   :  { %v671_v5 = vpop.permute.xlu1 %670 }
0x130e   :  { %4287 = vmatmul.mubr.msk.bf16.vlgmr.msra.gmra.mxu1 %vm6364_vm3, %v671_v5  ;;  %v6370_v5 = vmov 0.0   ;;  %vm6371_vm3 = vcmp.ge.s32.totalorder %v854_v41, 0  ;;  %v6374_v41 = vmov 0 }
0x130f   :  { %3771 = vmatpush1.msk.msra.mxu1 %vm5300_vm14, %v6367_v36  ;;  %1625 = vmatprep.mubr.f32.mxu1 %v6370_v5  ;;  %vm5333_vm5 = vmand %vm6371_vm3, %vm982_vm2  ;;  %v6375_v41 = vsel %vm5346_vm1, 4294967295, %v6374_v41  ;;  %v838_v5 = vsub.s32 %v5284_v39, %v4967_v29  ;;  %vm6378_vm2 = vcmp.ge.s32.totalorder %v847_v10, 0  ;;  %v6379_v29 = vmov 0 }
0x1310   :  { %3772 = vmatprep.subr.msk.mxu1 %vm5306_vm10, %v6367_v36  ;;  %v6373_v19 = vsel %vm5333_vm5, 4294967295, %v6372_v19  ;;  %vm5369_vm3 = vmand %vm6378_vm2, %vm975_vm15  ;;  %vm903_vm15 = vcmp.ge.s32.totalorder %v839_v16, 0  ;;  %vm967_vm2 = vcmp.lt.s32.totalorder %v839_v16, 12  ;;  %v831_v10 = vsub.s32 %v4944_v25, %v5080_v55 }
0x1311   :  { %3773 = vmatpush1.msk.msra.mxu1 %vm5313_vm4, %v6367_v36  ;;  %v755_v27 = vpop.permute.xlu1 %754  ;;  %v6380_v29 = vsel %vm5369_vm3, 4294967295, %v6379_v29  ;;  %vm5380_vm4 = vmand %vm6382_vm0, %vm6381_vm8  ;;  %vm966_vm10 = vcmp.lt.s32.totalorder %v838_v5, 12  ;;  %vm6388_vm0 = vcmp.ge.s32.totalorder %v842_v26, 0  ;;  %v6389_v16 = vmov 0 }
0x1312   :  { %3774 = vmatprep.subr.msk.mxu1 %vm5322_vm13, %v6367_v36  ;;  %v757_v50 = vmul.f32 %v5339_v9, %v755_v27  ;;  %v6383_v27 = vmov 0  ;;  %vm6385_vm13 = vcmp.ge.s32.totalorder %v843_v54, 0  ;;  %vm5400_vm8 = vmand %vm6388_vm0, %vm970_vm6  ;;  %vm963_vm14 = vcmp.lt.s32.totalorder %v835_v59, 12 }
0x1313   :  { %3775 = vmatpush1.msk.msra.mxu1 %vm5333_vm5, %v6367_v36  ;;  %v6384_v27 = vsel %vm5380_vm4, 4294967295, %v6383_v27  ;;  %vm5390_vm5 = vmand %vm6385_vm13, %vm971_vm9  ;;  %v6390_v16 = vsel %vm5400_vm8, 4294967295, %v6389_v16  ;;  %vm898_vm9 = vcmp.ge.s32.totalorder %v834_v2, 0  ;;  %v826_v54 = vsub.s32 %v5284_v39, %v5097_v14 }
0x1314   :  { %4647 = vtanh.f32 %v757_v50  ;;  %3776 = vmatprep.subr.msk.mxu1 %vm5346_vm1, %v6367_v36  ;;  %v6387_v31 = vsel %vm5390_vm5, 4294967295, %v6386_v31  ;;  %vm902_vm1 = vcmp.ge.s32.totalorder %v838_v5, 0  ;;  %v830_v50 = vsub.s32 %v5284_v39, %v5080_v55  ;;  %vm5409_vm13 = vmand %vm903_vm15, %vm967_vm2 }
0x1315   :  { %3777 = vmatpush1.msk.msra.mxu1 %vm5358_vm12, %v6367_v36  ;;  %vm899_vm12 = vcmp.ge.s32.totalorder %v835_v59, 0  ;;  %v6391_v55 = vmov 0  ;;  %vm5418_vm6 = vmand %vm902_vm1, %vm966_vm10  ;;  %v6393_v26 = vmov 0  ;;  %vm895_vm0 = vcmp.ge.s32.totalorder %v831_v10, 0 }
0x1316   :  { %3778 = vmatprep.subr.msk.mxu1 %vm5369_vm3, %v6367_v36  ;;  %v6392_v55 = vsel %vm5409_vm13, 4294967295, %v6391_v55  ;;  %vm962_vm3 = vcmp.lt.s32.totalorder %v834_v2, 12  ;;  %v6394_v26 = vsel %vm5418_vm6, 4294967295, %v6393_v26  ;;  %vm959_vm7 = vcmp.lt.s32.totalorder %v831_v10, 12  ;;  %vm5427_vm15 = vmand %vm899_vm12, %vm963_vm14 }
0x1317   :  { %3779 = vmatpush1.msk.msra.mxu1 %vm5380_vm4, %v6367_v36  ;;  %6395 = vst [vmem:[#allocation25_spill] sm:$0xff] %v6394_v26  ;;  %v823_v5 = vsub.s32 %v4944_v25, %v5119_v33  ;;  %v6396_v59 = vmov 0  ;;  %vm894_vm2 = vcmp.ge.s32.totalorder %v830_v50, 0  ;;  %vm958_vm4 = vcmp.lt.s32.totalorder %v830_v50, 12  ;;  %vm5436_vm10 = vmand %vm898_vm9, %vm962_vm3 }
0x1318   :  { %3780 = vmatprep.subr.msk.mxu1 %vm5390_vm5, %v6367_v36  ;;  %v6397_v59 = vsel %vm5427_vm15, 4294967295, %v6396_v59  ;;  %v822_v14 = vsub.s32 %v5284_v39, %v5119_v33  ;;  %v6399_v2 = vmov 0  ;;  %vm891_vm1 = vcmp.ge.s32.totalorder %v827_v22, 0  ;;  %vm5445_vm14 = vmand %vm895_vm0, %vm959_vm7 }
0x1319   :  { %3781 = vmatpush1.msk.msra.mxu1 %vm5400_vm8, %v6367_v36  ;;  %6398 = vst [vmem:[#allocation26_spill] sm:$0xff] %v6397_v59  ;;  %v6400_v2 = vsel %vm5436_vm10, 4294967295, %v6399_v2  ;;  %vm955_vm5 = vcmp.lt.s32.totalorder %v827_v22, 12  ;;  %v819_v10 = vsub.s32 %v4944_v25, %v5143_v42  ;;  %v6402_v50 = vmov 0  ;;  %vm5454_vm3 = vmand %vm894_vm2, %vm958_vm4 }
0x131a   :  { %3782 = vmatprep.subr.msk.mxu1 %vm5409_vm13, %v6367_v36  ;;  %6401 = vst [vmem:[#allocation27_spill] sm:$0xff] %v6400_v2  ;;  %v6403_v50 = vsel %vm5445_vm14, 4294967295, %v6402_v50  ;;  %vm890_vm12 = vcmp.ge.s32.totalorder %v826_v54, 0  ;;  %vm954_vm8 = vcmp.lt.s32.totalorder %v826_v54, 12  ;;  %v818_v33 = vsub.s32 %v5284_v39, %v5143_v42  ;;  %vm5463_vm7 = vmand %vm891_vm1, %vm955_vm5 }
0x131b   :  { %3783 = vmatpush1.msk.msra.mxu1 %vm5418_vm6, %v6367_v36  ;;  %6404 = vst [vmem:[#allocation28_spill] sm:$0xff] %v6403_v50  ;;  %v6405_v22 = vmov 0  ;;  %vm887_vm9 = vcmp.ge.s32.totalorder %v823_v5, 0  ;;  %vm951_vm13 = vcmp.lt.s32.totalorder %v823_v5, 12  ;;  %v815_v26 = vsub.s32 %v4944_v25, %v5172_v21  ;;  %vm5472_vm4 = vmand %vm890_vm12, %vm954_vm8 }
0x131c   :  { %3784 = vmatprep.subr.msk.mxu1 %vm5427_vm15, %v6367_v36  ;;  %v6406_v22 = vsel %vm5454_vm3, 4294967295, %v6405_v22  ;;  %v6408_v54 = vmov 0  ;;  %vm886_vm0 = vcmp.ge.s32.totalorder %v822_v14, 0  ;;  %vm950_vm6 = vcmp.lt.s32.totalorder %v822_v14, 12  ;;  %vm5481_vm5 = vmand %vm887_vm9, %vm951_vm13 }
0x131d   :  { %6407 = vst [vmem:[#allocation29_spill] sm:$0xff] %v6406_v22  ;;  %3785 = vmatpush1.msk.msra.mxu1 %vm5436_vm10, %v6367_v36  ;;  %v6409_v54 = vsel %vm5463_vm7, 4294967295, %v6408_v54  ;;  %v814_v42 = vsub.s32 %v5284_v39, %v5172_v21  ;;  %v6411_v5 = vmov 0  ;;  %vm947_vm15 = vcmp.lt.s32.totalorder %v819_v10, 12  ;;  %vm5490_vm8 = vmand %vm886_vm0, %vm950_vm6 }
0x131e   :  { %6410 = vst [vmem:[#allocation30_spill] sm:$0xff] %v6409_v54  ;;  %3786 = vmatprep.subr.msk.mxu1 %vm5445_vm14, %v6367_v36  ;;  %v6412_v5 = vsel %vm5472_vm4, 4294967295, %v6411_v5  ;;  %v811_v2 = vsub.s32 %v4944_v25, %v5196_v57  ;;  %v6414_v14 = vmov 0  ;;  %vm946_vm10 = vcmp.lt.s32.totalorder %v818_v33, 12 }
0x131f   :  { %6413 = vst [vmem:[#allocation31_spill] sm:$0xff] %v6412_v5  ;;  %3787 = vmatpush1.msk.msra.mxu1 %vm5454_vm3, %v6367_v36  ;;  %v6415_v14 = vsel %vm5481_vm5, 4294967295, %v6414_v14  ;;  %v810_v21 = vsub.s32 %v5284_v39, %v5196_v57  ;;  %v6416_v50 = vmov 0  ;;  %vm943_vm2 = vcmp.lt.s32.totalorder %v815_v26, 12 }
0x1320   :  { %3788 = vmatprep.subr.msk.mxu1 %vm5463_vm7, %v6367_v36  ;;  %v6417_v50 = vsel %vm5490_vm8, 4294967295, %v6416_v50  ;;  %v807_v22 = vsub.s32 %v4944_v25, %v5214_v0  ;;  %vm6419_vm13 = vcmp.ge.s32.totalorder %v819_v10, 0  ;;  %v6420_v57 = vmov 0 }
0x1321   :  { %6418 = vst [vmem:[#allocation32_spill] sm:$0xff] %v6417_v50  ;;  %v4648_v59 = vpop.eup %4647  ;;  %3789 = vmatpush1.msk.msra.mxu1 %vm5472_vm4, %v6367_v36  ;;  %vm5500_vm9 = vmand %vm6419_vm13, %vm947_vm15  ;;  %vm942_vm6 = vcmp.lt.s32.totalorder %v814_v42, 12  ;;  %v806_v54 = vsub.s32 %v5284_v39, %v5214_v0  ;;  %vm6423_vm0 = vcmp.ge.s32.totalorder %v818_v33, 0  ;;  %v6424_v5 = vmov 0 }
0x1322   :  { %v6421_v57 = vsel %vm5500_vm9, 4294967295, %v6420_v57  ;;  %3790 = vmatprep.subr.msk.mxu1 %vm5481_vm5, %v6367_v36  ;;  %760 = vrot.lane.b32.xlu1 %v4648_v59, %s4710_s26  ;;  %vm5512_vm12 = vmand %vm6423_vm0, %vm946_vm10  ;;  %vm875_vm15 = vcmp.ge.s32.totalorder %v811_v2, 0  ;;  %vm939_vm13 = vcmp.lt.s32.totalorder %v811_v2, 12  ;;  %v803_v10 = vsub.s32 %v4944_v25, %v5228_v1 }
0x1323   :  { %6422 = vst [vmem:[#allocation33_spill] sm:$0xff] %v6421_v57  ;;  %v6425_v5 = vsel %vm5512_vm12, 4294967295, %v6424_v5  ;;  %3791 = vmatpush1.msk.msra.mxu1 %vm5490_vm8, %v6367_v36  ;;  %vm6427_vm1 = vcmp.ge.s32.totalorder %v815_v26, 0  ;;  %v6428_v0 = vmov 0  ;;  %vm874_vm4 = vcmp.ge.s32.totalorder %v810_v21, 0 }
0x1324   :  { %6426 = vst [vmem:[#allocation34_spill] sm:$0xff] %v6425_v5  ;;  %vm5523_vm5 = vmand %vm6427_vm1, %vm943_vm2  ;;  %vm938_vm10 = vcmp.lt.s32.totalorder %v810_v21, 12  ;;  %v802_v59 = vsub.s32 %v5284_v39, %v5228_v1  ;;  %3792 = vmatprep.subr.msk.mxu1 %vm5500_vm9, %v6367_v36  ;;  %vm6431_vm0 = vcmp.ge.s32.totalorder %v814_v42, 0  ;;  %v6432_v25 = vmov 0 }
0x1325   :  { %v6429_v0 = vsel %vm5523_vm5, 4294967295, %v6428_v0  ;;  %vm5533_vm7 = vmand %vm6431_vm0, %vm942_vm6  ;;  %vm871_vm8 = vcmp.ge.s32.totalorder %v807_v22, 0  ;;  %vm935_vm3 = vcmp.lt.s32.totalorder %v807_v22, 12  ;;  %3793 = vmatpush1.msk.msra.mxu1 %vm5512_vm12, %v6367_v36  ;;  %v6435_v26 = vmov 0 }
0x1326   :  { %6430 = vst [vmem:[#allocation35_spill] sm:$0xff] %v6429_v0  ;;  %v6433_v25 = vsel %vm5533_vm7, 4294967295, %v6432_v25  ;;  %vm5540_vm2 = vmand %vm875_vm15, %vm939_vm13  ;;  %vm870_vm1 = vcmp.ge.s32.totalorder %v806_v54, 0  ;;  %vm934_vm14 = vcmp.lt.s32.totalorder %v806_v54, 12  ;;  %3794 = vmatprep.subr.msk.mxu1 %vm5523_vm5, %v6367_v36  ;;  %v6438_v1 = vmov 0 }
0x1327   :  { %6434 = vst [vmem:[#allocation36_spill] sm:$0xff] %v6433_v25  ;;  %v6436_v26 = vsel %vm5540_vm2, 4294967295, %v6435_v26  ;;  %vm5547_vm6 = vmand %vm874_vm4, %vm938_vm10  ;;  %vm867_vm0 = vcmp.ge.s32.totalorder %v803_v10, 0  ;;  %vm931_vm9 = vcmp.lt.s32.totalorder %v803_v10, 12  ;;  %3795 = vmatpush1.msk.msra.mxu1 %vm5533_vm7, %v6367_v36  ;;  %v6441_v39 = vmov 0 }
0x1328   :  { %6437 = vst [vmem:[#allocation37_spill] sm:$0xff] %v6436_v26  ;;  %v6439_v1 = vsel %vm5547_vm6, 4294967295, %v6438_v1  ;;  %vm5554_vm15 = vmand %vm871_vm8, %vm935_vm3  ;;  %vm866_vm13 = vcmp.ge.s32.totalorder %v802_v59, 0  ;;  %vm930_vm12 = vcmp.lt.s32.totalorder %v802_v59, 12  ;;  %3796 = vmatprep.subr.msk.mxu1 %vm5540_vm2, %v6367_v36  ;;  %v6444_v2 = vmov 0 }
0x1329   :  { %6440 = vst [vmem:[#allocation38_spill] sm:$0xff] %v6439_v1  ;;  %v6442_v39 = vsel %vm5554_vm15, 4294967295, %v6441_v39  ;;  %vm5561_vm4 = vmand %vm870_vm1, %vm934_vm14  ;;  %3797 = vmatpush1.msk.msra.mxu1 %vm5547_vm6, %v6367_v36  ;;  %v6447_v33 = vmov 0  ;;  %v6450_v22 = vmov 0  ;;  %v5590_v54 = vmul.u32 12, %v4754_v13 }
0x132a   :  { %6443 = vst [vmem:[#allocation39_spill] sm:$0xff] %v6442_v39  ;;  %v6445_v2 = vsel %vm5561_vm4, 4294967295, %v6444_v2  ;;  %vm5568_vm10 = vmand %vm867_vm0, %vm931_vm9  ;;  %3798 = vmatprep.subr.msk.mxu1 %vm5554_vm15, %v6367_v36  ;;  %v1135_v42 = vadd.s32 248, %v4867_v58  ;;  %v1167_v21 = vadd.s32 504, %v4867_v58  ;;  %v1151_v10 = vadd.s32 376, %v4867_v58 }
0x132b   :  { %6446 = vst [vmem:[#allocation40_spill] sm:$0xff] %v6445_v2  ;;  %v6448_v33 = vsel %vm5568_vm10, 4294967295, %v6447_v33  ;;  %vm5575_vm3 = vmand %vm866_vm13, %vm930_vm12  ;;  %3799 = vmatpush1.msk.msra.mxu1 %vm5561_vm4, %v6367_v36  ;;  %v1134_v2 = vadd.s32 240, %v4867_v58  ;;  %v1183_v39 = vsub.s32 %v4876_v61, %v5590_v54 }
0x132c   :  { %6449 = vst [vmem:[#allocation41_spill] sm:$0xff] %v6448_v33  ;;  %v6451_v22 = vsel %vm5575_vm3, 4294967295, %v6450_v22  ;;  %3800 = vmatprep.subr.msk.mxu1 %vm5568_vm10, %v6367_v36  ;;  %v1200_v59 = vsub.s32 %v1135_v42, %v5590_v54  ;;  %v1232_v33 = vsub.s32 %v1167_v21, %v5590_v54  ;;  %v1216_v13 = vsub.s32 %v1151_v10, %v5590_v54 }
0x132d   :  { %6452 = vst [vmem:[#allocation42_spill] sm:$0xff] %v6451_v22  ;;  %3801 = vmatpush1.msk.msra.mxu1 %vm5575_vm3, %v6367_v36  ;;  %v1166_v22 = vadd.s32 496, %v4867_v58  ;;  %v1199_v42 = vsub.s32 %v1134_v2, %v5590_v54  ;;  %vm1247_vm6 = vcmp.ge.s32.totalorder %v1183_v39, 0  ;;  %vm1311_vm2 = vcmp.lt.s32.totalorder %v1183_v39, 12 }
0x132e   :  { %1626 = vmatmul.mubr.f32.vlgmr.msra.gmra.mxu1 %v5272_v17  ;;  %v1184_v17 = vsub.s32 %v4873_v60, %v5590_v54  ;;  %vm1264_vm14 = vcmp.ge.s32.totalorder %v1200_v59, 0  ;;  %vm1328_vm8 = vcmp.lt.s32.totalorder %v1200_v59, 12  ;;  %vm1296_vm12 = vcmp.ge.s32.totalorder %v1232_v33, 0 }
0x132f   :  { %vm1360_vm9 = vcmp.lt.s32.totalorder %v1232_v33, 12  ;;  %vm1392_vm1 = vmand %vm1264_vm14, %vm1328_vm8  ;;  %v1231_v21 = vsub.s32 %v1166_v22, %v5590_v54  ;;  %v1150_v60 = vadd.s32 368, %v4867_v58  ;;  %v1133_v59 = vadd.s32 232, %v4867_v58 }
0x1330   :  { %vm1248_vm0 = vcmp.ge.s32.totalorder %v1184_v17, 0  ;;  %vm1312_vm13 = vcmp.lt.s32.totalorder %v1184_v17, 12  ;;  %4142 = vmatprep.subr.msk.mxu0 %vm1392_vm1, %v6367_v36  ;;  %vm1424_vm3 = vmand %vm1296_vm12, %vm1360_vm9  ;;  %vm1280_vm8 = vcmp.ge.s32.totalorder %v1216_v13, 0  ;;  %vm1344_vm10 = vcmp.lt.s32.totalorder %v1216_v13, 12 }
0x1331   :  { %4177 = vmatprep.subr.msk.mxu1 %vm1424_vm3, %v6367_v36  ;;  %vm1376_vm14 = vmand %vm1248_vm0, %vm1312_vm13  ;;  %vm1263_vm4 = vcmp.ge.s32.totalorder %v1199_v42, 0  ;;  %vm1327_vm15 = vcmp.lt.s32.totalorder %v1199_v42, 12  ;;  %vm1295_vm12 = vcmp.ge.s32.totalorder %v1231_v21, 0  ;;  %vm1359_vm9 = vcmp.lt.s32.totalorder %v1231_v21, 12 }
0x1332   :  { %4143 = vmatpush3.msk.msra.mxu0 %vm1376_vm14, %v6367_v36  ;;  %vm1408_vm1 = vmand %vm1280_vm8, %vm1344_vm10  ;;  %v1215_v61 = vsub.s32 %v1150_v60, %v5590_v54  ;;  %v1198_v2 = vsub.s32 %v1133_v59, %v5590_v54  ;;  %v1165_v33 = vadd.s32 488, %v4867_v58  ;;  %v1182_v22 = vsub.s32 %v4879_v62, %v5590_v54 }
0x1333   :  { %4178 = vmatpush3.msk.msra.mxu1 %vm1408_vm1, %v6367_v36  ;;  %vm1391_vm7 = vmand %vm1263_vm4, %vm1327_vm15  ;;  %v1149_v10 = vadd.s32 360, %v4867_v58  ;;  %v1132_v17 = vadd.s32 224, %v4867_v58  ;;  %v1164_v13 = vadd.s32 480, %v4867_v58  ;;  %v1181_v42 = vsub.s32 %v4882_v63, %v5590_v54 }
0x1334   :  { %4144 = vmatprep.subr.msk.mxu0 %vm1391_vm7, %v6367_v36  ;;  %vm1423_vm3 = vmand %vm1295_vm12, %vm1359_vm9  ;;  %vm1279_vm4 = vcmp.ge.s32.totalorder %v1215_v61, 0  ;;  %vm1343_vm10 = vcmp.lt.s32.totalorder %v1215_v61, 12  ;;  %vm1262_vm0 = vcmp.ge.s32.totalorder %v1198_v2, 0  ;;  %vm1326_vm13 = vcmp.lt.s32.totalorder %v1198_v2, 12 }
0x1335   :  { %4179 = vmatprep.subr.msk.mxu1 %vm1423_vm3, %v6367_v36  ;;  %vm1375_vm15 = vmand %vm1247_vm6, %vm1311_vm2  ;;  %v1230_v21 = vsub.s32 %v1165_v33, %v5590_v54  ;;  %vm1246_vm14 = vcmp.ge.s32.totalorder %v1182_v22, 0  ;;  %vm1310_vm8 = vcmp.lt.s32.totalorder %v1182_v22, 12  ;;  %v1214_v60 = vsub.s32 %v1149_v10, %v5590_v54 }
0x1336   :  { %4145 = vmatpush3.msk.msra.mxu0 %vm1375_vm15, %v6367_v36  ;;  %vm1407_vm7 = vmand %vm1279_vm4, %vm1343_vm10  ;;  %v1197_v39 = vsub.s32 %v1132_v17, %v5590_v54  ;;  %v1229_v59 = vsub.s32 %v1164_v13, %v5590_v54  ;;  %vm1245_vm2 = vcmp.ge.s32.totalorder %v1181_v42, 0  ;;  %vm1309_vm11 = vcmp.lt.s32.totalorder %v1181_v42, 12 }
0x1337   :  { %4180 = vmatpush3.msk.msra.mxu1 %vm1407_vm7, %v6367_v36  ;;  %vm1390_vm1 = vmand %vm1262_vm0, %vm1326_vm13  ;;  %vm1294_vm6 = vcmp.ge.s32.totalorder %v1230_v21, 0  ;;  %vm1358_vm12 = vcmp.lt.s32.totalorder %v1230_v21, 12  ;;  %vm1278_vm3 = vcmp.ge.s32.totalorder %v1214_v60, 0  ;;  %vm1342_vm15 = vcmp.lt.s32.totalorder %v1214_v60, 12 }
0x1338   :  { %4146 = vmatprep.subr.msk.mxu0 %vm1390_vm1, %v6367_v36  ;;  %vm1374_vm9 = vmand %vm1246_vm14, %vm1310_vm8  ;;  %vm1261_vm10 = vcmp.ge.s32.totalorder %v1197_v39, 0  ;;  %vm1325_vm5 = vcmp.lt.s32.totalorder %v1197_v39, 12  ;;  %vm1293_vm7 = vcmp.ge.s32.totalorder %v1229_v59, 0  ;;  %vm1357_vm13 = vcmp.lt.s32.totalorder %v1229_v59, 12 }
0x1339   :  { %vm1422_vm4 = vmand %vm1294_vm6, %vm1358_vm12  ;;  %4147 = vmatpush3.msk.msra.mxu0 %vm1374_vm9, %v6367_v36  ;;  %v1131_v2 = vadd.s32 216, %v4867_v58  ;;  %v1163_v22 = vadd.s32 472, %v4867_v58  ;;  %v1180_v10 = vsub.s32 %v4891_v3, %v5590_v54  ;;  %v1147_v17 = vadd.s32 344, %v4867_v58 }
0x133a   :  { %4181 = vmatprep.subr.msk.mxu1 %vm1422_vm4, %v6367_v36  ;;  %vm1406_vm0 = vmand %vm1278_vm3, %vm1342_vm15  ;;  %v1130_v21 = vadd.s32 208, %v4867_v58  ;;  %v1162_v60 = vadd.s32 464, %v4867_v58  ;;  %v1159_v39 = vadd.s32 440, %v4867_v58 }
0x133b   :  { %4182 = vmatpush3.msk.msra.mxu1 %vm1406_vm0, %v6367_v36  ;;  %vm1389_vm14 = vmand %vm1261_vm10, %vm1325_vm5  ;;  %v1228_v3 = vsub.s32 %v1163_v22, %v5590_v54  ;;  %vm1244_vm1 = vcmp.ge.s32.totalorder %v1180_v10, 0  ;;  %vm1308_vm6 = vcmp.lt.s32.totalorder %v1180_v10, 12  ;;  %v1178_v22 = vsub.s32 %v4903_v7, %v5590_v54 }
0x133c   :  { %4148 = vmatprep.subr.msk.mxu0 %vm1389_vm14, %v6367_v36  ;;  %vm1421_vm8 = vmand %vm1293_vm7, %vm1357_vm13  ;;  %v1195_v42 = vsub.s32 %v1130_v21, %v5590_v54  ;;  %v1227_v59 = vsub.s32 %v1162_v60, %v5590_v54  ;;  %v1145_v10 = vadd.s32 328, %v4867_v58  ;;  %v1160_v21 = vadd.s32 448, %v4867_v58 }
0x133d   :  { %4183 = vmatprep.subr.msk.mxu1 %vm1421_vm8, %v6367_v36  ;;  %vm1373_vm5 = vmand %vm1245_vm2, %vm1309_vm11  ;;  %vm1292_vm7 = vcmp.ge.s32.totalorder %v1228_v3, 0  ;;  %vm1356_vm0 = vcmp.lt.s32.totalorder %v1228_v3, 12  ;;  %v1177_v60 = vsub.s32 %v4906_v8, %v5590_v54  ;;  %v1144_v3 = vadd.s32 320, %v4867_v58 }
0x133e   :  { %4149 = vmatpush3.msk.msra.mxu0 %vm1373_vm5, %v6367_v36  ;;  %vm5654_vm4 = vmand %vm1244_vm1, %vm1308_vm6  ;;  %vm1259_vm5 = vcmp.ge.s32.totalorder %v1195_v42, 0  ;;  %vm1323_vm1 = vcmp.lt.s32.totalorder %v1195_v42, 12  ;;  %vm1291_vm6 = vcmp.ge.s32.totalorder %v1227_v59, 0  ;;  %v1176_v42 = vsub.s32 %v5075_v53, %v5590_v54 }
0x133f   :  { %vm1420_vm14 = vmand %vm1292_vm7, %vm1356_vm0  ;;  %vm1306_vm7 = vcmp.lt.s32.totalorder %v1178_v22, 12  ;;  %v1209_v53 = vsub.s32 %v1144_v3, %v5590_v54 }
0x1394   :  { %v761_v62 = vpop.permute.xlu1 %760 }
0x1395   :  { %v763_v63 = vmul.f32 %v5339_v9, %v761_v62  ;;  %v1148_v9 = vadd.s32 352, %v4867_v58  ;;  %v1196_v62 = vsub.s32 %v1131_v2, %v5590_v54  ;;  %v1129_v2 = vadd.s32 200, %v4867_v58 }
0x1397   :  { %v2884_v61 = vpack.c.bf16 %v763_v63, %v763_v63  ;;  %v1213_v13 = vsub.s32 %v1148_v9, %v5590_v54  ;;  %v1212_v63 = vsub.s32 %v1147_v17, %v5590_v54  ;;  %vm1260_vm3 = vcmp.ge.s32.totalorder %v1196_v62, 0 }
0x1398   :  { %vm1324_vm15 = vcmp.lt.s32.totalorder %v1196_v62, 12  ;;  %v1146_v9 = vadd.s32 336, %v4867_v58  ;;  %v1194_v7 = vsub.s32 %v1129_v2, %v5590_v54  ;;  %v1128_v62 = vadd.s32 192, %v4867_v58 }
0x1399   :  { %v2890_v33 = vrot.slane %v2884_v61, 2  ;;  %vm1277_vm12 = vcmp.ge.s32.totalorder %v1213_v13, 0  ;;  %vm1341_vm9 = vcmp.lt.s32.totalorder %v1213_v13, 12  ;;  %vm1276_vm11 = vcmp.ge.s32.totalorder %v1212_v63, 0  ;;  %vm1388_vm13 = vmand %vm1260_vm3, %vm1324_vm15 }
0x139a   :  { %vm1405_vm10 = vmand %vm1277_vm12, %vm1341_vm9  ;;  %vm1340_vm2 = vcmp.lt.s32.totalorder %v1212_v63, 12  ;;  %v1179_v61 = vsub.s32 %v4894_v4, %v5590_v54  ;;  %4150 = vmatprep.subr.msk.mxu0 %vm1388_vm13, %v6367_v36  ;;  %vm1355_vm12 = vcmp.lt.s32.totalorder %v1227_v59, 12  ;;  %v1211_v4 = vsub.s32 %v1146_v9, %v5590_v54 }
0x139b   :  { %2891 = vrot.lane.b32.xlu1 %v2890_v33, %s4711_s27  ;;  %4184 = vmatpush3.msk.msra.mxu1 %vm1405_vm10, %v6367_v36  ;;  %v1161_v33 = vadd.s32 456, %v4867_v58  ;;  %vm1404_vm8 = vmand %vm1276_vm11, %vm1340_vm2  ;;  %v1210_v13 = vsub.s32 %v1145_v10, %v5590_v54  ;;  %vm1258_vm13 = vcmp.ge.s32.totalorder %v1194_v7, 0  ;;  %v1127_v63 = vadd.s32 184, %v4867_v58 }
0x139c   :  { %4185 = vmatprep.subr.msk.mxu1 %vm1420_vm14, %v6367_v36  ;;  %4151 = vmatpush3.msk.msra.mxu0 %vm5654_vm4, %v6367_v36  ;;  %vm1387_vm9 = vmand %vm1259_vm5, %vm1323_vm1  ;;  %vm1243_vm3 = vcmp.ge.s32.totalorder %v1179_v61, 0  ;;  %vm1307_vm15 = vcmp.lt.s32.totalorder %v1179_v61, 12  ;;  %vm1242_vm4 = vcmp.ge.s32.totalorder %v1178_v22, 0  ;;  %vm1275_vm11 = vcmp.ge.s32.totalorder %v1211_v4, 0 }
0x139d   :  { %4186 = vmatpush3.msk.msra.mxu1 %vm1404_vm8, %v6367_v36  ;;  %4152 = vmatprep.subr.msk.mxu0 %vm1387_vm9, %v6367_v36  ;;  %vm1419_vm10 = vmand %vm1291_vm6, %vm1355_vm12  ;;  %v1226_v17 = vsub.s32 %v1161_v33, %v5590_v54  ;;  %vm1339_vm2 = vcmp.lt.s32.totalorder %v1211_v4, 12  ;;  %vm1322_vm14 = vcmp.lt.s32.totalorder %v1194_v7, 12  ;;  %vm1274_vm9 = vcmp.ge.s32.totalorder %v1210_v13, 0 }
0x139e   :  { %4187 = vmatprep.subr.msk.mxu1 %vm1419_vm10, %v6367_v36  ;;  %vm1371_vm0 = vmand %vm1243_vm3, %vm1307_vm15  ;;  %vm1338_vm6 = vcmp.lt.s32.totalorder %v1210_v13, 12  ;;  %v1143_v59 = vadd.s32 312, %v4867_v58  ;;  %v1193_v8 = vsub.s32 %v1128_v62, %v5590_v54  ;;  %v1225_v61 = vsub.s32 %v1160_v21, %v5590_v54 }
0x139f   :  { %4153 = vmatpush3.msk.msra.mxu0 %vm1371_vm0, %v6367_v36  ;;  %vm1403_vm8 = vmand %vm1275_vm11, %vm1339_vm2  ;;  %vm1290_vm5 = vcmp.ge.s32.totalorder %v1226_v17, 0  ;;  %vm1354_vm1 = vcmp.lt.s32.totalorder %v1226_v17, 12  ;;  %vm1241_vm10 = vcmp.ge.s32.totalorder %v1177_v60, 0  ;;  %vm1305_vm0 = vcmp.lt.s32.totalorder %v1177_v60, 12 }
0x13a0   :  { %4188 = vmatpush3.msk.msra.mxu1 %vm1403_vm8, %v6367_v36  ;;  %vm1386_vm12 = vmand %vm1258_vm13, %vm1322_vm14  ;;  %v1192_v9 = vsub.s32 %v1127_v63, %v5590_v54  ;;  %v1224_v2 = vsub.s32 %v1159_v39, %v5590_v54  ;;  %vm1289_vm13 = vcmp.ge.s32.totalorder %v1225_v61, 0  ;;  %vm1353_vm14 = vcmp.lt.s32.totalorder %v1225_v61, 12 }
0x13a1   :  { %4154 = vmatprep.subr.msk.mxu0 %vm1386_vm12, %v6367_v36  ;;  %vm1418_vm3 = vmand %vm1290_vm5, %vm1354_vm1  ;;  %vm1273_vm1 = vcmp.ge.s32.totalorder %v1209_v53, 0  ;;  %vm1337_vm12 = vcmp.lt.s32.totalorder %v1209_v53, 12  ;;  %v1208_v33 = vsub.s32 %v1143_v59, %v5590_v54  ;;  %v1126_v22 = vadd.s32 176, %v4867_v58 }
0x13a2   :  { %4189 = vmatprep.subr.msk.mxu1 %vm1418_vm3, %v6367_v36  ;;  %vm1370_vm15 = vmand %vm1242_vm4, %vm1306_vm7  ;;  %vm1257_vm4 = vcmp.ge.s32.totalorder %v1193_v8, 0  ;;  %vm1321_vm7 = vcmp.lt.s32.totalorder %v1193_v8, 12  ;;  %vm1256_vm3 = vcmp.ge.s32.totalorder %v1192_v9, 0  ;;  %vm1352_vm2 = vcmp.lt.s32.totalorder %v1224_v2, 12 }
0x13a3   :  { %4155 = vmatpush3.msk.msra.mxu0 %vm1370_vm15, %v6367_v36  ;;  %vm1402_vm11 = vmand %vm1274_vm9, %vm1338_vm6  ;;  %vm1320_vm15 = vcmp.lt.s32.totalorder %v1192_v9, 12  ;;  %vm1288_vm6 = vcmp.ge.s32.totalorder %v1224_v2, 0  ;;  %v1158_v10 = vadd.s32 432, %v4867_v58  ;;  %v1175_v4 = vsub.s32 %v5083_v56, %v5590_v54 }
0x13a4   :  { %4190 = vmatpush3.msk.msra.mxu1 %vm1402_vm11, %v6367_v36  ;;  %vm1369_vm8 = vmand %vm1241_vm10, %vm1305_vm0  ;;  %vm1304_vm11 = vcmp.lt.s32.totalorder %v1176_v42, 12  ;;  %v1142_v7 = vadd.s32 304, %v4867_v58  ;;  %v1125_v17 = vadd.s32 168, %v4867_v58  ;;  %v1157_v13 = vadd.s32 424, %v4867_v58 }
0x13a5   :  { %vm1385_vm5 = vmand %vm1257_vm4, %vm1321_vm7  ;;  %vm1272_vm4 = vcmp.ge.s32.totalorder %v1208_v33, 0  ;;  %vm1336_vm7 = vcmp.lt.s32.totalorder %v1208_v33, 12  ;;  %v1191_v56 = vsub.s32 %v1126_v22, %v5590_v54  ;;  %v1223_v62 = vsub.s32 %v1158_v10, %v5590_v54 }
0x13a6   :  { %4156 = vmatprep.subr.msk.mxu0 %vm1385_vm5, %v6367_v36  ;;  %vm1417_vm9 = vmand %vm1289_vm13, %vm1353_vm14  ;;  %vm6455_vm5 = vcmp.ge.s32.totalorder %v1176_v42, 0  ;;  %v1207_v21 = vsub.s32 %v1142_v7, %v5590_v54  ;;  %v1190_v60 = vsub.s32 %v1125_v17, %v5590_v54  ;;  %v1222_v3 = vsub.s32 %v1157_v13, %v5590_v54 }
0x13a7   :  { %4191 = vmatprep.subr.msk.mxu1 %vm1417_vm9, %v6367_v36  ;;  %4157 = vmatpush3.msk.msra.mxu0 %vm1369_vm8, %v6367_v36  ;;  %vm1401_vm0 = vmand %vm1273_vm1, %vm1337_vm12  ;;  %v1174_v63 = vsub.s32 %v5100_v15, %v5590_v54  ;;  %vm1255_vm12 = vcmp.ge.s32.totalorder %v1191_v56, 0  ;;  %vm1351_vm9 = vcmp.lt.s32.totalorder %v1223_v62, 12  ;;  %v1141_v15 = vadd.s32 296, %v4867_v58 }
0x13a8   :  { %4192 = vmatpush3.msk.msra.mxu1 %vm1401_vm0, %v6367_v36  ;;  %vm1384_vm10 = vmand %vm1256_vm3, %vm1320_vm15  ;;  %vm1319_vm3 = vcmp.lt.s32.totalorder %v1191_v56, 12  ;;  %vm1287_vm15 = vcmp.ge.s32.totalorder %v1223_v62, 0  ;;  %vm1335_vm0 = vcmp.lt.s32.totalorder %v1207_v21, 12  ;;  %vm1286_vm14 = vcmp.ge.s32.totalorder %v1222_v3, 0 }
0x13a9   :  { %4158 = vmatprep.subr.msk.mxu0 %vm1384_vm10, %v6367_v36  ;;  %vm1416_vm13 = vmand %vm1288_vm6, %vm1352_vm2  ;;  %vm1254_vm10 = vcmp.ge.s32.totalorder %v1190_v60, 0  ;;  %vm1350_vm8 = vcmp.lt.s32.totalorder %v1222_v3, 12  ;;  %v1124_v39 = vadd.s32 160, %v4867_v58  ;;  %v1156_v42 = vadd.s32 416, %v4867_v58 }
0x13aa   :  { %4193 = vmatprep.subr.msk.mxu1 %vm1416_vm13, %v6367_v36  ;;  %vm1368_vm1 = vmand %vm6455_vm5, %vm1304_vm11  ;;  %vm1271_vm11 = vcmp.ge.s32.totalorder %v1207_v21, 0  ;;  %vm1318_vm5 = vcmp.lt.s32.totalorder %v1190_v60, 12  ;;  %v1173_v59 = vsub.s32 %v5122_v34, %v5590_v54  ;;  %v1140_v8 = vadd.s32 288, %v4867_v58 }
0x13ab   :  { %4159 = vmatpush3.msk.msra.mxu0 %vm1368_vm1, %v6367_v36  ;;  %vm1400_vm2 = vmand %vm1272_vm4, %vm1336_vm7  ;;  %vm1238_vm1 = vcmp.ge.s32.totalorder %v1174_v63, 0  ;;  %vm6456_vm4 = vcmp.lt.s32.totalorder %v1175_v4, 12  ;;  %vm6457_vm7 = vcmp.ge.s32.totalorder %v1175_v4, 0  ;;  %v1123_v61 = vadd.s32 152, %v4867_v58 }
0x13ac   :  { %4194 = vmatpush3.msk.msra.mxu1 %vm1400_vm2, %v6367_v36  ;;  %vm1383_vm6 = vmand %vm1255_vm12, %vm1319_vm3  ;;  %vm1302_vm3 = vcmp.lt.s32.totalorder %v1174_v63, 12  ;;  %v1155_v53 = vadd.s32 408, %v4867_v58  ;;  %v1206_v9 = vsub.s32 %v1141_v15, %v5590_v54  ;;  %v1189_v34 = vsub.s32 %v1124_v39, %v5590_v54 }
0x13ad   :  { %4160 = vmatprep.subr.msk.mxu0 %vm1383_vm6, %v6367_v36  ;;  %vm1415_vm13 = vmand %vm1287_vm15, %vm1351_vm9  ;;  %v1221_v2 = vsub.s32 %v1156_v42, %v5590_v54  ;;  %v1172_v33 = vsub.s32 %v5161_v51, %v5590_v54  ;;  %v1205_v22 = vsub.s32 %v1140_v8, %v5590_v54  ;;  %v1188_v10 = vsub.s32 %v1123_v61, %v5590_v54 }
0x13ae   :  { %4195 = vmatprep.subr.msk.mxu1 %vm1415_vm13, %v6367_v36  ;;  %vm1367_vm2 = vmand %vm6457_vm7, %vm6456_vm4  ;;  %v1220_v4 = vsub.s32 %v1155_v53, %v5590_v54  ;;  %vm1253_vm13 = vcmp.ge.s32.totalorder %v1189_v34, 0  ;;  %vm1301_vm7 = vcmp.lt.s32.totalorder %v1173_v59, 12  ;;  %v1139_v51 = vadd.s32 280, %v4867_v58 }
0x13af   :  { %4161 = vmatpush3.msk.msra.mxu0 %vm1367_vm2, %v6367_v36  ;;  %vm1399_vm12 = vmand %vm1271_vm11, %vm1335_vm0  ;;  %vm1270_vm0 = vcmp.ge.s32.totalorder %v1206_v9, 0  ;;  %vm1252_vm6 = vcmp.ge.s32.totalorder %v1188_v10, 0  ;;  %v1122_v7 = vadd.s32 144, %v4867_v58  ;;  %v1154_v17 = vadd.s32 400, %v4867_v58 }
0x13b0   :  { %4196 = vmatpush3.msk.msra.mxu1 %vm1399_vm12, %v6367_v36  ;;  %vm1382_vm15 = vmand %vm1254_vm10, %vm1318_vm5  ;;  %vm1334_vm10 = vcmp.lt.s32.totalorder %v1206_v9, 12  ;;  %vm1317_vm5 = vcmp.lt.s32.totalorder %v1189_v34, 12  ;;  %v1171_v13 = vsub.s32 %v5175_v38, %v5590_v54  ;;  %v1138_v56 = vadd.s32 272, %v4867_v58 }
0x13b1   :  { %4162 = vmatprep.subr.msk.mxu0 %vm1382_vm15, %v6367_v36  ;;  %vm1414_vm9 = vmand %vm1286_vm14, %vm1350_vm8  ;;  %vm1285_vm14 = vcmp.ge.s32.totalorder %v1221_v2, 0  ;;  %vm1349_vm8 = vcmp.lt.s32.totalorder %v1221_v2, 12  ;;  %vm1333_vm15 = vcmp.lt.s32.totalorder %v1205_v22, 12  ;;  %v1204_v62 = vsub.s32 %v1139_v51, %v5590_v54 }
0x13b2   :  { %4197 = vmatprep.subr.msk.mxu1 %vm1414_vm9, %v6367_v36  ;;  %vm1366_vm11 = vmand %vm1238_vm1, %vm1302_vm3  ;;  %vm1316_vm9 = vcmp.lt.s32.totalorder %v1188_v10, 12  ;;  %vm1284_vm1 = vcmp.ge.s32.totalorder %v1220_v4, 0  ;;  %v1187_v21 = vsub.s32 %v1122_v7, %v5590_v54  ;;  %v1121_v60 = vadd.s32 136, %v4867_v58  ;;  %v5850_v7 = vpop.f32.mrf.mxu0 }
0x13b3   :  { %4163 = vmatpush3.msk.msra.mxu0 %vm1366_vm11, %v6367_v36  ;;  %vm1398_vm4 = vmand %vm1270_vm0, %vm1334_vm10  ;;  %vm1348_vm11 = vcmp.lt.s32.totalorder %v1220_v4, 12  ;;  %vm1236_vm0 = vcmp.ge.s32.totalorder %v1172_v33, 0  ;;  %vm6458_vm10 = vcmp.ge.s32.totalorder %v1173_v59, 0  ;;  %v1153_v3 = vadd.s32 392, %v4867_v58 }
0x13b4   :  { %4198 = vmatpush3.msk.msra.mxu1 %vm1398_vm4, %v6367_v36  ;;  %vm1381_vm12 = vmand %vm1253_vm13, %vm1317_vm5  ;;  %vm1300_vm4 = vcmp.lt.s32.totalorder %v1172_v33, 12  ;;  %vm6459_vm13 = vcmp.ge.s32.totalorder %v1205_v22, 0  ;;  %v1219_v38 = vsub.s32 %v1154_v17, %v5590_v54  ;;  %v1203_v63 = vsub.s32 %v1138_v56, %v5590_v54 }
0x13b5   :  { %4164 = vmatprep.subr.msk.mxu0 %vm1381_vm12, %v6367_v36  ;;  %vm1413_vm3 = vmand %vm1285_vm14, %vm1349_vm8  ;;  %vm1251_vm12 = vcmp.ge.s32.totalorder %v1187_v21, 0  ;;  %v1170_v15 = vsub.s32 %v5189_v18, %v5590_v54  ;;  %v1186_v39 = vsub.s32 %v1121_v60, %v5590_v54  ;;  %v1218_v42 = vsub.s32 %v1153_v3, %v5590_v54 }
0x13b6   :  { %4199 = vmatprep.subr.msk.mxu1 %vm1413_vm3, %v6367_v36  ;;  %vm1365_vm2 = vmand %vm6458_vm10, %vm1301_vm7  ;;  %vm1268_vm7 = vcmp.ge.s32.totalorder %v1204_v62, 0  ;;  %vm1283_vm10 = vcmp.ge.s32.totalorder %v1219_v38, 0  ;;  %v1137_v59 = vadd.s32 264, %v4867_v58  ;;  %v1120_v8 = vadd.s32 128, %v4867_v58 }
0x13b7   :  { %4165 = vmatpush3.msk.msra.mxu0 %vm1365_vm2, %v6367_v36  ;;  %vm1397_vm5 = vmand %vm6459_vm13, %vm1333_vm15  ;;  %vm1332_vm2 = vcmp.lt.s32.totalorder %v1204_v62, 12  ;;  %vm1315_vm15 = vcmp.lt.s32.totalorder %v1187_v21, 12  ;;  %v1152_v18 = vadd.s32 384, %v4867_v58  ;;  %v1169_v34 = vsub.s32 %v4867_v58, %v5590_v54 }
0x13b8   :  { %4200 = vmatpush3.msk.msra.mxu1 %vm1397_vm5, %v6367_v36  ;;  %vm1380_vm14 = vmand %vm1252_vm6, %vm1316_vm9  ;;  %vm1347_vm6 = vcmp.lt.s32.totalorder %v1219_v38, 12  ;;  %vm1235_vm9 = vcmp.ge.s32.totalorder %v1171_v13, 0  ;;  %vm1299_vm5 = vcmp.lt.s32.totalorder %v1171_v13, 12  ;;  %v1202_v61 = vsub.s32 %v1137_v59, %v5590_v54 }
0x13b9   :  { %4166 = vmatprep.subr.msk.mxu0 %vm1380_vm14, %v6367_v36  ;;  %vm1412_vm8 = vmand %vm1284_vm1, %vm1348_vm11  ;;  %vm1267_vm1 = vcmp.ge.s32.totalorder %v1203_v63, 0  ;;  %vm1250_vm14 = vcmp.ge.s32.totalorder %v1186_v39, 0  ;;  %v1185_v53 = vsub.s32 %v1120_v8, %v5590_v54  ;;  %v1217_v9 = vsub.s32 %v1152_v18, %v5590_v54 }
0x13ba   :  { %4201 = vmatprep.subr.msk.mxu1 %vm1412_vm8, %v6367_v36  ;;  %vm1364_vm3 = vmand %vm1236_vm0, %vm1300_vm4  ;;  %vm1331_vm0 = vcmp.lt.s32.totalorder %v1203_v63, 12  ;;  %vm1314_vm8 = vcmp.lt.s32.totalorder %v1186_v39, 12  ;;  %v1136_v2 = vadd.s32 256, %v4867_v58 }
0x13bb   :  { %4167 = vmatpush3.msk.msra.mxu0 %vm1364_vm3, %v6367_v36  ;;  %vm1396_vm13 = vmand %vm1268_vm7, %vm1332_vm2  ;;  %vm1282_vm7 = vcmp.ge.s32.totalorder %v1218_v42, 0  ;;  %vm1234_vm3 = vcmp.ge.s32.totalorder %v1170_v15, 0 }
0x13bc   :  { %4202 = vmatpush3.msk.msra.mxu1 %vm1396_vm13, %v6367_v36  ;;  %vm1379_vm11 = vmand %vm1251_vm12, %vm1315_vm15  ;;  %vm1346_vm12 = vcmp.lt.s32.totalorder %v1218_v42, 12  ;;  %vm1330_vm13 = vcmp.lt.s32.totalorder %v1202_v61, 12  ;;  %v1201_v33 = vsub.s32 %v1136_v2, %v5590_v54 }
0x13bd   :  { %4168 = vmatprep.subr.msk.mxu0 %vm1379_vm11, %v6367_v36  ;;  %vm1411_vm4 = vmand %vm1283_vm10, %vm1347_vm6  ;;  %vm1298_vm10 = vcmp.lt.s32.totalorder %v1170_v15, 12  ;;  %vm1313_vm11 = vcmp.lt.s32.totalorder %v1185_v53, 12 }
0x13be   :  { %4203 = vmatprep.subr.msk.mxu1 %vm1411_vm4, %v6367_v36  ;;  %vm1363_vm2 = vmand %vm1235_vm9, %vm1299_vm5  ;;  %vm1266_vm9 = vcmp.ge.s32.totalorder %v1202_v61, 0  ;;  %vm1281_vm4 = vcmp.ge.s32.totalorder %v1217_v9, 0 }
0x13bf   :  { %4169 = vmatpush3.msk.msra.mxu0 %vm1363_vm2, %v6367_v36  ;;  %vm1395_vm15 = vmand %vm1267_vm1, %vm1331_vm0  ;;  %vm1249_vm1 = vcmp.ge.s32.totalorder %v1185_v53, 0  ;;  %vm1345_vm2 = vcmp.lt.s32.totalorder %v1217_v9, 12 }
0x13c0   :  { %4204 = vmatpush3.msk.msra.mxu1 %vm1395_vm15, %v6367_v36  ;;  %vm1378_vm6 = vmand %vm1250_vm14, %vm1314_vm8  ;;  %vm1233_vm14 = vcmp.ge.s32.totalorder %v1169_v34, 0  ;;  %vm1297_vm8 = vcmp.lt.s32.totalorder %v1169_v34, 12 }
0x13c1   :  { %4170 = vmatprep.subr.msk.mxu0 %vm1378_vm6, %v6367_v36  ;;  %vm1410_vm5 = vmand %vm1282_vm7, %vm1346_vm12  ;;  %vm1265_vm7 = vcmp.ge.s32.totalorder %v1201_v33, 0  ;;  %vm1329_vm12 = vcmp.lt.s32.totalorder %v1201_v33, 12 }
0x13c2   :  { %4205 = vmatprep.subr.msk.mxu1 %vm1410_vm5, %v6367_v36  ;;  %vm1362_vm0 = vmand %vm1234_vm3, %vm1298_vm10 }
0x13c3   :  { %4171 = vmatpush3.msk.msra.mxu0 %vm1362_vm0, %v6367_v36  ;;  %vm1394_vm15 = vmand %vm1266_vm9, %vm1330_vm13  ;;  %vm6460_vm9 = vnez %v6276_v20  ;;  %vm6461_vm13 = vnez %v6308_v52  ;;  %v5856_v52 = vpop.f32.mrf.mxu0 }
0x13c4   :  { %4206 = vmatpush3.msk.msra.mxu1 %vm1394_vm15, %v6367_v36  ;;  %vm1377_vm6 = vmand %vm1249_vm1, %vm1313_vm11  ;;  %vm1632_vm1 = vcmask 1043456   ;;  %vm6462_vm15 = vnez %v6278_v23  ;;  %v6486_v23 = vld [vmem:[#allocation6_spill] sm:$0xff] }
0x13c5   :  { %4172 = vmatprep.subr.msk.mxu0 %vm1377_vm6, %v6367_v36  ;;  %vm1409_vm5 = vmand %vm1281_vm4, %vm1345_vm2  ;;  %v1633_v20 = vsel %vm1632_vm1, %v5850_v7, inf  ;;  %v1661_v13 = vsel %vm1632_vm1, %v5850_v7, -inf  ;;  %v1668_v21 = vsel %vm1632_vm1, %v5856_v52, -inf  ;;  %vm6465_vm6 = vnez %v6363_v35  ;;  %v6512_v35 = vld [vmem:[#allocation31_spill] sm:$0xff] }
0x13c6   :  { %4207 = vmatprep.subr.msk.mxu1 %vm1409_vm5, %v6367_v36  ;;  %vm1361_vm3 = vmand %vm1233_vm14, %vm1297_vm8  ;;  %v1634_v56 = vrot.slane %v1633_v20, 4  ;;  %v1662_v62 = vrot.slane %v1661_v13, 4  ;;  %v1669_v63 = vrot.slane %v1668_v21, 4  ;;  %vm6463_vm14 = vnez %v6361_v12  ;;  %v6510_v12 = vld [vmem:[#allocation12_spill] sm:$0xff] }
0x13c7   :  { %4173 = vmatpush3.msk.msra.mxu0 %vm1361_vm3, %v6367_v36  ;;  %vm1393_vm10 = vmand %vm1265_vm7, %vm1329_vm12  ;;  %vm6464_vm8 = vnez %v6280_v24  ;;  %vm6466_vm7 = vnez %v6282_v30  ;;  %vm6467_vm12 = vnez %v6366_v6  ;;  %vm6468_vm5 = vnez %v6284_v28  ;;  %v6488_v24 = vld [vmem:[#allocation25_spill] sm:$0xff]  ;;  %v6490_v30 = vld [vmem:[#allocation7_spill] sm:$0xff] }
0x13c8   :  { %4208 = vmatpush3.msk.msra.mxu1 %vm1393_vm10, %v6367_v36  ;;  %3868 = vmatprep.subr.msk.mxu0 %vm6460_vm9, %v6367_v36  ;;  %v1635_v60 = vmin.f32 %v1633_v20, %v1634_v56  ;;  %v1663_v3 = vmax.f32 %v1661_v13, %v1662_v62  ;;  %v1670_v8 = vmax.f32 %v1668_v21, %v1669_v63  ;;  %v6492_v28 = vld [vmem:[#allocation26_spill] sm:$0xff]  ;;  %v6514_v6 = vld [vmem:[#allocation13_spill] sm:$0xff] }
0x13c9   :  { %3900 = vmatprep.subr.msk.mxu1 %vm6461_vm13, %v6367_v36  ;;  %vm6469_vm3 = vnez %v6369_v11  ;;  %vm6470_vm10 = vnez %v6286_v32  ;;  %vm6471_vm9 = vnez %v6373_v19  ;;  %vm6472_vm13 = vnez %v6288_v37  ;;  %v6494_v32 = vld [vmem:[#allocation8_spill] sm:$0xff]  ;;  %v6508_v19 = vld [vmem:[#allocation30_spill] sm:$0xff] }
0x13ca   :  { %v1636_v39 = vrot.slane %v1635_v60, 2  ;;  %v1664_v42 = vrot.slane %v1663_v3, 2  ;;  %v1671_v9 = vrot.slane %v1670_v8, 2  ;;  %v6517_v11 = vld [vmem:[#allocation14_spill] sm:$0xff] }
0x13cc   :  { %v1637_v18 = vmin.f32 %v1635_v60, %v1636_v39  ;;  %v1665_v61 = vmax.f32 %v1663_v3, %v1664_v42 }
0x13ce   :  { %v709_v54 = vpop.f32.mrf.mxu1  ;;  %v1638_v34 = vrot.slane %v1637_v18, 1  ;;  %v1666_v2 = vrot.slane %v1665_v61, 1 }
0x13cf   :  { %v716_v22 = vrot.slane %v709_v54, 4  ;;  %v1672_v54 = vmax.f32 %v1670_v8, %v1671_v9 }
0x13d0   :  { %v4288_v10 = vpop.f32.mrf.mxu1 }
0x13d1   :  { %v5847_v4 = vadd.f32 %v716_v22, %v4852_v40  ;;  %v1640_v40 = vsel %vm1632_vm1, %v5856_v52, inf  ;;  %v5863_v22 = vmin.f32 %v1637_v18, %v1638_v34  ;;  %v1667_v10 = vmax.f32 %v1665_v61, %v1666_v2 }
0x13d2   :  { %v712_v51 = vpop.f32.mrf.mxu1  ;;  %v1641_v38 = vrot.slane %v1640_v40, 4 }
0x13d3   :  { %4649 = vtanh.f32 %v5847_v4  ;;  %v1689_v62 = vsub.f32 %v1667_v10, %v5863_v22 }
0x13d4   :  { %v4289_v17 = vpop.f32.mrf.mxu1  ;;  %v1642_v59 = vmin.f32 %v1640_v40, %v1641_v38 }
0x13d5   :  { %v1673_v17 = vrot.slane %v1672_v54, 1  ;;  %v1693_v34 = vmul.f32 0.1, %v1689_v62 }
0x13d6   :  { %v1643_v53 = vrot.slane %v1642_v59, 2 }
0x13d7   :  { %v1674_v38 = vmax.f32 %v1672_v54, %v1673_v17  ;;  %vm1697_vm11 = vcmp.eq.f32.partialorder %v1693_v34, 0.0  ;;  %v1701_v17 = vmul.f32 0.2, %v1693_v34 }
0x13d8   :  { %v1644_v33 = vmin.f32 %v1642_v59, %v1643_v53 }
0x13d9   :  { %v1705_v62 = vsel %vm1697_vm11, 1.0, %v1701_v17  ;;  %vm6474_vm11 = vnez %v6290_v43  ;;  %v6496_v43 = vld [vmem:[#allocation27_spill] sm:$0xff] }
0x13da   :  { %v1645_v51 = vrot.slane %v1644_v33, 1  ;;  %v1794_v57 = vmul.f32 2.0, %v1705_v62 }
0x13dc   :  { %v5874_v3 = vmin.f32 %v1644_v33, %v1645_v51 }
0x13de   :  { %v1690_v2 = vsub.f32 %v1674_v38, %v5874_v3 }
0x13e0   :  { %v4650_v15 = vpop.eup %4649 }
0x13e1   :  { %731 = vrot.lane.b32.xlu0 %v4650_v15, %s4708_s2 }
0x13ee   :  { %v5865_v20 = vpop.f32.mrf.mxu1 }
0x13ef   :  { %v1647_v13 = vsel %vm1632_vm1, %v5865_v20, inf  ;;  %v1675_v56 = vsel %vm1632_vm1, %v5865_v20, -inf }
0x13f0   :  { %v1648_v40 = vrot.slane %v1647_v13, 4  ;;  %v1676_v21 = vrot.slane %v1675_v56, 4  ;;  %v5872_v60 = vpop.f32.mrf.mxu1 }
0x13f1   :  { %v1654_v63 = vsel %vm1632_vm1, %v5872_v60, inf  ;;  %v1682_v15 = vsel %vm1632_vm1, %v5872_v60, -inf  ;;  %vm6473_vm1 = vnez %v6375_v41  ;;  %v6519_v41 = vld [vmem:[#allocation32_spill] sm:$0xff] }
0x13f2   :  { %v1649_v39 = vmin.f32 %v1647_v13, %v1648_v40  ;;  %v1677_v42 = vmax.f32 %v1675_v56, %v1676_v21  ;;  %v1655_v59 = vrot.slane %v1654_v63, 4  ;;  %v1683_v8 = vrot.slane %v1682_v15, 4 }
0x13f3   :  { %v1694_v56 = vmul.f32 0.1, %v1690_v2  ;;  %v4713_v40 = vmov 1966171168  }
0x13f4   :  { %v1650_v18 = vrot.slane %v1649_v39, 2  ;;  %v1678_v61 = vrot.slane %v1677_v42, 2  ;;  %v1656_v53 = vmin.f32 %v1654_v63, %v1655_v59  ;;  %v1684_v9 = vmax.f32 %v1682_v15, %v1683_v8 }
0x13f5   :  { %v1726_v21 = vunpack.c.l.s4 %v4713_v40  ;;  %v1702_v59 = vmul.f32 0.2, %v1694_v56  ;;  %vm1698_vm0 = vcmp.eq.f32.partialorder %v1694_v56, 0.0  ;;  %v1723_v2 = vcombine.low %v1693_v34, %v1694_v56 }
0x13f6   :  { %v1651_v33 = vmin.f32 %v1649_v39, %v1650_v18  ;;  %v1679_v10 = vmax.f32 %v1677_v42, %v1678_v61  ;;  %v1657_v54 = vrot.slane %v1656_v53, 2  ;;  %v1685_v51 = vrot.slane %v1684_v9, 2 }
0x13f7   :  { %v1727_v8 = vunpack.c.0.s8 %v1726_v21  ;;  %v1706_v50 = vsel %vm1698_vm0, 1.0, %v1702_v59  ;;  %v1709_v21 = vmul.f32 0.5, %v1693_v34  ;;  %v5890_v34 = vsub.s32 1, %v4867_v58 }
0x13f8   :  { %v1652_v1 = vrot.slane %v1651_v33, 1  ;;  %v1680_v26 = vrot.slane %v1679_v10, 1  ;;  %v1658_v25 = vmin.f32 %v1656_v53, %v1657_v54  ;;  %v1686_v13 = vmax.f32 %v1684_v9, %v1685_v51 }
0x13f9   :  { %v1798_v54 = vmul.f32 %v1794_v57, %v1705_v62  ;;  %v5886_v57 = vsub.s32 0, %v4867_v58  ;;  %v1764_v62 = vsub.s32 3, %v4867_v58  ;;  %vm6475_vm0 = vnez %v6377_v49 }
0x13fa   :  { %v1653_v0 = vmin.f32 %v1651_v33, %v1652_v1  ;;  %v1681_v5 = vmax.f32 %v1679_v10, %v1680_v26  ;;  %v1659_v63 = vrot.slane %v1658_v25, 1  ;;  %v1687_v15 = vrot.slane %v1686_v13, 1 }
0x13fb   :  { %v1730_v1 = vsub.s32 %v1727_v8, %v4867_v58  ;;  %v1795_v26 = vmul.f32 2.0, %v1706_v50  ;;  %4651 = vrcp.f32 %v1798_v54 }
0x13fc   :  { %v1691_v38 = vsub.f32 %v1681_v5, %v1653_v0  ;;  %v1660_v39 = vmin.f32 %v1658_v25, %v1659_v63  ;;  %v1688_v42 = vmax.f32 %v1686_v13, %v1687_v15  ;;  %v1710_v63 = vmul.f32 0.5, %v1694_v56 }
0x13fd   :  { %v1731_v17 = vrot.slane %v1723_v2, %v1730_v1  ;;  %v1799_v15 = vmul.f32 %v1795_v26, %v1706_v50  ;;  %v1760_v50 = vsub.s32 2, %v4867_v58  ;;  %v1713_v26 = vsub.f32 %v5863_v22, %v1709_v21 }
0x13fe   :  { %v1695_v18 = vmul.f32 0.1, %v1691_v38  ;;  %v1692_v61 = vsub.f32 %v1688_v42, %v1660_v39  ;;  %v3802_v38 = vld [vmem:[%s6163_s3 + $0x5] ss:$8 sm:$0xf] }
0x1400   :  { %vm1699_vm4 = vcmp.eq.f32.partialorder %v1695_v18, 0.0  ;;  %v1703_v53 = vmul.f32 0.2, %v1695_v18  ;;  %v1696_v9 = vmul.f32 0.1, %v1692_v61  ;;  %v1711_v61 = vmul.f32 0.5, %v1695_v18 }
0x1402   :  { %v1707_v33 = vsel %vm1699_vm4, 1.0, %v1703_v53  ;;  %vm1700_vm2 = vcmp.eq.f32.partialorder %v1696_v9, 0.0  ;;  %v1704_v10 = vmul.f32 0.2, %v1696_v9  ;;  %v1724_v5 = vcombine.low %v1695_v18, %v1696_v9 }
0x1403   :  { %v1796_v51 = vmul.f32 2.0, %v1707_v33  ;;  %v1712_v53 = vmul.f32 0.5, %v1696_v9  ;;  %v1714_v18 = vsub.f32 %v5874_v3, %v1710_v63  ;;  %v1715_v9 = vsub.f32 %v1653_v0, %v1711_v61 }
0x1404   :  { %v1708_v25 = vsel %vm1700_vm2, 1.0, %v1704_v10  ;;  %v1738_v13 = vrot.slane %v1724_v5, %v1730_v1  ;;  %vm6476_vm4 = vnez %v6292_v44  ;;  %vm6477_vm2 = vnez %v6380_v29  ;;  %v6498_v44 = vld [vmem:[#allocation9_spill] sm:$0xff]  ;;  %v6521_v29 = vld [vmem:[#allocation15_spill] sm:$0xff] }
0x1405   :  { %v1797_v40 = vmul.f32 2.0, %v1708_v25  ;;  %v1800_v59 = vmul.f32 %v1796_v51, %v1707_v33  ;;  %v1716_v33 = vsub.f32 %v1660_v39, %v1712_v53 }
0x1406   :  { %v1739_v42 = vcombine.low %v1731_v17, %v1738_v13 }
0x1407   :  { %v1801_v8 = vmul.f32 %v1797_v40, %v1708_v25 }
0x1408   :  { %v1746_v2 = vrot.slane %v1739_v42, %v1730_v1 }
0x1409   :  { %4653 = vrcp.f32 %v1801_v8 }
0x140a   :  { %4655 = vrcp.f32 %v1799_v15  ;;  %v1748_v56 = vmul.f32 %v3802_v38, %v1746_v2  ;;  %v4652_v15 = vpop.eup %4651 }
0x140b   :  { %4657 = vrcp.f32 %v1800_v59 }
0x140c   :  { %v1753_v10 = vrot.slane %v1748_v56, %v5886_v57  ;;  %v1765_v54 = vrot.slane %v1748_v56, %v1764_v62  ;;  %v1757_v1 = vrot.slane %v1748_v56, %v5890_v34  ;;  %v1761_v51 = vrot.slane %v1748_v56, %v1760_v50 }
0x140e   :  { %v1770_v5 = vadd.f32 %v1753_v10, %v1713_v26  ;;  %v1773_v25 = vadd.f32 %v1765_v54, %v1716_v33  ;;  %v1771_v17 = vadd.f32 %v1757_v1, %v1714_v18  ;;  %v1772_v13 = vadd.f32 %v1761_v51, %v1715_v9  ;;  %v3803_v51 = vld [vmem:[%s6163_s3 + $0x6] ss:$8 sm:$0xf] }
0x1410   :  { %v1789_v58 = vrot.slane %v1773_v25, %v5886_v57  ;;  %v1781_v40 = vrot.slane %v1771_v17, %v5886_v57  ;;  %v1777_v22 = vrot.slane %v1770_v5, %v5886_v57  ;;  %v1785_v3 = vrot.slane %v1772_v13, %v5886_v57 }
0x1411   :  { %v1844_v5 = vrot.slane %v3803_v51, %v1764_v62  ;;  %v1836_v25 = vrot.slane %v3803_v51, %v5890_v34  ;;  %v1832_v17 = vrot.slane %v3803_v51, %v5886_v57 }
0x1412   :  { %v1793_v0 = vsub.f32 %v5872_v60, %v1789_v58  ;;  %v1791_v39 = vsub.f32 %v5856_v52, %v1781_v40  ;;  %v1790_v21 = vsub.f32 %v5850_v7, %v1777_v22  ;;  %v1792_v63 = vsub.f32 %v5865_v20, %v1785_v3 }
0x1413   :  { %v1840_v58 = vrot.slane %v3803_v51, %v1760_v50  ;;  %v6535_v50 = vld [vmem:[#allocation36_spill] sm:$0xff] }
0x1414   :  { %v1809_v59 = vmul.f32 %v1793_v0, %v1793_v0  ;;  %v1807_v38 = vmul.f32 %v1791_v39, %v1791_v39  ;;  %v1806_v42 = vmul.f32 %v1790_v21, %v1790_v21  ;;  %v1808_v8 = vmul.f32 %v1792_v63, %v1792_v63 }
0x1415   :  { %v3736_v63 = vmul.f32 -1.442695, %v5847_v4  ;;  %v6533_v4 = vld [vmem:[#allocation18_spill] sm:$0xff] }
0x1416   :  { %v4654_v61 = vpop.eup %4653  ;;  %v1813_v2 = vsub.f32 0.0, %v1809_v59  ;;  %v1811_v56 = vsub.f32 0.0, %v1807_v38  ;;  %v1810_v26 = vsub.f32 0.0, %v1806_v42  ;;  %v1812_v18 = vsub.f32 0.0, %v1808_v8  ;;  %v6539_v59 = vld [vmem:[#allocation37_spill] sm:$0xff]  ;;  %v6541_v38 = vld [vmem:[#allocation20_spill] sm:$0xff] }
0x1417   :  { %v4656_v53 = vpop.eup %4655  ;;  %v6543_v42 = vld [vmem:[#allocation38_spill] sm:$0xff]  ;;  %v6545_v8 = vld [vmem:[#allocation21_spill] sm:$0xff] }
0x1418   :  { %v4658_v9 = vpop.eup %4657  ;;  %v1817_v33 = vmul.f32 %v4654_v61, %v1813_v2  ;;  %v1815_v60 = vmul.f32 %v4656_v53, %v1811_v56  ;;  %v1814_v10 = vmul.f32 %v4652_v15, %v1810_v26  ;;  %v6537_v15 = vld [vmem:[#allocation19_spill] sm:$0xff]  ;;  %v6549_v53 = vld [vmem:[#allocation22_spill] sm:$0xff]  ;;  %v6551_v2 = vld [vmem:[#allocation40_spill] sm:$0xff] }
0x1419   :  { %v1816_v52 = vmul.f32 %v4658_v9, %v1812_v18  ;;  %v6547_v61 = vld [vmem:[#allocation39_spill] sm:$0xff]  ;;  %v6555_v26 = vld [vmem:[#allocation41_spill] sm:$0xff]  ;;  %v6557_v18 = vld [vmem:[#allocation24_spill] sm:$0xff]  ;;  %v6559_v9 = vmov 0.0  }
0x141a   :  { %v1824_v54 = vmul.f32 1.442695, %v1817_v33  ;;  %v1820_v7 = vmul.f32 1.442695, %v1815_v60  ;;  %v1818_v1 = vmul.f32 1.442695, %v1814_v10 }
0x141b   :  { %v1822_v20 = vmul.f32 1.442695, %v1816_v52  ;;  %v6553_v56 = vld [vmem:[#allocation23_spill] sm:$0xff]  ;;  %v6560_v33 = vld [vmem:[#allocation42_spill] sm:$0xff] }
0x141c   :  { %4659 = vpow2.f32 %v1824_v54  ;;  %v6562_v54 = vld [vmem:[#allocation5_spill] sm:$0xff] }
0x141d   :  { %4661 = vpow2.f32 %v1820_v7  ;;  %v727_v7 = vrot.slane %v6562_v54, 4  ;;  %v4380_v54 = vld [vmem:[#allocation2 + $0x230] ss:$8 sps:$4 sm:$0xff]  }
0x141e   :  { %4663 = vpow2.f32 %v1818_v1 }
0x141f   :  { %4665 = vpow2.f32 %v1822_v20 }
0x1420   :  { %4667 = vpow2.f32 %v3736_v63 }
0x1429   :  { %v4660_v13 = vpop.eup %4659 }
0x142a   :  { %v4662_v40 = vpop.eup %4661  ;;  %v5910_v22 = vmul.f32 %v4660_v13, %v1844_v5  ;;  %v4319_v5 = vld [vmem:[#allocation2 + $0xd4] ss:$8 sps:$4 sm:$0xff]  }
0x142b   :  { %v4664_v3 = vpop.eup %4663  ;;  %v5912_v0 = vmul.f32 %v4662_v40, %v1836_v25  ;;  %v4322_v25 = vld [vmem:[#allocation2 + $0x1d4] ss:$8 sps:$4 sm:$0xff]  }
0x142c   :  { %v4666_v39 = vpop.eup %4665  ;;  %1987 = vmatprep.mubr.f32.mxu1 %v5910_v22  ;;  %v5915_v21 = vmul.f32 %v4664_v3, %v1832_v17 }
0x142d   :  { %1917 = vmatprep.mubr.f32.mxu0 %v5912_v0  ;;  %v5919_v62 = vmul.f32 %v4666_v39, %v1840_v58  ;;  %v4668_v37 = vpop.eup %4667 }
0x142e   :  { %1918 = vmatmul.mubr.f32.vlgmr.msra.gmra.mxu0 %v5915_v21  ;;  %v722_v49 = vadd.f32 1.0, %v4668_v37  ;;  %v4323_v37 = vld [vmem:[#allocation2 + $0xc0] ss:$8 sps:$4 sm:$0xff]  }
0x142f   :  { %1988 = vmatmul.mubr.f32.vlgmr.msra.gmra.mxu1 %v5919_v62  ;;  %3869 = vmatpush1.msk.msra.mxu0 %vm6462_vm15, %v6367_v36  ;;  %vm6478_vm15 = vnez %v6294_v45  ;;  %v6500_v45 = vld [vmem:[#allocation28_spill] sm:$0xff] }
0x1430   :  { %3901 = vmatpush1.msk.msra.mxu1 %vm6463_vm14, %v6367_v36  ;;  %3870 = vmatprep.subr.msk.mxu0 %vm6464_vm8, %v6367_v36  ;;  %vm6479_vm14 = vnez %v6384_v27  ;;  %vm6480_vm8 = vnez %v6296_v46  ;;  %v6502_v46 = vld [vmem:[#allocation10_spill] sm:$0xff]  ;;  %4669 = vrcp.f32 %v722_v49  ;;  %v6523_v27 = vld [vmem:[#allocation33_spill] sm:$0xff] }
0x1431   :  { %3902 = vmatprep.subr.msk.mxu1 %vm6465_vm6, %v6367_v36  ;;  %3871 = vmatpush1.msk.msra.mxu0 %vm6466_vm7, %v6367_v36  ;;  %vm6481_vm6 = vnez %v6387_v31  ;;  %vm6482_vm7 = vnez %v6298_v47  ;;  %v6504_v47 = vld [vmem:[#allocation29_spill] sm:$0xff]  ;;  %v6525_v31 = vld [vmem:[#allocation16_spill] sm:$0xff] }
0x1432   :  { %3903 = vmatpush1.msk.msra.mxu1 %vm6467_vm12, %v6367_v36  ;;  %3872 = vmatprep.subr.msk.mxu0 %vm6468_vm5, %v6367_v36  ;;  %vm6483_vm12 = vnez %v6390_v16  ;;  %vm6484_vm5 = vnez %v6300_v48  ;;  %v6506_v48 = vld [vmem:[#allocation11_spill] sm:$0xff]  ;;  %v6527_v16 = vld [vmem:[#allocation34_spill] sm:$0xff] }
0x1433   :  { %3904 = vmatprep.subr.msk.mxu1 %vm6469_vm3, %v6367_v36  ;;  %3873 = vmatpush1.msk.msra.mxu0 %vm6470_vm10, %v6367_v36  ;;  %vm6485_vm3 = vnez %v6392_v55  ;;  %vm6487_vm10 = vnez %v6486_v23  ;;  %v6529_v55 = vld [vmem:[#allocation17_spill] sm:$0xff]  ;;  %v4317_v23 = vld [vmem:[#allocation2 + $0xd0] ss:$8 sps:$4 sm:$0xff]  }
0x1434   :  { %3905 = vmatpush1.msk.msra.mxu1 %vm6471_vm9, %v6367_v36  ;;  %3874 = vmatprep.subr.msk.mxu0 %vm6472_vm13, %v6367_v36  ;;  %vm6489_vm9 = vnez %v6488_v24  ;;  %vm6491_vm13 = vnez %v6490_v30  ;;  %v4320_v24 = vld [vmem:[#allocation2 + $0x1d0] ss:$8 sps:$4 sm:$0xff]   ;;  %v4325_v30 = vld [vmem:[#allocation2 + $0xc4] ss:$8 sps:$4 sm:$0xff]  }
0x1435   :  { %3906 = vmatprep.subr.msk.mxu1 %vm6473_vm1, %v6367_v36  ;;  %3875 = vmatpush1.msk.msra.mxu0 %vm6474_vm11, %v6367_v36  ;;  %vm6493_vm1 = vnez %v6492_v28  ;;  %vm6495_vm11 = vnez %v6494_v32  ;;  %v4328_v28 = vld [vmem:[#allocation2 + $0x1c4] ss:$8 sps:$4 sm:$0xff]  }
0x1436   :  { %3907 = vmatpush1.msk.msra.mxu1 %vm6475_vm0, %v6367_v36  ;;  %3876 = vmatprep.subr.msk.mxu0 %vm6476_vm4, %v6367_v36  ;;  %vm6497_vm0 = vnez %v6496_v43  ;;  %vm6499_vm4 = vnez %v6498_v44  ;;  %v4326_v43 = vld [vmem:[#allocation2 + $0x1c0] ss:$8 sps:$4 sm:$0xff]   ;;  %v4331_v44 = vld [vmem:[#allocation2 + $0xb4] ss:$8 sps:$4 sm:$0xff]   ;;  %v4340_v49 = vld [vmem:[#allocation2 + $0x1a4] ss:$8 sps:$4 sm:$0xff]  }
0x1437   :  { %3908 = vmatprep.subr.msk.mxu1 %vm6477_vm2, %v6367_v36  ;;  %3877 = vmatpush1.msk.msra.mxu0 %vm6478_vm15, %v6367_v36  ;;  %vm6501_vm2 = vnez %v6500_v45  ;;  %vm6503_vm15 = vnez %v6502_v46  ;;  %v4334_v45 = vld [vmem:[#allocation2 + $0x1b4] ss:$8 sps:$4 sm:$0xff]   ;;  %v4329_v46 = vld [vmem:[#allocation2 + $0xb0] ss:$8 sps:$4 sm:$0xff]  }
0x1438   :  { %3909 = vmatpush1.msk.msra.mxu1 %vm6479_vm14, %v6367_v36  ;;  %3878 = vmatprep.subr.msk.mxu0 %vm6480_vm8, %v6367_v36  ;;  %vm6505_vm14 = vnez %v6504_v47  ;;  %vm6507_vm8 = vnez %v6506_v48  ;;  %v4332_v47 = vld [vmem:[#allocation2 + $0x1b0] ss:$8 sps:$4 sm:$0xff]   ;;  %v4337_v48 = vld [vmem:[#allocation2 + $0xa4] ss:$8 sps:$4 sm:$0xff]  }
0x1439   :  { %3910 = vmatprep.subr.msk.mxu1 %vm6481_vm6, %v6367_v36  ;;  %3879 = vmatpush1.msk.msra.mxu0 %vm6482_vm7, %v6367_v36  ;;  %vm6509_vm6 = vnez %v6508_v19  ;;  %vm6511_vm7 = vnez %v6510_v12  ;;  %v4335_v19 = vld [vmem:[#allocation2 + $0xa0] ss:$8 sps:$4 sm:$0xff]  }
0x143a   :  { %3911 = vmatpush1.msk.msra.mxu1 %vm6483_vm12, %v6367_v36  ;;  %3880 = vmatprep.subr.msk.mxu0 %vm6484_vm5, %v6367_v36  ;;  %vm6513_vm12 = vnez %v6512_v35  ;;  %vm6515_vm5 = vnez %v6514_v6  ;;  %v4338_v12 = vld [vmem:[#allocation2 + $0x1a0] ss:$8 sps:$4 sm:$0xff]   ;;  %v4343_v35 = vld [vmem:[#allocation2 + $0x94] ss:$8 sps:$4 sm:$0xff]  }
0x143b   :  { %3912 = vmatprep.subr.msk.mxu1 %vm6485_vm3, %v6367_v36  ;;  %3881 = vmatpush1.msk.msra.mxu0 %vm6487_vm10, %v6367_v36  ;;  %vm6516_vm3 = vnez %v6415_v14  ;;  %vm6518_vm10 = vnez %v6517_v11  ;;  %v6531_v14 = vld [vmem:[#allocation35_spill] sm:$0xff] }
0x143c   :  { %3913 = vmatpush1.msk.msra.mxu1 %vm6489_vm9, %v6367_v36  ;;  %3882 = vmatprep.subr.msk.mxu0 %vm6491_vm13, %v6367_v36  ;;  %vm6520_vm9 = vnez %v6519_v41  ;;  %vm6522_vm13 = vnez %v6521_v29  ;;  %v4346_v6 = vld [vmem:[#allocation2 + $0x194] ss:$8 sps:$4 sm:$0xff]   ;;  %v4341_v11 = vld [vmem:[#allocation2 + $0x90] ss:$8 sps:$4 sm:$0xff]   ;;  %v4349_v29 = vld [vmem:[#allocation2 + $0x84] ss:$8 sps:$4 sm:$0xff]  }
0x143d   :  { %3914 = vmatprep.subr.msk.mxu1 %vm6493_vm1, %v6367_v36  ;;  %3883 = vmatpush1.msk.msra.mxu0 %vm6495_vm11, %v6367_v36  ;;  %vm6524_vm1 = vnez %v6523_v27  ;;  %vm6526_vm11 = vnez %v6525_v31  ;;  %v6111_v60 = vpop.eup %4669  ;;  %v4344_v41 = vld [vmem:[#allocation2 + $0x190] ss:$8 sps:$4 sm:$0xff]   ;;  %v4352_v27 = vld [vmem:[#allocation2 + $0x184] ss:$8 sps:$4 sm:$0xff]   ;;  %v4347_v31 = vld [vmem:[#allocation2 + $0x80] ss:$8 sps:$4 sm:$0xff]  }
0x143e   :  { %3915 = vmatpush1.msk.msra.mxu1 %vm6497_vm0, %v6367_v36  ;;  %3884 = vmatprep.subr.msk.mxu0 %vm6499_vm4, %v6367_v36  ;;  %vm6528_vm0 = vnez %v6527_v16  ;;  %vm6530_vm4 = vnez %v6529_v55  ;;  %v729_v1 = vmul.f32 %v6111_v60, %v727_v7  ;;  %v4350_v16 = vld [vmem:[#allocation2 + $0x180] ss:$8 sps:$4 sm:$0xff]   ;;  %v4355_v55 = vld [vmem:[#allocation2 + $0x74] ss:$8 sps:$4 sm:$0xff]   ;;  %v4385_v7 = vld [vmem:[#allocation2 + $0x124] ss:$8 sps:$4 sm:$0xff]  }
0x143f   :  { %3916 = vmatprep.subr.msk.mxu1 %vm6501_vm2, %v6367_v36  ;;  %3885 = vmatpush1.msk.msra.mxu0 %vm6503_vm15, %v6367_v36  ;;  %vm6532_vm2 = vnez %v6531_v14  ;;  %vm6534_vm15 = vnez %v6533_v4  ;;  %v4358_v14 = vld [vmem:[#allocation2 + $0x174] ss:$8 sps:$4 sm:$0xff]   ;;  %v4353_v4 = vld [vmem:[#allocation2 + $0x70] ss:$8 sps:$4 sm:$0xff]  }
0x1440   :  { %3917 = vmatpush1.msk.msra.mxu1 %vm6505_vm14, %v6367_v36  ;;  %3886 = vmatprep.subr.msk.mxu0 %vm6507_vm8, %v6367_v36  ;;  %vm6536_vm14 = vnez %v6535_v50  ;;  %vm6538_vm8 = vnez %v6537_v15  ;;  %v4356_v50 = vld [vmem:[#allocation2 + $0x170] ss:$8 sps:$4 sm:$0xff]   ;;  %v4361_v15 = vld [vmem:[#allocation2 + $0x64] ss:$8 sps:$4 sm:$0xff]  }
0x1441   :  { %3918 = vmatprep.subr.msk.mxu1 %vm6509_vm6, %v6367_v36  ;;  %3887 = vmatpush1.msk.msra.mxu0 %vm6511_vm7, %v6367_v36  ;;  %vm6540_vm6 = vnez %v6539_v59  ;;  %vm6542_vm7 = vnez %v6541_v38  ;;  %v4364_v59 = vld [vmem:[#allocation2 + $0x164] ss:$8 sps:$4 sm:$0xff]   ;;  %v4359_v38 = vld [vmem:[#allocation2 + $0x60] ss:$8 sps:$4 sm:$0xff]  }
0x1442   :  { %3919 = vmatpush1.msk.msra.mxu1 %vm6513_vm12, %v6367_v36  ;;  %3888 = vmatprep.subr.msk.mxu0 %vm6515_vm5, %v6367_v36  ;;  %vm6544_vm12 = vnez %v6543_v42  ;;  %vm6546_vm5 = vnez %v6545_v8  ;;  %v4362_v42 = vld [vmem:[#allocation2 + $0x160] ss:$8 sps:$4 sm:$0xff]   ;;  %v4367_v8 = vld [vmem:[#allocation2 + $0x154] ss:$8 sps:$4 sm:$0xff]  }
0x1443   :  { %3920 = vmatprep.subr.msk.mxu1 %vm6516_vm3, %v6367_v36  ;;  %3889 = vmatpush1.msk.msra.mxu0 %vm6518_vm10, %v6367_v36  ;;  %vm6548_vm3 = vnez %v6547_v61  ;;  %vm6550_vm10 = vnez %v6549_v53  ;;  %v4370_v61 = vld [vmem:[#allocation2 + $0x254] ss:$8 sps:$4 sm:$0xff]   ;;  %v4365_v53 = vld [vmem:[#allocation2 + $0x150] ss:$8 sps:$4 sm:$0xff]  }
0x1444   :  { %3921 = vmatpush1.msk.msra.mxu1 %vm6520_vm9, %v6367_v36  ;;  %3890 = vmatprep.subr.msk.mxu0 %vm6522_vm13, %v6367_v36  ;;  %vm6552_vm9 = vnez %v6551_v2  ;;  %vm6554_vm13 = vnez %v6553_v56  ;;  %v4368_v2 = vld [vmem:[#allocation2 + $0x250] ss:$8 sps:$4 sm:$0xff]   ;;  %v4373_v56 = vld [vmem:[#allocation2 + $0x144] ss:$8 sps:$4 sm:$0xff]  }
0x1445   :  { %3922 = vmatprep.subr.msk.mxu1 %vm6524_vm1, %v6367_v36  ;;  %3891 = vmatpush1.msk.msra.mxu0 %vm6526_vm11, %v6367_v36  ;;  %vm6556_vm1 = vnez %v6555_v26  ;;  %vm6558_vm11 = vnez %v6557_v18  ;;  %v4376_v26 = vld [vmem:[#allocation2 + $0x244] ss:$8 sps:$4 sm:$0xff]   ;;  %v4371_v18 = vld [vmem:[#allocation2 + $0x140] ss:$8 sps:$4 sm:$0xff]  }
0x1446   :  { %3923 = vmatpush1.msk.msra.mxu1 %vm6528_vm0, %v6367_v36  ;;  %3892 = vmatprep.subr.msk.mxu0 %vm6530_vm4, %v6367_v36  ;;  %vm6561_vm0 = vnez %v6560_v33  ;;  %v4379_v33 = vld [vmem:[#allocation2 + $0x134] ss:$8 sps:$4 sm:$0xff]  }
0x1447   :  { %3924 = vmatprep.subr.msk.mxu1 %vm6532_vm2, %v6367_v36  ;;  %3893 = vmatpush1.msk.msra.mxu0 %vm6534_vm15, %v6367_v36  ;;  %vm6564_vm2 = vcmask 261120  }
0x1448   :  { %3925 = vmatpush1.msk.msra.mxu1 %vm6536_vm14, %v6367_v36  ;;  %3894 = vmatprep.subr.msk.mxu0 %vm6538_vm8, %v6367_v36  ;;  %vm6565_vm15 = vmmov %vm6564_vm2 }
0x1449   :  { %3926 = vmatprep.subr.msk.mxu1 %vm6540_vm6, %v6367_v36  ;;  %3895 = vmatpush1.msk.msra.mxu0 %vm6542_vm7, %v6367_v36 }
0x144a   :  { %3927 = vmatpush1.msk.msra.mxu1 %vm6544_vm12, %v6367_v36  ;;  %3896 = vmatprep.subr.msk.mxu0 %vm6546_vm5, %v6367_v36 }
0x144b   :  { %3928 = vmatprep.subr.msk.mxu1 %vm6548_vm3, %v6367_v36  ;;  %3897 = vmatpush1.msk.msra.mxu0 %vm6550_vm10, %v6367_v36 }
0x144c   :  { %3929 = vmatpush1.msk.msra.mxu1 %vm6552_vm9, %v6367_v36  ;;  %3898 = vmatprep.subr.msk.mxu0 %vm6554_vm13, %v6367_v36 }
0x144d   :  { %3930 = vmatprep.subr.msk.mxu1 %vm6556_vm1, %v6367_v36  ;;  %3899 = vmatpush1.msk.msra.mxu0 %vm6558_vm11, %v6367_v36 }
0x144e   :  { %2059 = vmatprep.mubr.f32.mxu0 %v6559_v9  ;;  %3931 = vmatpush1.msk.msra.mxu1 %vm6561_vm0, %v6367_v36 }
0x144f   :  { %2130 = vmatprep.mubr.f32.mxu1 %v6559_v9  ;;  %2545 = vmatprep.subr.bf16.mxu0 %v4319_v5  ;;  %v4374_v9 = vld [vmem:[#allocation2 + $0x240] ss:$8 sps:$4 sm:$0xff]   ;;  %v4389_v5 = vld [vmem:[#allocation2 + $0x110] ss:$8 sps:$4 sm:$0xff]  }
0x1450   :  { %2586 = vmatprep.subr.bf16.mxu1 %v4322_v25  ;;  %v4391_v25 = vld [vmem:[#allocation2 + $0x114] ss:$8 sps:$4 sm:$0xff]  }
0x1453   :  { %v732_v10 = vpop.permute.xlu0 %731 }
0x1454   :  { %v734_v52 = vmul.f32 %v6111_v60, %v732_v10  ;;  %v4382_v10 = vld [vmem:[#allocation2 + $0x234] ss:$8 sps:$4 sm:$0xff]  }
0x1456   :  { %736 = vrot.lane.b32.xlu0 %v734_v52, %s4711_s27  ;;  %v4377_v52 = vld [vmem:[#allocation2 + $0x130] ss:$8 sps:$4 sm:$0xff]  }
0x14c8   :  { %v737_v20 = vpop.permute.xlu0 %736 }
0x14c9   :  { %v739_v51 = vadd.f32 %v737_v20, %v729_v1  ;;  %v4388_v1 = vld [vmem:[#allocation2 + $0x224] ss:$8 sps:$4 sm:$0xff]   ;;  %v4383_v20 = vld [vmem:[#allocation2 + $0x120] ss:$8 sps:$4 sm:$0xff]  }
0x14cb   :  { %4671 = vtanh.f32 %v739_v51  ;;  %v4386_v51 = vld [vmem:[#allocation2 + $0x220] ss:$8 sps:$4 sm:$0xff]  }
0x14d8   :  { %v4672_v36 = vpop.eup %4671 }
0x14d9   :  { %742 = vrot.lane.b32.xlu0 %v4672_v36, %s4708_s2  ;;  %v4392_v36 = vld [vmem:[#allocation2 + $0x210] ss:$8 sps:$4 sm:$0xff]  }
0x14ee   :  { %v4174_v17 = vpop.f32.mrf.mxu0 }
0x14ef   :  { %v4209_v13 = vpop.f32.mrf.mxu1 }
0x14f0   :  { %v4175_v58 = vpop.f32.mrf.mxu0 }
0x14f1   :  { %v4176_v40 = vadd.f32 %v4175_v58, %v4174_v17  ;;  %v4210_v3 = vpop.f32.mrf.mxu1  ;;  %v4394_v17 = vld [vmem:[#allocation2 + $0x214] ss:$8 sps:$4 sm:$0xff]   ;;  %v4400_v58 = vld [vmem:[#allocation2 + $0x204] ss:$8 sps:$4 sm:$0xff]  }
0x14f2   :  { %v4211_v39 = vadd.f32 %v4210_v3, %v4209_v13  ;;  %v4397_v13 = vld [vmem:[#allocation2 + $0x104] ss:$8 sps:$4 sm:$0xff]   ;;  %v4398_v3 = vld [vmem:[#allocation2 + $0x200] ss:$8 sps:$4 sm:$0xff]  }
0x14f4   :  { %v1990_v63 = vadd.f32 %v4211_v39, %v4176_v40  ;;  %v4395_v40 = vld [vmem:[#allocation2 + $0x100] ss:$8 sps:$4 sm:$0xff]   ;;  %v4403_v39 = vld [vmem:[#allocation2 + $0xf4] ss:$8 sps:$4 sm:$0xff]  }
0x14f6   :  { %vm1993_vm4 = vcmp.eq.f32.partialorder %v1990_v63, 0.0 }
0x14f7   :  { %v1994_v32 = vsel %vm1993_vm4, 1e-06, %v1990_v63  ;;  %v4406_v63 = vld [vmem:[#allocation2 + $0x1f4] ss:$8 sps:$4 sm:$0xff]  }
0x14f8   :  { %2060 = vmatmul.mubr.f32.vlgmr.msra.gmra.mxu0 %v1994_v32  ;;  %2131 = vmatmul.mubr.f32.vlgmr.msra.gmra.mxu1 %v1994_v32  ;;  %v4407_v32 = vld [vmem:[#allocation2 + $0xe0] ss:$8 sps:$4 sm:$0xff]  }
0x14f9   :  { %2546 = vmatpush1.bf16.msra.mxu0 %v4317_v23  ;;  %2587 = vmatpush1.bf16.msra.mxu1 %v4320_v24  ;;  %v4401_v23 = vld [vmem:[#allocation2 + $0xf0] ss:$8 sps:$4 sm:$0xff]  }
0x14fa   :  { %2547 = vmatprep.subr.bf16.mxu0 %v4325_v30  ;;  %2588 = vmatprep.subr.bf16.mxu1 %v4328_v28  ;;  %v4404_v24 = vld [vmem:[#allocation2 + $0x1f0] ss:$8 sps:$4 sm:$0xff]   ;;  %v4409_v30 = vld [vmem:[#allocation2 + $0xe4] ss:$8 sps:$4 sm:$0xff]  }
0x14fb   :  { %v4412_v28 = vld [vmem:[#allocation2 + $0x1e4] ss:$8 sps:$4 sm:$0xff]  }
0x14fd   :  { %2548 = vmatpush1.bf16.msra.mxu0 %v4323_v37  ;;  %2589 = vmatpush1.bf16.msra.mxu1 %v4326_v43  ;;  %v4410_v37 = vld [vmem:[#allocation2 + $0x1e0] ss:$8 sps:$4 sm:$0xff]  }
0x14fe   :  { %2549 = vmatprep.subr.bf16.mxu0 %v4331_v44  ;;  %2590 = vmatprep.subr.bf16.mxu1 %v4334_v45 }
0x1501   :  { %2550 = vmatpush1.bf16.msra.mxu0 %v4329_v46  ;;  %2591 = vmatpush1.bf16.msra.mxu1 %v4332_v47  ;;  %v4415_v46 = vld [vmem:[#allocation2 + $0x394] ss:$8 sps:$4 sm:$0xff]  }
0x1502   :  { %2551 = vmatprep.subr.bf16.mxu0 %v4337_v48  ;;  %2592 = vmatprep.subr.bf16.mxu1 %v4340_v49  ;;  %v4427_v48 = vld [vmem:[#allocation2 + $0x2d4] ss:$8 sps:$4 sm:$0xff]  }
0x1505   :  { %2552 = vmatpush1.bf16.msra.mxu0 %v4335_v19  ;;  %2593 = vmatpush1.bf16.msra.mxu1 %v4338_v12 }
0x1506   :  { %2553 = vmatprep.subr.bf16.mxu0 %v4343_v35  ;;  %2594 = vmatprep.subr.bf16.mxu1 %v4346_v6 }
0x1509   :  { %2554 = vmatpush1.bf16.msra.mxu0 %v4341_v11  ;;  %2595 = vmatpush1.bf16.msra.mxu1 %v4344_v41 }
0x150a   :  { %2555 = vmatprep.subr.bf16.mxu0 %v4349_v29  ;;  %2596 = vmatprep.subr.bf16.mxu1 %v4352_v27 }
0x150d   :  { %2556 = vmatpush1.bf16.msra.mxu0 %v4347_v31  ;;  %2597 = vmatpush1.bf16.msra.mxu1 %v4350_v16 }
0x150e   :  { %2557 = vmatprep.subr.bf16.mxu0 %v4355_v55  ;;  %2598 = vmatprep.subr.bf16.mxu1 %v4358_v14  ;;  %v4425_v14 = vld [vmem:[#allocation2 + $0x2d0] ss:$8 sps:$4 sm:$0xff]  }
0x1511   :  { %2558 = vmatpush1.bf16.msra.mxu0 %v4353_v4  ;;  %2599 = vmatpush1.bf16.msra.mxu1 %v4356_v50 }
0x1512   :  { %2559 = vmatprep.subr.bf16.mxu0 %v4361_v15  ;;  %2600 = vmatprep.subr.bf16.mxu1 %v4364_v59  ;;  %v4413_v15 = vld [vmem:[#allocation2 + $0x390] ss:$8 sps:$4 sm:$0xff]  }
0x1515   :  { %2560 = vmatpush1.bf16.msra.mxu0 %v4359_v38  ;;  %2601 = vmatpush1.bf16.msra.mxu1 %v4362_v42  ;;  %v4418_v38 = vld [vmem:[#allocation2 + $0x384] ss:$8 sps:$4 sm:$0xff]  }
0x1516   :  { %2561 = vmatprep.subr.bf16.mxu0 %v4367_v8  ;;  %2602 = vmatprep.subr.bf16.mxu1 %v4370_v61  ;;  %v4430_v42 = vld [vmem:[#allocation2 + $0x2c4] ss:$8 sps:$4 sm:$0xff]   ;;  %v6563_v8 = vmov 0   ;;  %v4431_v61 = vld [vmem:[#allocation2 + $0x2b0] ss:$8 sps:$4 sm:$0xff]  }
0x1519   :  { %2562 = vmatpush2.bf16.msra.mxu0 %v4365_v53  ;;  %2603 = vmatpush2.bf16.msra.mxu1 %v4368_v2  ;;  %v4419_v53 = vld [vmem:[#allocation2 + $0x370] ss:$8 sps:$4 sm:$0xff]   ;;  %v4424_v2 = vld [vmem:[#allocation2 + $0x364] ss:$8 sps:$4 sm:$0xff]  }
0x151a   :  { %2563 = vmatprep.subr.bf16.mxu0 %v4373_v56  ;;  %2604 = vmatprep.subr.bf16.mxu1 %v4376_v26  ;;  %v4436_v56 = vld [vmem:[#allocation2 + $0x2a4] ss:$8 sps:$4 sm:$0xff]   ;;  %v2892_v26 = vpop.permute.xlu1 %2891 }
0x151d   :  { %2564 = vmatpush2.bf16.msra.mxu0 %v4371_v18  ;;  %2605 = vmatpush2.bf16.msra.mxu1 %v4374_v9  ;;  %v4434_v18 = vld [vmem:[#allocation2 + $0x2a0] ss:$8 sps:$4 sm:$0xff]  }
0x151e   :  { %2565 = vmatprep.subr.bf16.mxu0 %v4379_v33  ;;  %2606 = vmatprep.subr.bf16.mxu1 %v4382_v10  ;;  %v4422_v9 = vld [vmem:[#allocation2 + $0x360] ss:$8 sps:$4 sm:$0xff]   ;;  %v4439_v33 = vld [vmem:[#allocation2 + $0x294] ss:$8 sps:$4 sm:$0xff]   ;;  %v4437_v10 = vld [vmem:[#allocation2 + $0x290] ss:$8 sps:$4 sm:$0xff]  }
0x1521   :  { %2566 = vmatpush2.bf16.msra.mxu0 %v4377_v52  ;;  %2607 = vmatpush2.bf16.msra.mxu1 %v4380_v54  ;;  %v4442_v52 = vld [vmem:[#allocation2 + $0x284] ss:$8 sps:$4 sm:$0xff]  }
0x1522   :  { %2567 = vmatprep.subr.bf16.mxu0 %v4385_v7  ;;  %2608 = vmatprep.subr.bf16.mxu1 %v4388_v1  ;;  %v4440_v7 = vld [vmem:[#allocation2 + $0x280] ss:$8 sps:$4 sm:$0xff]   ;;  %v4445_v1 = vld [vmem:[#allocation2 + $0x274] ss:$8 sps:$4 sm:$0xff]  }
0x1525   :  { %2568 = vmatpush2.bf16.msra.mxu0 %v4383_v20  ;;  %2609 = vmatpush2.bf16.msra.mxu1 %v4386_v51  ;;  %v4443_v20 = vld [vmem:[#allocation2 + $0x270] ss:$8 sps:$4 sm:$0xff]   ;;  %v4448_v51 = vld [vmem:[#allocation2 + $0x264] ss:$8 sps:$4 sm:$0xff]  }
0x1526   :  { %2569 = vmatprep.subr.bf16.mxu0 %v4391_v25  ;;  %2610 = vmatprep.subr.bf16.mxu1 %v4394_v17  ;;  %v4451_v25 = vld [vmem:[#allocation2 + $0x354] ss:$8 sps:$4 sm:$0xff]   ;;  %v4454_v17 = vld [vmem:[#allocation2 + $0x344] ss:$8 sps:$4 sm:$0xff]  }
0x1529   :  { %2570 = vmatpush2.bf16.msra.mxu0 %v4389_v5  ;;  %2611 = vmatpush2.bf16.msra.mxu1 %v4392_v36  ;;  %v4446_v5 = vld [vmem:[#allocation2 + $0x260] ss:$8 sps:$4 sm:$0xff]   ;;  %v4449_v36 = vld [vmem:[#allocation2 + $0x350] ss:$8 sps:$4 sm:$0xff]  }
0x152a   :  { %2571 = vmatprep.subr.bf16.mxu0 %v4397_v13  ;;  %2612 = vmatprep.subr.bf16.mxu1 %v4400_v58  ;;  %v4452_v13 = vld [vmem:[#allocation2 + $0x340] ss:$8 sps:$4 sm:$0xff]   ;;  %v4457_v58 = vld [vmem:[#allocation2 + $0x334] ss:$8 sps:$4 sm:$0xff]  }
0x152d   :  { %2572 = vmatpush2.bf16.msra.mxu0 %v4395_v40  ;;  %2613 = vmatpush2.bf16.msra.mxu1 %v4398_v3  ;;  %v4455_v40 = vld [vmem:[#allocation2 + $0x330] ss:$8 sps:$4 sm:$0xff]   ;;  %v4460_v3 = vld [vmem:[#allocation2 + $0x324] ss:$8 sps:$4 sm:$0xff]  }
0x152e   :  { %2573 = vmatprep.subr.bf16.mxu0 %v4403_v39  ;;  %2614 = vmatprep.subr.bf16.mxu1 %v4406_v63  ;;  %v4458_v39 = vld [vmem:[#allocation2 + $0x320] ss:$8 sps:$4 sm:$0xff]   ;;  %v4463_v63 = vld [vmem:[#allocation2 + $0x314] ss:$8 sps:$4 sm:$0xff]  }
0x1531   :  { %2574 = vmatpush2.bf16.msra.mxu0 %v4401_v23  ;;  %2615 = vmatpush2.bf16.msra.mxu1 %v4404_v24  ;;  %v4461_v23 = vld [vmem:[#allocation2 + $0x310] ss:$8 sps:$4 sm:$0xff]   ;;  %v4466_v24 = vld [vmem:[#allocation2 + $0x304] ss:$8 sps:$4 sm:$0xff]  }
0x1532   :  { %2575 = vmatprep.subr.bf16.mxu0 %v4409_v30  ;;  %2616 = vmatprep.subr.bf16.mxu1 %v4412_v28  ;;  %v4464_v30 = vld [vmem:[#allocation2 + $0x300] ss:$8 sps:$4 sm:$0xff]   ;;  %v4469_v28 = vld [vmem:[#allocation2 + $0x2f4] ss:$8 sps:$4 sm:$0xff]  }
0x1535   :  { %2576 = vmatpush2.bf16.msra.mxu0 %v4407_v32  ;;  %2617 = vmatpush2.bf16.msra.mxu1 %v4410_v37  ;;  %v4467_v32 = vld [vmem:[#allocation2 + $0x2f0] ss:$8 sps:$4 sm:$0xff]   ;;  %v4472_v37 = vld [vmem:[#allocation2 + $0x2e4] ss:$8 sps:$4 sm:$0xff]  }
0x1536   :  { %2928 = vmatprep.subr.bf16.mxu1 %v4415_v46  ;;  %2836 = vmatprep.subr.bf16.mxu0 %v4427_v48  ;;  %v4478_v46 = vld [vmem:[#allocation2 + $0x404] ss:$8 sps:$4 sm:$0xff]   ;;  %v4481_v48 = vld [vmem:[#allocation2 + $0x3f4] ss:$8 sps:$4 sm:$0xff]  }
0x154b   :  { %v743_v43 = vpop.permute.xlu0 %742 }
0x154c   :  { %v745_v44 = vmul.f32 %v6111_v60, %v743_v43  ;;  %v4470_v43 = vld [vmem:[#allocation2 + $0x2e0] ss:$8 sps:$4 sm:$0xff]  }
0x154e   :  { %v2879_v45 = vpack.c.bf16 %v745_v44, %v745_v44  ;;  %v4473_v44 = vld [vmem:[#allocation2 + $0x410] ss:$8 sps:$4 sm:$0xff]  }
0x1550   :  { %v2958_v47 = vrot.slane %v2879_v45, 2  ;;  %v4475_v45 = vld [vmem:[#allocation2 + $0x414] ss:$8 sps:$4 sm:$0xff]  }
0x1552   :  { %2959 = vrot.lane.b32.xlu0 %v2958_v47, %s4711_s27  ;;  %v4476_v47 = vld [vmem:[#allocation2 + $0x400] ss:$8 sps:$4 sm:$0xff]  }
0x15b8   :  { %v2061_v49 = vpop.f32.mrf.mxu0  ;;  %v2132_v19 = vpop.f32.mrf.mxu1 }
0x15b9   :  { %4673 = vrcp.f32 %v2061_v49  ;;  %v4479_v49 = vld [vmem:[#allocation2 + $0x3f0] ss:$8 sps:$4 sm:$0xff]  }
0x15ba   :  { %4675 = vrcp.f32 %v2132_v19  ;;  %v2063_v12 = vpop.f32.mrf.mxu0  ;;  %v2134_v35 = vpop.f32.mrf.mxu1  ;;  %v4484_v19 = vld [vmem:[#allocation2 + $0x3e4] ss:$8 sps:$4 sm:$0xff]  }
0x15bb   :  { %4677 = vrcp.f32 %v2063_v12  ;;  %v4482_v12 = vld [vmem:[#allocation2 + $0x3e0] ss:$8 sps:$4 sm:$0xff]  }
0x15bc   :  { %4679 = vrcp.f32 %v2134_v35  ;;  %v4487_v35 = vld [vmem:[#allocation2 + $0x3d4] ss:$8 sps:$4 sm:$0xff]  }
0x15c4   :  { %v2960_v54 = vpop.permute.xlu0 %2959 }
0x15c6   :  { %v4674_v6 = vpop.eup %4673 }
0x15c7   :  { %v4676_v60 = vpop.eup %4675  ;;  %v2141_v41 = vmul.f32 %v4674_v6, %v5915_v21  ;;  %v4428_v21 = vld [vmem:[#allocation2 + $0x2c0] ss:$8 sps:$4 sm:$0xff]   ;;  %v4485_v6 = vld [vmem:[#allocation2 + $0x3d0] ss:$8 sps:$4 sm:$0xff]  }
0x15c8   :  { %v4678_v11 = vpop.eup %4677  ;;  %v2143_v31 = vmul.f32 %v4676_v60, %v5919_v62  ;;  %v4433_v62 = vld [vmem:[#allocation2 + $0x2b4] ss:$8 sps:$4 sm:$0xff]   ;;  %v4490_v60 = vld [vmem:[#allocation2 + $0x3c4] ss:$8 sps:$4 sm:$0xff]  }
0x15c9   :  { %v4680_v29 = vpop.eup %4679  ;;  %v2142_v27 = vmul.f32 %v4678_v11, %v5912_v0  ;;  %v2145_v50 = vpack.c.bf16 %v2141_v41, %v2141_v41  ;;  %v4416_v0 = vld [vmem:[#allocation2 + $0x380] ss:$8 sps:$4 sm:$0xff]   ;;  %v4493_v41 = vld [vmem:[#allocation2 + $0x3b4] ss:$8 sps:$4 sm:$0xff]  }
0x15ca   :  { %v2144_v16 = vmul.f32 %v4680_v29, %v5910_v22  ;;  %v2147_v59 = vpack.c.bf16 %v2143_v31, %v2143_v31  ;;  %v4421_v22 = vld [vmem:[#allocation2 + $0x374] ss:$8 sps:$4 sm:$0xff]   ;;  %v4488_v11 = vld [vmem:[#allocation2 + $0x3c0] ss:$8 sps:$4 sm:$0xff]   ;;  %v4491_v29 = vld [vmem:[#allocation2 + $0x3b0] ss:$8 sps:$4 sm:$0xff]  }
0x15cb   :  { %v2146_v55 = vpack.c.bf16 %v2142_v27, %v2142_v27  ;;  %v4496_v27 = vld [vmem:[#allocation2 + $0x3a4] ss:$8 sps:$4 sm:$0xff]   ;;  %v4494_v31 = vld [vmem:[#allocation2 + $0x3a0] ss:$8 sps:$4 sm:$0xff]  }
0x15cc   :  { %v2148_v4 = vpack.c.bf16 %v2144_v16, %v2144_v16  ;;  %v4499_v16 = vld [vmem:[#allocation2 + $0x494] ss:$8 sps:$4 sm:$0xff]  }
0x15cd   :  { %2577 = vmatprep.mubr.bf16.mxu0 %v2146_v55  ;;  %v4497_v55 = vld [vmem:[#allocation2 + $0x490] ss:$8 sps:$4 sm:$0xff]  }
0x15ce   :  { %2618 = vmatprep.mubr.bf16.mxu1 %v2148_v4  ;;  %2578 = vmatmul.mubr.bf16.vlgmr.msra.gmra.mxu0 %v2145_v50  ;;  %v4500_v4 = vld [vmem:[#allocation2 + $0x480] ss:$8 sps:$4 sm:$0xff]   ;;  %v4505_v50 = vld [vmem:[#allocation2 + $0x474] ss:$8 sps:$4 sm:$0xff]  }
0x15cf   :  { %2619 = vmatmul.mubr.bf16.vlgmr.msra.gmra.mxu1 %v2147_v59  ;;  %2837 = vmatpush1.bf16.msra.mxu0 %v4425_v14  ;;  %v4502_v14 = vld [vmem:[#allocation2 + $0x484] ss:$8 sps:$4 sm:$0xff]  }
0x15d0   :  { %2929 = vmatpush1.bf16.msra.mxu1 %v4413_v15  ;;  %2948 = vmatprep.mubr.bf16.mxu1 %v6563_v8  ;;  %v4503_v15 = vld [vmem:[#allocation2 + $0x470] ss:$8 sps:$4 sm:$0xff]   ;;  %v4508_v59 = vld [vmem:[#allocation2 + $0x464] ss:$8 sps:$4 sm:$0xff]  }
0x15d1   :  { %2930 = vmatprep.subr.bf16.mxu1 %v4418_v38  ;;  %2838 = vmatprep.subr.bf16.mxu0 %v4430_v42  ;;  %v4506_v38 = vld [vmem:[#allocation2 + $0x460] ss:$8 sps:$4 sm:$0xff]   ;;  %v4511_v42 = vld [vmem:[#allocation2 + $0x454] ss:$8 sps:$4 sm:$0xff]  }
0x15d3   :  { %2839 = vmatpush1.bf16.msra.mxu0 %v4428_v21  ;;  %v4509_v21 = vld [vmem:[#allocation2 + $0x450] ss:$8 sps:$4 sm:$0xff]  }
0x15d4   :  { %2931 = vmatpush1.bf16.msra.mxu1 %v4416_v0  ;;  %2840 = vmatprep.subr.bf16.mxu0 %v4433_v62  ;;  %v4514_v0 = vld [vmem:[#allocation2 + $0x444] ss:$8 sps:$4 sm:$0xff]   ;;  %v2213_v62 = vld [vmem:[%s6163_s3] ss:$8 sm:$0x3] }
0x15d5   :  { %2996 = vmatprep.subr.bf16.mxu1 %v4421_v22  ;;  %v2218_v22 = vrot.slane %v2213_v62, %v5886_v57 }
0x15d7   :  { %4033 = vmatmul.mubr.msk.bf16.vlgmr.msra.gmra.mxu1 %vm6564_vm2, %v2892_v26  ;;  %2841 = vmatpush1.bf16.msra.mxu0 %v4431_v61  ;;  %v2222_v61 = vrot.slane %v2213_v62, %v5890_v34 }
0x15d8   :  { %2997 = vmatpush1.bf16.msra.mxu1 %v4419_v53  ;;  %3016 = vmatprep.mubr.bf16.mxu1 %v6563_v8  ;;  %v4512_v8 = vld [vmem:[#allocation2 + $0x440] ss:$8 sps:$4 sm:$0xff]  }
0x15d9   :  { %2998 = vmatprep.subr.bf16.mxu1 %v4424_v2  ;;  %2842 = vmatprep.subr.bf16.mxu0 %v4436_v56 }
0x15db   :  { %2843 = vmatpush1.bf16.msra.mxu0 %v4434_v18 }
0x15dc   :  { %2999 = vmatpush1.bf16.msra.mxu1 %v4422_v9  ;;  %2844 = vmatprep.subr.bf16.mxu0 %v4439_v33 }
0x15dd   :  { %3219 = vmatprep.subr.bf16.mxu1 %v4475_v45  ;;  %v4526_v45 = vld [vmem:[#allocation2 + $0x504] ss:$8 sps:$4 sm:$0xff]  }
0x15df   :  { %4038 = vmatmul.mubr.msk.bf16.vlgmr.msra.gmra.mxu1 %vm6565_vm15, %v2960_v54  ;;  %2845 = vmatpush1.bf16.msra.mxu0 %v4437_v10 }
0x15e0   :  { %2846 = vmatprep.subr.bf16.mxu0 %v4442_v52  ;;  %3220 = vmatpush1.bf16.msra.mxu1 %v4473_v44  ;;  %v4523_v44 = vld [vmem:[#allocation2 + $0x514] ss:$8 sps:$4 sm:$0xff]  }
0x15e1   :  { %3221 = vmatprep.subr.bf16.mxu1 %v4478_v46  ;;  %v4524_v46 = vld [vmem:[#allocation2 + $0x500] ss:$8 sps:$4 sm:$0xff]  }
0x15e3   :  { %2847 = vmatpush1.bf16.msra.mxu0 %v4440_v7 }
0x15e4   :  { %2848 = vmatprep.subr.bf16.mxu0 %v4445_v1  ;;  %3222 = vmatpush1.bf16.msra.mxu1 %v4476_v47  ;;  %v4529_v47 = vld [vmem:[#allocation2 + $0x4f4] ss:$8 sps:$4 sm:$0xff]  }
0x15e5   :  { %3223 = vmatprep.subr.bf16.mxu1 %v4481_v48  ;;  %v4527_v48 = vld [vmem:[#allocation2 + $0x4f0] ss:$8 sps:$4 sm:$0xff]  }
0x15e7   :  { %2849 = vmatpush1.bf16.msra.mxu0 %v4443_v20 }
0x15e8   :  { %2850 = vmatprep.subr.bf16.mxu0 %v4448_v51  ;;  %3224 = vmatpush1.bf16.msra.mxu1 %v4479_v49  ;;  %v4532_v49 = vld [vmem:[#allocation2 + $0x4e4] ss:$8 sps:$4 sm:$0xff]  }
0x15e9   :  { %3225 = vmatprep.subr.bf16.mxu1 %v4484_v19  ;;  %v4530_v19 = vld [vmem:[#allocation2 + $0x4e0] ss:$8 sps:$4 sm:$0xff]  }
0x15eb   :  { %2851 = vmatpush1.bf16.msra.mxu0 %v4446_v5 }
0x15ec   :  { %2852 = vmatprep.subr.bf16.mxu0 %v4451_v25  ;;  %3226 = vmatpush1.bf16.msra.mxu1 %v4482_v12  ;;  %v4535_v12 = vld [vmem:[#allocation2 + $0x4d4] ss:$8 sps:$4 sm:$0xff]  }
0x15ed   :  { %3227 = vmatprep.subr.bf16.mxu1 %v4487_v35  ;;  %v4533_v35 = vld [vmem:[#allocation2 + $0x4d0] ss:$8 sps:$4 sm:$0xff]  }
0x15ef   :  { %2853 = vmatpush2.bf16.msra.mxu0 %v4449_v36 }
0x15f0   :  { %2854 = vmatprep.subr.bf16.mxu0 %v4454_v17  ;;  %3228 = vmatpush1.bf16.msra.mxu1 %v4485_v6  ;;  %v4538_v6 = vld [vmem:[#allocation2 + $0x4c4] ss:$8 sps:$4 sm:$0xff]  }
0x15f1   :  { %3229 = vmatprep.subr.bf16.mxu1 %v4490_v60  ;;  %v4536_v60 = vld [vmem:[#allocation2 + $0x4c0] ss:$8 sps:$4 sm:$0xff]  }
0x15f3   :  { %2855 = vmatpush2.bf16.msra.mxu0 %v4452_v13 }
0x15f4   :  { %2856 = vmatprep.subr.bf16.mxu0 %v4457_v58  ;;  %3230 = vmatpush1.bf16.msra.mxu1 %v4488_v11  ;;  %v4541_v11 = vld [vmem:[#allocation2 + $0x4b4] ss:$8 sps:$4 sm:$0xff]  }
0x15f5   :  { %3231 = vmatprep.subr.bf16.mxu1 %v4493_v41  ;;  %v4539_v41 = vld [vmem:[#allocation2 + $0x4b0] ss:$8 sps:$4 sm:$0xff]  }
0x15f7   :  { %2857 = vmatpush2.bf16.msra.mxu0 %v4455_v40 }
0x15f8   :  { %2858 = vmatprep.subr.bf16.mxu0 %v4460_v3  ;;  %3232 = vmatpush1.bf16.msra.mxu1 %v4491_v29  ;;  %v4544_v29 = vld [vmem:[#allocation2 + $0x4a4] ss:$8 sps:$4 sm:$0xff]  }
0x15f9   :  { %3233 = vmatprep.subr.bf16.mxu1 %v4496_v27  ;;  %v4542_v27 = vld [vmem:[#allocation2 + $0x4a0] ss:$8 sps:$4 sm:$0xff]  }
0x15fb   :  { %2859 = vmatpush2.bf16.msra.mxu0 %v4458_v39 }
0x15fc   :  { %2860 = vmatprep.subr.bf16.mxu0 %v4463_v63  ;;  %3234 = vmatpush1.bf16.msra.mxu1 %v4494_v31  ;;  %v4547_v31 = vld [vmem:[#allocation2 + $0x594] ss:$8 sps:$4 sm:$0xff]  }
0x15fd   :  { %3235 = vmatprep.subr.bf16.mxu1 %v4499_v16  ;;  %v4545_v16 = vld [vmem:[#allocation2 + $0x590] ss:$8 sps:$4 sm:$0xff]  }
0x15ff   :  { %2861 = vmatpush2.bf16.msra.mxu0 %v4461_v23 }
0x1600   :  { %2862 = vmatprep.subr.bf16.mxu0 %v4466_v24  ;;  %3236 = vmatpush2.bf16.msra.mxu1 %v4497_v55  ;;  %v4550_v55 = vld [vmem:[#allocation2 + $0x584] ss:$8 sps:$4 sm:$0xff]  }
0x1601   :  { %3237 = vmatprep.subr.bf16.mxu1 %v4502_v14  ;;  %v4548_v14 = vld [vmem:[#allocation2 + $0x580] ss:$8 sps:$4 sm:$0xff]  }
0x1603   :  { %2863 = vmatpush2.bf16.msra.mxu0 %v4464_v30  ;;  %v4517_v30 = vld [vmem:[#allocation2 + $0x434] ss:$8 sps:$4 sm:$0xff]  }
0x1604   :  { %2864 = vmatprep.subr.bf16.mxu0 %v4469_v28  ;;  %3238 = vmatpush2.bf16.msra.mxu1 %v4500_v4  ;;  %v4515_v28 = vld [vmem:[#allocation2 + $0x430] ss:$8 sps:$4 sm:$0xff]   ;;  %v4553_v4 = vld [vmem:[#allocation2 + $0x574] ss:$8 sps:$4 sm:$0xff]  }
0x1605   :  { %3239 = vmatprep.subr.bf16.mxu1 %v4505_v50  ;;  %v4551_v50 = vld [vmem:[#allocation2 + $0x570] ss:$8 sps:$4 sm:$0xff]  }
0x1607   :  { %2865 = vmatpush2.bf16.msra.mxu0 %v4467_v32  ;;  %v4520_v32 = vld [vmem:[#allocation2 + $0x424] ss:$8 sps:$4 sm:$0xff]  }
0x1608   :  { %2866 = vmatprep.subr.bf16.mxu0 %v4472_v37  ;;  %3240 = vmatpush2.bf16.msra.mxu1 %v4503_v15  ;;  %v4518_v37 = vld [vmem:[#allocation2 + $0x420] ss:$8 sps:$4 sm:$0xff]   ;;  %v4556_v15 = vld [vmem:[#allocation2 + $0x564] ss:$8 sps:$4 sm:$0xff]  }
0x1609   :  { %3241 = vmatprep.subr.bf16.mxu1 %v4508_v59  ;;  %v4554_v59 = vld [vmem:[#allocation2 + $0x560] ss:$8 sps:$4 sm:$0xff]  }
0x160b   :  { %2867 = vmatpush2.bf16.msra.mxu0 %v4470_v43  ;;  %v4521_v43 = vld [vmem:[#allocation2 + $0x510] ss:$8 sps:$4 sm:$0xff]  }
0x160c   :  { %3242 = vmatpush2.bf16.msra.mxu1 %v4506_v38  ;;  %3486 = vmatprep.subr.bf16.mxu0 %v4523_v44  ;;  %v4559_v38 = vld [vmem:[#allocation2 + $0x554] ss:$8 sps:$4 sm:$0xff]  }
0x160d   :  { %3243 = vmatprep.subr.bf16.mxu1 %v4511_v42  ;;  %v4557_v42 = vld [vmem:[#allocation2 + $0x550] ss:$8 sps:$4 sm:$0xff]  }
0x1610   :  { %3244 = vmatpush2.bf16.msra.mxu1 %v4509_v21  ;;  %v3996_v21 = vld [vmem:[%s6163_s3 + $0x1] ss:$8 sm:$0x3] }
0x1611   :  { %3245 = vmatprep.subr.bf16.mxu1 %v4514_v0  ;;  %v2669_v0 = vrot.slane %v3996_v21, %v5886_v57 }
0x1614   :  { %3246 = vmatpush2.bf16.msra.mxu1 %v4512_v8  ;;  %v2673_v8 = vrot.slane %v3996_v21, %v5890_v34 }
0x1615   :  { %3247 = vmatprep.subr.bf16.mxu1 %v4517_v30  ;;  %v4580_v30 = vld [vmem:[#allocation2 + $0x5c0] ss:$8 sps:$4 sm:$0xff]  }
0x1618   :  { %3248 = vmatpush2.bf16.msra.mxu1 %v4515_v28  ;;  %v4071_v28 = vld [vmem:[%s6163_s3 + $0x2] ss:$8 sm:$0x3] }
0x1619   :  { %3249 = vmatprep.subr.bf16.mxu1 %v4520_v32  ;;  %v3268_v32 = vrot.slane %v4071_v28, %v5886_v57  ;;  %v3272_v44 = vrot.slane %v4071_v28, %v5890_v34 }
0x161c   :  { %3250 = vmatpush2.bf16.msra.mxu1 %v4518_v37 }
0x168e   :  { %v2579_v53 = vpop.f32.mrf.mxu0 }
0x168f   :  { %v2580_v2 = vadd.f32 %v2579_v53, %v2218_v22  ;;  %v2620_v56 = vpop.f32.mrf.mxu1 }
0x1690   :  { %v2581_v26 = vpop.f32.mrf.mxu0 }
0x1691   :  { %v2621_v18 = vadd.f32 %v2620_v56, %v2580_v2  ;;  %v2582_v9 = vadd.f32 %v2581_v26, %v2222_v61  ;;  %v2622_v33 = vpop.f32.mrf.mxu1 }
0x1692   :  { %v2583_v10 = vpop.f32.mrf.mxu0 }
0x1693   :  { %v2623_v52 = vadd.f32 %v2622_v33, %v2582_v9  ;;  %v2624_v54 = vpop.f32.mrf.mxu1  ;;  %v2627_v7 = vmax.f32 %v2621_v18, 0.0  ;;  %v4562_v10 = vld [vmem:[#allocation2 + $0x544] ss:$8 sps:$4 sm:$0xff]  }
0x1694   :  { %v2584_v1 = vpop.f32.mrf.mxu0  ;;  %v4565_v54 = vld [vmem:[#allocation2 + $0x534] ss:$8 sps:$4 sm:$0xff]  }
0x1695   :  { %v2628_v20 = vmax.f32 %v2623_v52, 0.0  ;;  %v2625_v51 = vpop.f32.mrf.mxu1  ;;  %v2629_v36 = vpack.c.bf16 %v2627_v7, %v2627_v7  ;;  %v4560_v52 = vld [vmem:[#allocation2 + $0x540] ss:$8 sps:$4 sm:$0xff]   ;;  %v4563_v7 = vld [vmem:[#allocation2 + $0x530] ss:$8 sps:$4 sm:$0xff]  }
0x1696   :  { %v4568_v1 = vld [vmem:[#allocation2 + $0x524] ss:$8 sps:$4 sm:$0xff]   ;;  %v4569_v51 = vld [vmem:[#allocation2 + $0x690] ss:$8 sps:$4 sm:$0xff]  }
0x1697   :  { %v2630_v5 = vpack.c.bf16 %v2628_v20, %v2628_v20  ;;  %v2950_v25 = vpop.f32.mrf.mxu1  ;;  %v4566_v20 = vld [vmem:[#allocation2 + $0x520] ss:$8 sps:$4 sm:$0xff]   ;;  %4212 = vmatprep.subr.bf16.mxu1 %v4569_v51 }
0x1699   :  { %v2952_v17 = vpop.f32.mrf.mxu1  ;;  %2868 = vmatprep.mubr.bf16.mxu0 %v2630_v5  ;;  %v4570_v5 = vld [vmem:[#allocation2 + $0x610] ss:$8 sps:$4 sm:$0xff]  }
0x169a   :  { %2869 = vmatmul.mubr.bf16.vlgmr.msra.gmra.mxu0 %v2629_v36  ;;  %v4572_v36 = vld [vmem:[#allocation2 + $0x600] ss:$8 sps:$4 sm:$0xff]  }
0x169b   :  { %v2954_v13 = vpop.f32.mrf.mxu1  ;;  %3487 = vmatpush1.bf16.msra.mxu0 %v4521_v43 }
0x169c   :  { %3488 = vmatprep.subr.bf16.mxu0 %v4526_v45  ;;  %v4574_v13 = vld [vmem:[#allocation2 + $0x5f0] ss:$8 sps:$4 sm:$0xff]  }
0x169d   :  { %v2955_v58 = vpop.f32.mrf.mxu1 }
0x169e   :  { %v4575_v58 = vld [vmem:[#allocation2 + $0x660] ss:$8 sps:$4 sm:$0xff]  }
0x169f   :  { %v3018_v40 = vpop.f32.mrf.mxu1  ;;  %3489 = vmatpush1.bf16.msra.mxu0 %v4524_v46 }
0x16a0   :  { %v6133_v3 = vadd.f32 %v3018_v40, %v2950_v25  ;;  %3490 = vmatprep.subr.bf16.mxu0 %v4529_v47  ;;  %v4571_v25 = vld [vmem:[#allocation2 + $0x680] ss:$8 sps:$4 sm:$0xff]  }
0x16a1   :  { %v3020_v39 = vpop.f32.mrf.mxu1  ;;  %v4576_v40 = vld [vmem:[#allocation2 + $0x5e0] ss:$8 sps:$4 sm:$0xff]  }
0x16a2   :  { %v6135_v63 = vadd.f32 %v3020_v39, %v2952_v17  ;;  %v4573_v17 = vld [vmem:[#allocation2 + $0x670] ss:$8 sps:$4 sm:$0xff]  }
0x16a3   :  { %v3022_v23 = vpop.f32.mrf.mxu1  ;;  %3491 = vmatpush1.bf16.msra.mxu0 %v4527_v48  ;;  %v4577_v39 = vld [vmem:[#allocation2 + $0x650] ss:$8 sps:$4 sm:$0xff]  }
0x16a4   :  { %3492 = vmatprep.subr.bf16.mxu0 %v4532_v49  ;;  %v4578_v23 = vld [vmem:[#allocation2 + $0x5d0] ss:$8 sps:$4 sm:$0xff]  }
0x16a5   :  { %v3023_v24 = vpop.f32.mrf.mxu1 }
0x16a6   :  { %v4579_v24 = vld [vmem:[#allocation2 + $0x640] ss:$8 sps:$4 sm:$0xff]  }
0x16a7   :  { %3493 = vmatpush1.bf16.msra.mxu0 %v4530_v19 }
0x16a8   :  { %3494 = vmatprep.subr.bf16.mxu0 %v4535_v12 }
0x16ab   :  { %3495 = vmatpush1.bf16.msra.mxu0 %v4533_v35 }
0x16ac   :  { %3496 = vmatprep.subr.bf16.mxu0 %v4538_v6 }
0x16af   :  { %3497 = vmatpush1.bf16.msra.mxu0 %v4536_v60 }
0x16b0   :  { %3498 = vmatprep.subr.bf16.mxu0 %v4541_v11  ;;  %v4581_v11 = vld [vmem:[#allocation2 + $0x630] ss:$8 sps:$4 sm:$0xff]  }
0x16b3   :  { %3499 = vmatpush1.bf16.msra.mxu0 %v4539_v41  ;;  %v4582_v41 = vld [vmem:[#allocation2 + $0x5b0] ss:$8 sps:$4 sm:$0xff]  }
0x16b4   :  { %3500 = vmatprep.subr.bf16.mxu0 %v4544_v29  ;;  %v4584_v29 = vld [vmem:[#allocation2 + $0x5a0] ss:$8 sps:$4 sm:$0xff]  }
0x16b7   :  { %3501 = vmatpush1.bf16.msra.mxu0 %v4542_v27 }
0x16b8   :  { %3502 = vmatprep.subr.bf16.mxu0 %v4547_v31 }
0x16bb   :  { %3503 = vmatpush2.bf16.msra.mxu0 %v4545_v16 }
0x16bc   :  { %3504 = vmatprep.subr.bf16.mxu0 %v4550_v55 }
0x16bf   :  { %3505 = vmatpush2.bf16.msra.mxu0 %v4548_v14 }
0x16c0   :  { %3506 = vmatprep.subr.bf16.mxu0 %v4553_v4 }
0x16c3   :  { %3507 = vmatpush2.bf16.msra.mxu0 %v4551_v50 }
0x16c4   :  { %3508 = vmatprep.subr.bf16.mxu0 %v4556_v15 }
0x16c7   :  { %3509 = vmatpush2.bf16.msra.mxu0 %v4554_v59 }
0x16c8   :  { %3510 = vmatprep.subr.bf16.mxu0 %v4559_v38 }
0x16cb   :  { %3511 = vmatpush2.bf16.msra.mxu0 %v4557_v42 }
0x16cc   :  { %3512 = vmatprep.subr.bf16.mxu0 %v4562_v10 }
0x16cf   :  { %3513 = vmatpush2.bf16.msra.mxu0 %v4560_v52 }
0x16d0   :  { %3514 = vmatprep.subr.bf16.mxu0 %v4565_v54 }
0x16d3   :  { %3515 = vmatpush2.bf16.msra.mxu0 %v4563_v7 }
0x16d4   :  { %3516 = vmatprep.subr.bf16.mxu0 %v4568_v1 }
0x16d7   :  { %3517 = vmatpush2.bf16.msra.mxu0 %v4566_v20 }
0x175a   :  { %v2870_v62 = vpop.f32.mrf.mxu0 }
0x175b   :  { %v2871_v22 = vadd.f32 %v2870_v62, %v2669_v0 }
0x175c   :  { %v2872_v61 = vpop.f32.mrf.mxu0 }
0x175d   :  { %v2873_v53 = vadd.f32 %v2872_v61, %v2673_v8  ;;  %v2877_v2 = vmax.f32 %v2871_v22, 0.0  ;;  %v3563_v8 = vld [vmem:[%s6163_s3 + $0x4] ss:$0 sm:$0xff] }
0x175e   :  { %v2874_v56 = vpop.f32.mrf.mxu0 }
0x175f   :  { %v2878_v26 = vmax.f32 %v2873_v53, 0.0  ;;  %v3025_v33 = vpack.c.bf16 %v2877_v2, %v2877_v2 }
0x1760   :  { %v2875_v18 = vpop.f32.mrf.mxu0 }
0x1761   :  { %v3026_v9 = vpack.c.bf16 %v2878_v26, %v2878_v26 }
0x1763   :  { %3251 = vmatprep.mubr.bf16.mxu1 %v3026_v9 }
0x1764   :  { %3252 = vmatmul.mubr.bf16.vlgmr.msra.gmra.mxu1 %v3025_v33 }
0x1765   :  { %4213 = vmatpush3.bf16.msra.mxu1 %v4570_v5 }
0x1766   :  { %4214 = vmatprep.subr.bf16.mxu1 %v4571_v25 }
0x1769   :  { %4215 = vmatpush3.bf16.msra.mxu1 %v4572_v36 }
0x176a   :  { %4216 = vmatprep.subr.bf16.mxu1 %v4573_v17 }
0x176d   :  { %4217 = vmatpush3.bf16.msra.mxu1 %v4574_v13 }
0x176e   :  { %4218 = vmatprep.subr.bf16.mxu1 %v4575_v58 }
0x1771   :  { %4219 = vmatpush3.bf16.msra.mxu1 %v4576_v40 }
0x1772   :  { %4220 = vmatprep.subr.bf16.mxu1 %v4577_v39 }
0x1775   :  { %4221 = vmatpush3.bf16.msra.mxu1 %v4578_v23 }
0x1776   :  { %4222 = vmatprep.subr.bf16.mxu1 %v4579_v24 }
0x1779   :  { %4223 = vmatpush3.bf16.msra.mxu1 %v4580_v30 }
0x177a   :  { %4224 = vmatprep.subr.bf16.mxu1 %v4581_v11 }
0x177d   :  { %4225 = vmatpush3.bf16.msra.mxu1 %v4582_v41 }
0x1824   :  { %v3253_v37 = vpop.f32.mrf.mxu1 }
0x1825   :  { %v3260_v43 = vadd.f32 %v3253_v37, %v6133_v3  ;;  %v4583_v3 = vld [vmem:[#allocation2 + $0x620] ss:$8 sps:$4 sm:$0xff]  }
0x1826   :  { %v3255_v45 = vpop.f32.mrf.mxu1  ;;  %4226 = vmatprep.subr.bf16.mxu1 %v4583_v3 }
0x1827   :  { %v3275_v46 = vadd.f32 %v3268_v32, %v3260_v43  ;;  %v3261_v47 = vadd.f32 %v3255_v45, %v6135_v63  ;;  %4227 = vmatpush3.bf16.msra.mxu1 %v4584_v29  ;;  %v4072_v63 = vld [vmem:[%s6163_s3 + $0x3] ss:$8 sm:$0x3] }
0x1828   :  { %v3257_v48 = vpop.f32.mrf.mxu1  ;;  %v3319_v27 = vrot.slane %v4072_v63, %v5886_v57  ;;  %v3323_v31 = vrot.slane %v4072_v63, %v5890_v34 }
0x1829   :  { %v3276_v49 = vadd.f32 %v3272_v44, %v3261_v47  ;;  %v3277_v19 = vmax.f32 %v3275_v46, 0.0 }
0x182a   :  { %v3258_v12 = vpop.f32.mrf.mxu1 }
0x182b   :  { %v3278_v35 = vmax.f32 %v3276_v49, 0.0  ;;  %v3279_v60 = vpack.c.bf16 %v3277_v19, %v3277_v19 }
0x182d   :  { %v3280_v6 = vpack.c.bf16 %v3278_v35, %v3278_v35 }
0x182f   :  { %3518 = vmatprep.mubr.bf16.mxu0 %v3280_v6 }
0x1830   :  { %3519 = vmatmul.mubr.bf16.vlgmr.msra.gmra.mxu0 %v3279_v60 }
0x18f0   :  { %v3520_v16 = vpop.f32.mrf.mxu0 }
0x18f1   :  { %v3521_v55 = vadd.f32 %v3520_v16, %v3319_v27 }
0x18f2   :  { %v3522_v14 = vpop.f32.mrf.mxu0 }
0x18f3   :  { %v3523_v4 = vadd.f32 %v3522_v14, %v3323_v31  ;;  %v3527_v50 = vmax.f32 %v3521_v55, 0.0 }
0x18f4   :  { %v3524_v15 = vpop.f32.mrf.mxu0 }
0x18f5   :  { %v3528_v59 = vmax.f32 %v3523_v4, 0.0  ;;  %v3529_v21 = vpack.c.bf16 %v3527_v50, %v3527_v50 }
0x18f6   :  { %v3525_v38 = vpop.f32.mrf.mxu0 }
0x18f7   :  { %v3530_v42 = vpack.c.bf16 %v3528_v59, %v3528_v59 }
0x18f9   :  { %3692 = vmatprep.mubr.bf16.mxu1 %v3530_v42 }
0x18fa   :  { %3693 = vmatmul.mubr.bf16.vlgmr.msra.gmra.mxu1 %v3529_v21 }
0x19ba   :  { %v4228_v0 = vpop.f32.mrf.mxu1 }
0x19bc   :  { %v4229_v57 = vpop.f32.mrf.mxu1 }
0x19bd   :  { %v4230_v62 = vadd.f32 %v4229_v57, %v4228_v0 }
0x19be   :  { %v4231_v34 = vpop.f32.mrf.mxu1 }
0x19bf   :  { %v3695_v22 = vadd.f32 %v4230_v62, %v3563_v8 }
0x19c0   :  { %v4232_v61 = vpop.f32.mrf.mxu1 }
0x19c1   :  { %3700 = vst [vmem:[%s6164_s4] sm:$0xf] %v3695_v22 }
0x19c2   :  { %3705 = vsyncpa [#allocation3], 1 }

</bundles_post_ra>
